<compile_context>
chip_gen: v5e
topology: v5e:2x2
jax: 0.10.0
libtpu: 0.0.40
codegen_flags: <defaults>
</compile_context>

<pallas_src>
import functools
import math

import jax
import jax.numpy as jnp
from jax import lax
from jax.experimental import pallas as pl
from jax.experimental.pallas import tpu as pltpu

# ----------------------- config (mirrors the PyTorch `config`) -----------------------
VOCAB_SIZE = 32      # == EMBED_DIM so the reference's `logits.view(-1, embed_dim)` is well defined
EMBED_DIM = 32
NUM_HEADS = 4
HEAD_DIM = EMBED_DIM // NUM_HEADS
MAX_SEQ_LEN = 8      # pos_embedding (1, max_seq_len, E) broadcast requires seq_len == max_seq_len
DEPTH = 2
PAD_IDX = 0
LN_EPS = 1e-5
MLP_DIM = 4 * EMBED_DIM
# TODO(synk): nn.Dropout layers are treated as identity (inference / p=0); stochastic dropout
#             would need pltpu.prng_seed/prng_random_bits inside the kernel.

# Packed per-layer matrix slab wA[d] has 9*E columns; every sub-matrix starts lane-aligned:
#   [0   : 4E)  w1    (E, 4E)  MLP up-projection
#   [4E  : 7E)  wqkv  (E, 3E)  fused Q|K|V projection
#   [7E  : 8E)  zero padding (so wo starts on a 128-lane boundary)
#   [8E  : 9E)  wo    (E, E)   attention output projection
# Packed per-layer vector slab vecs[d] is (8, 128); each vector starts at lane 0 of its row:
ROW_LN1_W, ROW_LN1_B, ROW_BQKV, ROW_BO, ROW_LN2_W, ROW_LN2_B, ROW_B1, ROW_B2 = range(8)


# ----------------------------- in-kernel math helpers --------------------------------
def _layernorm(x, w, b, eps=LN_EPS):
    mu = jnp.mean(x, axis=-1, keepdims=True)
    var = jnp.mean((x - mu) * (x - mu), axis=-1, keepdims=True)
    return (x - mu) * jax.lax.rsqrt(var + eps) * w + b


def _erf(x):
    # Abramowitz & Stegun 7.1.26 polynomial, |err| < 1.5e-7 (fp32-level); nn.GELU (exact)
    # needs erf and lax.erf may not lower inside Mosaic.
    p = 0.3275911
    a1, a2, a3, a4, a5 = 0.254829592, -0.284496736, 1.421413741, -1.453152027, 1.061405429
    s = jnp.where(x < 0.0, -1.0, 1.0)
    ax = jnp.abs(x)
    t = 1.0 / (1.0 + p * ax)
    poly = ((((a5 * t + a4) * t + a3) * t + a2) * t + a1) * t
    return s * (1.0 - poly * jnp.exp(-ax * ax))


def _gelu_exact(x):
    return 0.5 * x * (1.0 + _erf(x * 0.7071067811865476))


# ------------------------------------ fused kernel ------------------------------------
def _gpt_fused_kernel(ints_ref, emb_ref, wa_ref, wb_ref, vec_ref, fin_ref,
                      logits_ref, loss_ref, *, depth, num_heads, scale):
    _, B, S = ints_ref.shape
    E = emb_ref.shape[1]
    V = emb_ref.shape[0] - S
    H = num_heads
    Dh = E // H
    N = B * S
    inv_scale = 1.0 / scale

    ids = ints_ref[0]                       # (B, S) int32 input token ids
    msk = ints_ref[1]                       # (B, S) int32 masks
    tgt = ints_ref[2]                       # (B, S) int32 target token ids

    emb_tbl = emb_ref[...]                  # (V + S, E)
    tok_tbl = emb_tbl[0:V, :]               # (V, E) token table (pad row pre-zeroed)
    pos_emb = emb_tbl[V:V + S, :]           # (S, E) positional embedding

    # ---- embedding gather done in-kernel as a one-hot (N,V)@(V,E) matmul ----
    onehot = (lax.broadcasted_iota(jnp.int32, (B, S, V), 2) ==
              ids[:, :, None]).astype(jnp.float32)
    tok = jnp.dot(onehot.reshape(N, V), tok_tbl, preferred_element_type=jnp.float32)
    emb = tok.reshape(B, S, E) + pos_emb[None, :, :]
    # reference: embedding.masked_fill(masks.unsqueeze(-1)..., 0) -> zero where mask != 0
    h = jnp.where(msk[:, :, None] != 0, 0.0, emb)                     # (B, S, E)

    # ---- causal mask as an additive bias, built ONCE and reused by every layer ----
    row = lax.broadcasted_iota(jnp.int32, (S, S), 0)
    col = lax.broadcasted_iota(jnp.int32, (S, S), 1)
    causal_bias = jnp.where(row >= col, 0.0, -1e30)[None, :, :]       # (1, S, S)

    # ---- transformer blocks (DEPTH is static -> unrolled) ----
    for d in range(depth):
        wa = wa_ref[d]                                                # (E, 9E)
        w1 = wa[:, 0:4 * E]
        wqkv = wa[:, 4 * E:7 * E]
        wo = wa[:, 8 * E:9 * E]
        w2 = wb_ref[d]                                                # (4E, E)
        vec = vec_ref[d]                                              # (8, 128)
        ln1_w = vec[ROW_LN1_W:ROW_LN1_W + 1, 0:E]
        ln1_b = vec[ROW_LN1_B:ROW_LN1_B + 1, 0:E]
        bqkv = vec[ROW_BQKV:ROW_BQKV + 1, 0:3 * E]
        bo = vec[ROW_BO:ROW_BO + 1, 0:E]
        ln2_w = vec[ROW_LN2_W:ROW_LN2_W + 1, 0:E]
        ln2_b = vec[ROW_LN2_B:ROW_LN2_B + 1, 0:E]
        b1 = vec[ROW_B1:ROW_B1 + 1, 0:4 * E]
        b2 = vec[ROW_B2:ROW_B2 + 1, 0:E]

        x = h.reshape(N, E)                                           # fold batch into sublanes
        ln1 = _layernorm(x, ln1_w, ln1_b)

        # fused QKV projection: one (N,E)@(E,3E) matmul + one bias add
        qkv = jnp.dot(ln1, wqkv, preferred_element_type=jnp.float32) + bqkv
        q3 = qkv[:, 0:E].reshape(B, S, E)
        k3 = qkv[:, E:2 * E].reshape(B, S, E)
        v3 = qkv[:, 2 * E:3 * E].reshape(B, S, E)

        # stack heads on the (cheap) leading axis -> (H*B, S, Dh); index order is h*B + b
        qh = jnp.concatenate([q3[:, :, i * Dh:(i + 1) * Dh] for i in range(H)], axis=0)
        kh = jnp.concatenate([k3[:, :, i * Dh:(i + 1) * Dh] for i in range(H)], axis=0)
        vh = jnp.concatenate([v3[:, :, i * Dh:(i + 1) * Dh] for i in range(H)], axis=0)

        # all heads at once: two batched einsums + a single softmax
        s = jnp.einsum('bqd,bkd->bqk', qh, kh,
                       preferred_element_type=jnp.float32) * inv_scale
        s = s + causal_bias
        s = s - jnp.max(s, axis=-1, keepdims=True)
        p = jnp.exp(s)
        p = p / jnp.sum(p, axis=-1, keepdims=True)    # exact divide: parity with F.softmax
        o = jnp.einsum('bqk,bkd->bqd', p, vh,
                       preferred_element_type=jnp.float32)            # (H*B, S, Dh)

        # put head i back at lane columns [i*Dh, (i+1)*Dh) -> (N, E)
        o = jnp.concatenate([o[i * B:(i + 1) * B] for i in range(H)],
                            axis=-1).reshape(N, E)
        attn = jnp.dot(o, wo, preferred_element_type=jnp.float32) + bo

        h1 = x + attn                                                 # residual (resid_drop == id)

        ln2 = _layernorm(h1, ln2_w, ln2_b)
        m = jnp.dot(ln2, w1, preferred_element_type=jnp.float32) + b1
        m = _gelu_exact(m)
        m = jnp.dot(m, w2, preferred_element_type=jnp.float32) + b2
        h = (h1 + m).reshape(B, S, E)                                 # residual

    # ---- final LN + token prediction head (no bias) ----
    fin = fin_ref[...]                                                # (E + 2, V); V == E
    w_head = fin[0:E, :]                                              # (E, V)
    lnf_w = fin[E:E + 1, 0:E]
    lnf_b = fin[E + 1:E + 2, 0:E]
    xf = _layernorm(h.reshape(N, E), lnf_w, lnf_b)
    logits3 = jnp.dot(xf, w_head, preferred_element_type=jnp.float32).reshape(B, S, V)
    logits_ref[...] = logits3

    # ---- loss: per-token CE, zeroed where mask == 0, mean over ALL B*S tokens
    #      (matches F.cross_entropy(reduction='none') -> masked_fill(mask==0,0) -> mean()) ----
    mx = jnp.max(logits3, axis=-1, keepdims=True)
    lse = jnp.log(jnp.sum(jnp.exp(logits3 - mx), axis=-1, keepdims=True)) + mx
    vocab_ids = lax.broadcasted_iota(jnp.int32, (B, S, V), 2)
    tgt_onehot = (vocab_ids == tgt[:, :, None]).astype(jnp.float32)
    tgt_logit = jnp.sum(logits3 * tgt_onehot, axis=-1, keepdims=True)
    per_tok = lse - tgt_logit
    per_tok = jnp.where(msk[:, :, None] == 0, 0.0, per_tok)
    loss_ref[...] = (jnp.sum(per_tok) * (1.0 / float(N))) * jnp.ones((1, 1), jnp.float32)


# ------------------------------- pallas_call wrapper -----------------------------------
def gpt_fused_forward(ints, params):
    _, B, S = ints.shape
    V = VOCAB_SIZE
    kernel = functools.partial(_gpt_fused_kernel, depth=DEPTH, num_heads=NUM_HEADS,
                               scale=math.sqrt(EMBED_DIM))   # reference scales by sqrt(embed_dim)
    vmem = pl.BlockSpec(memory_space=pltpu.MemorySpace.VMEM)
    # Single program, no grid: ~120 KB resident easily fits VMEM on v5e/v6e/v7x. A
    # batch-parallel grid for v7x's second TensorCore was evaluated but at B=2 the
    # cross-batch loss mean would need extra finalize glue that outweighs the win.
    logits, loss = pl.pallas_call(
        kernel,
        out_shape=(jax.ShapeDtypeStruct((B, S, V), jnp.float32),
                   jax.ShapeDtypeStruct((1, 1), jnp.float32)),
        in_specs=[vmem] * 6,
        out_specs=(vmem, vmem),
    )(ints, params["emb_tbl"], params["wA"], params["wB"], params["vecs"], params["final"])
    return logits, loss[0, 0]


# ------------------------------------ full model ---------------------------------------
def gpt_forward(params, idx_sequences, masks):
    # Reproduces GPT.forward, including the reference's batch-dim slicing:
    # inputs = idx_sequences[:-1], targets = idx_sequences[1:]  (slices dim 0).
    inputs = idx_sequences[:-1].astype(jnp.int32)
    targets = idx_sequences[1:].astype(jnp.int32)
    ints = jnp.stack([inputs, masks.astype(jnp.int32), targets], axis=0)   # (3, B, S)
    return gpt_fused_forward(ints, params)


def init_params(key):
    ks = iter(jax.random.split(key, 64))

    def nrm(shape, scale=0.02):
        return (scale * jax.random.normal(next(ks), shape)).astype(jnp.float32)

    E, V, S, D, M = EMBED_DIM, VOCAB_SIZE, MAX_SEQ_LEN, DEPTH, MLP_DIM

    def row128(v):                       # pad a 1-D vector to a 128-lane row
        return jnp.pad(v, (0, M - v.shape[0]))[None, :]

    # embedding table: token rows (pad row zeroed, as nn.Embedding(padding_idx)) + pos rows
    tok_emb = nrm((V, E)).at[PAD_IDX].set(0.0)
    pos_emb = nrm((S, E))
    emb_tbl = jnp.concatenate([tok_emb, pos_emb], axis=0)             # (V + S, E)

    wA, wB, vecs = [], [], []
    for _ in range(D):
        wq, bq = nrm((E, E)), nrm((E,))
        wk, bk = nrm((E, E)), nrm((E,))
        wv, bv = nrm((E, E)), nrm((E,))
        wo, bo = nrm((E, E)), nrm((E,))
        w1, b1 = nrm((E, M)), nrm((M,))
        w2, b2 = nrm((M, E)), nrm((E,))
        ln1_w = jnp.ones((E,), jnp.float32) + nrm((E,), 0.01)
        ln1_b = nrm((E,), 0.01)
        ln2_w = jnp.ones((E,), jnp.float32) + nrm((E,), 0.01)
        ln2_b = nrm((E,), 0.01)

        wqkv = jnp.concatenate([wq, wk, wv], axis=1)                  # (E, 3E) fused QKV
        pad = jnp.zeros((E, E), jnp.float32)                          # lane-align wo at 8E
        wA.append(jnp.concatenate([w1, wqkv, pad, wo], axis=1))       # (E, 9E)
        wB.append(w2)                                                 # (4E, E)
        vecs.append(jnp.concatenate(
            [row128(ln1_w), row128(ln1_b), row128(jnp.concatenate([bq, bk, bv])),
             row128(bo), row128(ln2_w), row128(ln2_b), row128(b1), row128(b2)],
            axis=0))                                                  # (8, 128)

    ln_f_w = jnp.ones((E,), jnp.float32) + nrm((E,), 0.01)
    ln_f_b = nrm((E,), 0.01)
    w_head = nrm((E, V))
    final = jnp.concatenate([w_head, ln_f_w[None, :], ln_f_b[None, :]], axis=0)  # (E+2, V)

    return dict(emb_tbl=emb_tbl,
                wA=jnp.stack(wA, axis=0),        # (D, E, 9E)
                wB=jnp.stack(wB, axis=0),        # (D, 4E, E)
                vecs=jnp.stack(vecs, axis=0),    # (D, 8, 128)
                final=final)                     # (E+2, V)


if __name__ == "__main__":
    key = jax.random.PRNGKey(0)
    pkey, dkey, mkey = jax.random.split(key, 3)
    params = init_params(pkey)

    n_seqs = 3                                  # idx_sequences[:-1] -> effective batch of 2
    idx_sequences = jax.random.randint(dkey, (n_seqs, MAX_SEQ_LEN), 0, VOCAB_SIZE,
                                       dtype=jnp.int32)
    masks = jax.random.randint(mkey, (n_seqs - 1, MAX_SEQ_LEN), 0, 2, dtype=jnp.int32)

    logits, loss = gpt_forward(params, idx_sequences, masks)
    jax.block_until_ready((logits, loss))
    assert logits.shape == (n_seqs - 1, MAX_SEQ_LEN, VOCAB_SIZE)
    assert loss.shape == ()
    print("KERNEL_OK")
</pallas_src>

<mosaic_0001>
module attributes {stable_mosaic.version = 11 : i64} {
  func.func @_gpt_fused_kernel(%arg0: memref<3x2x8xi32, #tpu.memory_space<vmem>>, %arg1: memref<40x32xf32, #tpu.memory_space<vmem>>, %arg2: memref<2x32x288xf32, #tpu.memory_space<vmem>>, %arg3: memref<2x128x32xf32, #tpu.memory_space<vmem>>, %arg4: memref<2x8x128xf32, #tpu.memory_space<vmem>>, %arg5: memref<34x32xf32, #tpu.memory_space<vmem>>, %arg6: memref<2x8x32xf32, #tpu.memory_space<vmem>>, %arg7: memref<1x1xf32, #tpu.memory_space<vmem>>) attributes {dimension_semantics = [], scalar_prefetch = 0 : i64, scratch_operands = 0 : i64, tpu.core_type = #tpu.core_type<tc>} {
    %c0 = arith.constant 0 : index
    %c0_0 = arith.constant 0 : index
    %c0_1 = arith.constant 0 : index
    %0 = vector.load %arg0[%c0, %c0_0, %c0_1] : memref<3x2x8xi32, #tpu.memory_space<vmem>>, vector<1x2x8xi32>
    %1 = vector.shape_cast %0 : vector<1x2x8xi32> to vector<2x8xi32>
    %c1 = arith.constant 1 : index
    %c0_2 = arith.constant 0 : index
    %c0_3 = arith.constant 0 : index
    %2 = vector.load %arg0[%c1, %c0_2, %c0_3] : memref<3x2x8xi32, #tpu.memory_space<vmem>>, vector<1x2x8xi32>
    %3 = vector.shape_cast %2 : vector<1x2x8xi32> to vector<2x8xi32>
    %c2 = arith.constant 2 : index
    %c0_4 = arith.constant 0 : index
    %c0_5 = arith.constant 0 : index
    %4 = vector.load %arg0[%c2, %c0_4, %c0_5] : memref<3x2x8xi32, #tpu.memory_space<vmem>>, vector<1x2x8xi32>
    %5 = vector.shape_cast %4 : vector<1x2x8xi32> to vector<2x8xi32>
    %c0_6 = arith.constant 0 : index
    %c0_7 = arith.constant 0 : index
    %6 = vector.load %arg1[%c0_6, %c0_7] : memref<40x32xf32, #tpu.memory_space<vmem>>, vector<40x32xf32>
    %7 = vector.extract_strided_slice %6 {offsets = [0, 0], sizes = [32, 32], strides = [1, 1]} : vector<40x32xf32> to vector<32x32xf32>
    %8 = vector.extract_strided_slice %6 {offsets = [32, 0], sizes = [8, 32], strides = [1, 1]} : vector<40x32xf32> to vector<8x32xf32>
    %9 = tpu.iota {dimensions = array<i32: 2>} : vector<2x8x32xi32>
    %10 = vector.shape_cast %1 : vector<2x8xi32> to vector<2x8x1xi32>
    %11 = vector.broadcast %10 : vector<2x8x1xi32> to vector<2x8x32xi32>
    %12 = arith.cmpi eq, %9, %11 : vector<2x8x32xi32>
    %13 = arith.extui %12 : vector<2x8x32xi1> to vector<2x8x32xi32>
    %14 = arith.sitofp %13 : vector<2x8x32xi32> to vector<2x8x32xf32>
    %15 = vector.shape_cast %14 : vector<2x8x32xf32> to vector<16x32xf32>
    %cst = arith.constant dense<0.000000e+00> : vector<16x32xf32>
    %16 = tpu.matmul %15, %7, %cst {dimension_numbers = #tpu.dot_dimension_numbers<[1], [0], [0], [1], [0, 0, 1, 1], [], []>} : vector<16x32xf32>, vector<32x32xf32>, vector<16x32xf32> -> vector<16x32xf32>
    %17 = vector.shape_cast %16 : vector<16x32xf32> to vector<2x8x32xf32>
    %18 = vector.shape_cast %8 : vector<8x32xf32> to vector<1x8x32xf32>
    %19 = vector.broadcast %18 : vector<1x8x32xf32> to vector<2x8x32xf32>
    %20 = arith.addf %17, %19 : vector<2x8x32xf32>
    %21 = vector.shape_cast %3 : vector<2x8xi32> to vector<2x8x1xi32>
    %c0_i32 = arith.constant 0 : i32
    %22 = vector.broadcast %c0_i32 : i32 to vector<2x8x1xi32>
    %23 = arith.cmpi ne, %21, %22 : vector<2x8x1xi32>
    %cst_8 = arith.constant 0.000000e+00 : f32
    %24 = vector.shape_cast %23 : vector<2x8x1xi1> to vector<2x8x1xi1>
    %25 = vector.broadcast %24 : vector<2x8x1xi1> to vector<2x8x32xi1>
    %26 = vector.broadcast %cst_8 : f32 to vector<2x8x32xf32>
    %27 = arith.select %25, %26, %20 : vector<2x8x32xi1>, vector<2x8x32xf32>
    %28 = tpu.iota {dimensions = array<i32: 0>} : vector<8x8xi32>
    %29 = tpu.iota {dimensions = array<i32: 1>} : vector<8x8xi32>
    %30 = arith.cmpi sge, %28, %29 : vector<8x8xi32>
    %cst_9 = arith.constant 0.000000e+00 : f32
    %cst_10 = arith.constant -1.000000e+30 : f32
    %31 = vector.broadcast %cst_9 : f32 to vector<8x8xf32>
    %32 = vector.broadcast %cst_10 : f32 to vector<8x8xf32>
    %33 = arith.select %30, %31, %32 : vector<8x8xi1>, vector<8x8xf32>
    %34 = vector.shape_cast %33 : vector<8x8xf32> to vector<1x8x8xf32>
    %c0_11 = arith.constant 0 : index
    %c0_12 = arith.constant 0 : index
    %c0_13 = arith.constant 0 : index
    %35 = vector.load %arg2[%c0_11, %c0_12, %c0_13] : memref<2x32x288xf32, #tpu.memory_space<vmem>>, vector<1x32x288xf32>
    %36 = vector.shape_cast %35 : vector<1x32x288xf32> to vector<32x288xf32>
    %37 = vector.extract_strided_slice %36 {offsets = [0, 0], sizes = [32, 128], strides = [1, 1]} : vector<32x288xf32> to vector<32x128xf32>
    %38 = vector.extract_strided_slice %36 {offsets = [0, 128], sizes = [32, 96], strides = [1, 1]} : vector<32x288xf32> to vector<32x96xf32>
    %39 = vector.extract_strided_slice %36 {offsets = [0, 256], sizes = [32, 32], strides = [1, 1]} : vector<32x288xf32> to vector<32x32xf32>
    %c0_14 = arith.constant 0 : index
    %c0_15 = arith.constant 0 : index
    %c0_16 = arith.constant 0 : index
    %40 = vector.load %arg3[%c0_14, %c0_15, %c0_16] : memref<2x128x32xf32, #tpu.memory_space<vmem>>, vector<1x128x32xf32>
    %41 = vector.shape_cast %40 : vector<1x128x32xf32> to vector<128x32xf32>
    %c0_17 = arith.constant 0 : index
    %c0_18 = arith.constant 0 : index
    %c0_19 = arith.constant 0 : index
    %42 = vector.load %arg4[%c0_17, %c0_18, %c0_19] : memref<2x8x128xf32, #tpu.memory_space<vmem>>, vector<1x8x128xf32>
    %43 = vector.shape_cast %42 : vector<1x8x128xf32> to vector<8x128xf32>
    %44 = vector.extract_strided_slice %43 {offsets = [0, 0], sizes = [1, 32], strides = [1, 1]} : vector<8x128xf32> to vector<1x32xf32>
    %45 = vector.extract_strided_slice %43 {offsets = [1, 0], sizes = [1, 32], strides = [1, 1]} : vector<8x128xf32> to vector<1x32xf32>
    %46 = vector.extract_strided_slice %43 {offsets = [2, 0], sizes = [1, 96], strides = [1, 1]} : vector<8x128xf32> to vector<1x96xf32>
    %47 = vector.extract_strided_slice %43 {offsets = [3, 0], sizes = [1, 32], strides = [1, 1]} : vector<8x128xf32> to vector<1x32xf32>
    %48 = vector.extract_strided_slice %43 {offsets = [4, 0], sizes = [1, 32], strides = [1, 1]} : vector<8x128xf32> to vector<1x32xf32>
    %49 = vector.extract_strided_slice %43 {offsets = [5, 0], sizes = [1, 32], strides = [1, 1]} : vector<8x128xf32> to vector<1x32xf32>
    %50 = vector.extract_strided_slice %43 {offsets = [6, 0], sizes = [1, 128], strides = [1, 1]} : vector<8x128xf32> to vector<1x128xf32>
    %51 = vector.extract_strided_slice %43 {offsets = [7, 0], sizes = [1, 32], strides = [1, 1]} : vector<8x128xf32> to vector<1x32xf32>
    %52 = vector.shape_cast %27 : vector<2x8x32xf32> to vector<16x32xf32>
    %cst_20 = arith.constant dense<0.000000e+00> : vector<16xf32>
    %53 = vector.multi_reduction <add>, %52, %cst_20 [1] : vector<16x32xf32> to vector<16xf32>
    %54 = vector.shape_cast %53 : vector<16xf32> to vector<16x1xf32>
    %cst_21 = arith.constant 3.200000e+01 : f32
    %55 = vector.broadcast %cst_21 : f32 to vector<16x1xf32>
    %56 = arith.divf %54, %55 : vector<16x1xf32>
    %57 = vector.broadcast %56 : vector<16x1xf32> to vector<16x32xf32>
    %58 = arith.subf %52, %57 : vector<16x32xf32>
    %59 = vector.broadcast %56 : vector<16x1xf32> to vector<16x32xf32>
    %60 = arith.subf %52, %59 : vector<16x32xf32>
    %61 = arith.mulf %58, %60 : vector<16x32xf32>
    %cst_22 = arith.constant dense<0.000000e+00> : vector<16xf32>
    %62 = vector.multi_reduction <add>, %61, %cst_22 [1] : vector<16x32xf32> to vector<16xf32>
    %63 = vector.shape_cast %62 : vector<16xf32> to vector<16x1xf32>
    %cst_23 = arith.constant 3.200000e+01 : f32
    %64 = vector.broadcast %cst_23 : f32 to vector<16x1xf32>
    %65 = arith.divf %63, %64 : vector<16x1xf32>
    %66 = vector.broadcast %56 : vector<16x1xf32> to vector<16x32xf32>
    %67 = arith.subf %52, %66 : vector<16x32xf32>
    %cst_24 = arith.constant 9.99999974E-6 : f32
    %68 = vector.broadcast %cst_24 : f32 to vector<16x1xf32>
    %69 = arith.addf %65, %68 : vector<16x1xf32>
    %70 = math.rsqrt %69 : vector<16x1xf32>
    %71 = vector.broadcast %70 : vector<16x1xf32> to vector<16x32xf32>
    %72 = arith.mulf %67, %71 : vector<16x32xf32>
    %73 = vector.broadcast %44 : vector<1x32xf32> to vector<16x32xf32>
    %74 = arith.mulf %72, %73 : vector<16x32xf32>
    %75 = vector.broadcast %45 : vector<1x32xf32> to vector<16x32xf32>
    %76 = arith.addf %74, %75 : vector<16x32xf32>
    %cst_25 = arith.constant dense<0.000000e+00> : vector<16x96xf32>
    %77 = tpu.matmul %76, %38, %cst_25 {dimension_numbers = #tpu.dot_dimension_numbers<[1], [0], [0], [1], [0, 0, 1, 1], [], []>} : vector<16x32xf32>, vector<32x96xf32>, vector<16x96xf32> -> vector<16x96xf32>
    %78 = vector.broadcast %46 : vector<1x96xf32> to vector<16x96xf32>
    %79 = arith.addf %77, %78 : vector<16x96xf32>
    %80 = vector.extract_strided_slice %79 {offsets = [0, 0], sizes = [16, 32], strides = [1, 1]} : vector<16x96xf32> to vector<16x32xf32>
    %81 = vector.shape_cast %80 : vector<16x32xf32> to vector<2x8x32xf32>
    %82 = vector.extract_strided_slice %79 {offsets = [0, 32], sizes = [16, 32], strides = [1, 1]} : vector<16x96xf32> to vector<16x32xf32>
    %83 = vector.shape_cast %82 : vector<16x32xf32> to vector<2x8x32xf32>
    %84 = vector.extract_strided_slice %79 {offsets = [0, 64], sizes = [16, 32], strides = [1, 1]} : vector<16x96xf32> to vector<16x32xf32>
    %85 = vector.shape_cast %84 : vector<16x32xf32> to vector<2x8x32xf32>
    %86 = vector.extract_strided_slice %81 {offsets = [0, 0, 0], sizes = [2, 8, 8], strides = [1, 1, 1]} : vector<2x8x32xf32> to vector<2x8x8xf32>
    %87 = vector.extract_strided_slice %81 {offsets = [0, 0, 8], sizes = [2, 8, 8], strides = [1, 1, 1]} : vector<2x8x32xf32> to vector<2x8x8xf32>
    %88 = vector.extract_strided_slice %81 {offsets = [0, 0, 16], sizes = [2, 8, 8], strides = [1, 1, 1]} : vector<2x8x32xf32> to vector<2x8x8xf32>
    %89 = vector.extract_strided_slice %81 {offsets = [0, 0, 24], sizes = [2, 8, 8], strides = [1, 1, 1]} : vector<2x8x32xf32> to vector<2x8x8xf32>
    %90 = tpu.concatenate %86, %87, %88, %89 in 0 : vector<2x8x8xf32>, vector<2x8x8xf32>, vector<2x8x8xf32>, vector<2x8x8xf32> -> vector<8x8x8xf32>
    %91 = vector.extract_strided_slice %83 {offsets = [0, 0, 0], sizes = [2, 8, 8], strides = [1, 1, 1]} : vector<2x8x32xf32> to vector<2x8x8xf32>
    %92 = vector.extract_strided_slice %83 {offsets = [0, 0, 8], sizes = [2, 8, 8], strides = [1, 1, 1]} : vector<2x8x32xf32> to vector<2x8x8xf32>
    %93 = vector.extract_strided_slice %83 {offsets = [0, 0, 16], sizes = [2, 8, 8], strides = [1, 1, 1]} : vector<2x8x32xf32> to vector<2x8x8xf32>
    %94 = vector.extract_strided_slice %83 {offsets = [0, 0, 24], sizes = [2, 8, 8], strides = [1, 1, 1]} : vector<2x8x32xf32> to vector<2x8x8xf32>
    %95 = tpu.concatenate %91, %92, %93, %94 in 0 : vector<2x8x8xf32>, vector<2x8x8xf32>, vector<2x8x8xf32>, vector<2x8x8xf32> -> vector<8x8x8xf32>
    %96 = vector.extract_strided_slice %85 {offsets = [0, 0, 0], sizes = [2, 8, 8], strides = [1, 1, 1]} : vector<2x8x32xf32> to vector<2x8x8xf32>
    %97 = vector.extract_strided_slice %85 {offsets = [0, 0, 8], sizes = [2, 8, 8], strides = [1, 1, 1]} : vector<2x8x32xf32> to vector<2x8x8xf32>
    %98 = vector.extract_strided_slice %85 {offsets = [0, 0, 16], sizes = [2, 8, 8], strides = [1, 1, 1]} : vector<2x8x32xf32> to vector<2x8x8xf32>
    %99 = vector.extract_strided_slice %85 {offsets = [0, 0, 24], sizes = [2, 8, 8], strides = [1, 1, 1]} : vector<2x8x32xf32> to vector<2x8x8xf32>
    %100 = tpu.concatenate %96, %97, %98, %99 in 0 : vector<2x8x8xf32>, vector<2x8x8xf32>, vector<2x8x8xf32>, vector<2x8x8xf32> -> vector<8x8x8xf32>
    "tpu.trace_start"() <{level = 10 : i32, message = "bqd,bkd->bqk"}> : () -> ()
    %cst_26 = arith.constant dense<0.000000e+00> : vector<8x8x8xf32>
    %101 = tpu.matmul %90, %95, %cst_26 {dimension_numbers = #tpu.dot_dimension_numbers<[2], [2], [1], [1], [0, 0, 0, 1, 1, 1], [0], [0]>} : vector<8x8x8xf32>, vector<8x8x8xf32>, vector<8x8x8xf32> -> vector<8x8x8xf32>
    "tpu.trace_stop"() : () -> ()
    %cst_27 = arith.constant 0.176776692 : f32
    %102 = vector.broadcast %cst_27 : f32 to vector<8x8x8xf32>
    %103 = arith.mulf %101, %102 : vector<8x8x8xf32>
    %104 = vector.broadcast %34 : vector<1x8x8xf32> to vector<8x8x8xf32>
    %105 = arith.addf %103, %104 : vector<8x8x8xf32>
    %cst_28 = arith.constant dense<0xFF800000> : vector<8x8xf32>
    %106 = vector.multi_reduction <maximumf>, %105, %cst_28 [2] : vector<8x8x8xf32> to vector<8x8xf32>
    %107 = vector.shape_cast %106 : vector<8x8xf32> to vector<8x8x1xf32>
    %108 = vector.broadcast %107 : vector<8x8x1xf32> to vector<8x8x8xf32>
    %109 = arith.subf %105, %108 : vector<8x8x8xf32>
    %110 = math.exp %109 : vector<8x8x8xf32>
    %cst_29 = arith.constant dense<0.000000e+00> : vector<8x8xf32>
    %111 = vector.multi_reduction <add>, %110, %cst_29 [2] : vector<8x8x8xf32> to vector<8x8xf32>
    %112 = vector.shape_cast %111 : vector<8x8xf32> to vector<8x8x1xf32>
    %113 = vector.broadcast %112 : vector<8x8x1xf32> to vector<8x8x8xf32>
    %114 = arith.divf %110, %113 : vector<8x8x8xf32>
    "tpu.trace_start"() <{level = 10 : i32, message = "bqk,bkd->bqd"}> : () -> ()
    %cst_30 = arith.constant dense<0.000000e+00> : vector<8x8x8xf32>
    %115 = tpu.matmul %114, %100, %cst_30 {dimension_numbers = #tpu.dot_dimension_numbers<[2], [1], [1], [2], [0, 0, 0, 1, 1, 2], [0], [0]>} : vector<8x8x8xf32>, vector<8x8x8xf32>, vector<8x8x8xf32> -> vector<8x8x8xf32>
    "tpu.trace_stop"() : () -> ()
    %116 = vector.extract_strided_slice %115 {offsets = [0, 0, 0], sizes = [2, 8, 8], strides = [1, 1, 1]} : vector<8x8x8xf32> to vector<2x8x8xf32>
    %117 = vector.extract_strided_slice %115 {offsets = [2, 0, 0], sizes = [2, 8, 8], strides = [1, 1, 1]} : vector<8x8x8xf32> to vector<2x8x8xf32>
    %118 = vector.extract_strided_slice %115 {offsets = [4, 0, 0], sizes = [2, 8, 8], strides = [1, 1, 1]} : vector<8x8x8xf32> to vector<2x8x8xf32>
    %119 = vector.extract_strided_slice %115 {offsets = [6, 0, 0], sizes = [2, 8, 8], strides = [1, 1, 1]} : vector<8x8x8xf32> to vector<2x8x8xf32>
    %120 = tpu.concatenate %116, %117, %118, %119 in 2 : vector<2x8x8xf32>, vector<2x8x8xf32>, vector<2x8x8xf32>, vector<2x8x8xf32> -> vector<2x8x32xf32>
    %121 = vector.shape_cast %120 : vector<2x8x32xf32> to vector<16x32xf32>
    %cst_31 = arith.constant dense<0.000000e+00> : vector<16x32xf32>
    %122 = tpu.matmul %121, %39, %cst_31 {dimension_numbers = #tpu.dot_dimension_numbers<[1], [0], [0], [1], [0, 0, 1, 1], [], []>} : vector<16x32xf32>, vector<32x32xf32>, vector<16x32xf32> -> vector<16x32xf32>
    %123 = vector.broadcast %47 : vector<1x32xf32> to vector<16x32xf32>
    %124 = arith.addf %122, %123 : vector<16x32xf32>
    %125 = arith.addf %52, %124 : vector<16x32xf32>
    %cst_32 = arith.constant dense<0.000000e+00> : vector<16xf32>
    %126 = vector.multi_reduction <add>, %125, %cst_32 [1] : vector<16x32xf32> to vector<16xf32>
    %127 = vector.shape_cast %126 : vector<16xf32> to vector<16x1xf32>
    %cst_33 = arith.constant 3.200000e+01 : f32
    %128 = vector.broadcast %cst_33 : f32 to vector<16x1xf32>
    %129 = arith.divf %127, %128 : vector<16x1xf32>
    %130 = vector.broadcast %129 : vector<16x1xf32> to vector<16x32xf32>
    %131 = arith.subf %125, %130 : vector<16x32xf32>
    %132 = vector.broadcast %129 : vector<16x1xf32> to vector<16x32xf32>
    %133 = arith.subf %125, %132 : vector<16x32xf32>
    %134 = arith.mulf %131, %133 : vector<16x32xf32>
    %cst_34 = arith.constant dense<0.000000e+00> : vector<16xf32>
    %135 = vector.multi_reduction <add>, %134, %cst_34 [1] : vector<16x32xf32> to vector<16xf32>
    %136 = vector.shape_cast %135 : vector<16xf32> to vector<16x1xf32>
    %cst_35 = arith.constant 3.200000e+01 : f32
    %137 = vector.broadcast %cst_35 : f32 to vector<16x1xf32>
    %138 = arith.divf %136, %137 : vector<16x1xf32>
    %139 = vector.broadcast %129 : vector<16x1xf32> to vector<16x32xf32>
    %140 = arith.subf %125, %139 : vector<16x32xf32>
    %cst_36 = arith.constant 9.99999974E-6 : f32
    %141 = vector.broadcast %cst_36 : f32 to vector<16x1xf32>
    %142 = arith.addf %138, %141 : vector<16x1xf32>
    %143 = math.rsqrt %142 : vector<16x1xf32>
    %144 = vector.broadcast %143 : vector<16x1xf32> to vector<16x32xf32>
    %145 = arith.mulf %140, %144 : vector<16x32xf32>
    %146 = vector.broadcast %48 : vector<1x32xf32> to vector<16x32xf32>
    %147 = arith.mulf %145, %146 : vector<16x32xf32>
    %148 = vector.broadcast %49 : vector<1x32xf32> to vector<16x32xf32>
    %149 = arith.addf %147, %148 : vector<16x32xf32>
    %cst_37 = arith.constant dense<0.000000e+00> : vector<16x128xf32>
    %150 = tpu.matmul %149, %37, %cst_37 {dimension_numbers = #tpu.dot_dimension_numbers<[1], [0], [0], [1], [0, 0, 1, 1], [], []>} : vector<16x32xf32>, vector<32x128xf32>, vector<16x128xf32> -> vector<16x128xf32>
    %151 = vector.broadcast %50 : vector<1x128xf32> to vector<16x128xf32>
    %152 = arith.addf %150, %151 : vector<16x128xf32>
    %cst_38 = arith.constant 5.000000e-01 : f32
    %153 = vector.broadcast %cst_38 : f32 to vector<16x128xf32>
    %154 = arith.mulf %153, %152 : vector<16x128xf32>
    %cst_39 = arith.constant 0.707106769 : f32
    %155 = vector.broadcast %cst_39 : f32 to vector<16x128xf32>
    %156 = arith.mulf %152, %155 : vector<16x128xf32>
    %cst_40 = arith.constant 0.000000e+00 : f32
    %157 = vector.broadcast %cst_40 : f32 to vector<16x128xf32>
    %158 = arith.cmpf olt, %156, %157 : vector<16x128xf32>
    %cst_41 = arith.constant -1.000000e+00 : f32
    %cst_42 = arith.constant 1.000000e+00 : f32
    %159 = vector.broadcast %cst_41 : f32 to vector<16x128xf32>
    %160 = vector.broadcast %cst_42 : f32 to vector<16x128xf32>
    %161 = arith.select %158, %159, %160 : vector<16x128xi1>, vector<16x128xf32>
    %162 = math.absf %156 : vector<16x128xf32>
    %cst_43 = arith.constant 0.327591091 : f32
    %163 = vector.broadcast %cst_43 : f32 to vector<16x128xf32>
    %164 = arith.mulf %163, %162 : vector<16x128xf32>
    %cst_44 = arith.constant 1.000000e+00 : f32
    %165 = vector.broadcast %cst_44 : f32 to vector<16x128xf32>
    %166 = arith.addf %165, %164 : vector<16x128xf32>
    %cst_45 = arith.constant 1.000000e+00 : f32
    %167 = vector.broadcast %cst_45 : f32 to vector<16x128xf32>
    %168 = arith.divf %167, %166 : vector<16x128xf32>
    %cst_46 = arith.constant 1.06140542 : f32
    %169 = vector.broadcast %cst_46 : f32 to vector<16x128xf32>
    %170 = arith.mulf %169, %168 : vector<16x128xf32>
    %cst_47 = arith.constant -1.45315206 : f32
    %171 = vector.broadcast %cst_47 : f32 to vector<16x128xf32>
    %172 = arith.addf %170, %171 : vector<16x128xf32>
    %173 = arith.mulf %172, %168 : vector<16x128xf32>
    %cst_48 = arith.constant 1.42141378 : f32
    %174 = vector.broadcast %cst_48 : f32 to vector<16x128xf32>
    %175 = arith.addf %173, %174 : vector<16x128xf32>
    %176 = arith.mulf %175, %168 : vector<16x128xf32>
    %cst_49 = arith.constant -0.284496725 : f32
    %177 = vector.broadcast %cst_49 : f32 to vector<16x128xf32>
    %178 = arith.addf %176, %177 : vector<16x128xf32>
    %179 = arith.mulf %178, %168 : vector<16x128xf32>
    %cst_50 = arith.constant 0.254829586 : f32
    %180 = vector.broadcast %cst_50 : f32 to vector<16x128xf32>
    %181 = arith.addf %179, %180 : vector<16x128xf32>
    %182 = arith.mulf %181, %168 : vector<16x128xf32>
    %cst_51 = arith.constant 0.000000e+00 : f32
    %183 = vector.broadcast %cst_51 : f32 to vector<16x128xf32>
    %184 = arith.subf %183, %162 : vector<16x128xf32>
    %185 = arith.mulf %184, %162 : vector<16x128xf32>
    %186 = math.exp %185 : vector<16x128xf32>
    %187 = arith.mulf %182, %186 : vector<16x128xf32>
    %cst_52 = arith.constant 1.000000e+00 : f32
    %188 = vector.broadcast %cst_52 : f32 to vector<16x128xf32>
    %189 = arith.subf %188, %187 : vector<16x128xf32>
    %190 = arith.mulf %161, %189 : vector<16x128xf32>
    %cst_53 = arith.constant 1.000000e+00 : f32
    %191 = vector.broadcast %cst_53 : f32 to vector<16x128xf32>
    %192 = arith.addf %191, %190 : vector<16x128xf32>
    %193 = arith.mulf %154, %192 : vector<16x128xf32>
    %cst_54 = arith.constant dense<0.000000e+00> : vector<16x32xf32>
    %194 = tpu.matmul %193, %41, %cst_54 {dimension_numbers = #tpu.dot_dimension_numbers<[1], [0], [0], [1], [0, 0, 1, 1], [], []>} : vector<16x128xf32>, vector<128x32xf32>, vector<16x32xf32> -> vector<16x32xf32>
    %195 = vector.broadcast %51 : vector<1x32xf32> to vector<16x32xf32>
    %196 = arith.addf %194, %195 : vector<16x32xf32>
    %197 = arith.addf %125, %196 : vector<16x32xf32>
    %198 = vector.shape_cast %197 : vector<16x32xf32> to vector<2x8x32xf32>
    %c1_55 = arith.constant 1 : index
    %c0_56 = arith.constant 0 : index
    %c0_57 = arith.constant 0 : index
    %199 = vector.load %arg2[%c1_55, %c0_56, %c0_57] : memref<2x32x288xf32, #tpu.memory_space<vmem>>, vector<1x32x288xf32>
    %200 = vector.shape_cast %199 : vector<1x32x288xf32> to vector<32x288xf32>
    %201 = vector.extract_strided_slice %200 {offsets = [0, 0], sizes = [32, 128], strides = [1, 1]} : vector<32x288xf32> to vector<32x128xf32>
    %202 = vector.extract_strided_slice %200 {offsets = [0, 128], sizes = [32, 96], strides = [1, 1]} : vector<32x288xf32> to vector<32x96xf32>
    %203 = vector.extract_strided_slice %200 {offsets = [0, 256], sizes = [32, 32], strides = [1, 1]} : vector<32x288xf32> to vector<32x32xf32>
    %c1_58 = arith.constant 1 : index
    %c0_59 = arith.constant 0 : index
    %c0_60 = arith.constant 0 : index
    %204 = vector.load %arg3[%c1_58, %c0_59, %c0_60] : memref<2x128x32xf32, #tpu.memory_space<vmem>>, vector<1x128x32xf32>
    %205 = vector.shape_cast %204 : vector<1x128x32xf32> to vector<128x32xf32>
    %c1_61 = arith.constant 1 : index
    %c0_62 = arith.constant 0 : index
    %c0_63 = arith.constant 0 : index
    %206 = vector.load %arg4[%c1_61, %c0_62, %c0_63] : memref<2x8x128xf32, #tpu.memory_space<vmem>>, vector<1x8x128xf32>
    %207 = vector.shape_cast %206 : vector<1x8x128xf32> to vector<8x128xf32>
    %208 = vector.extract_strided_slice %207 {offsets = [0, 0], sizes = [1, 32], strides = [1, 1]} : vector<8x128xf32> to vector<1x32xf32>
    %209 = vector.extract_strided_slice %207 {offsets = [1, 0], sizes = [1, 32], strides = [1, 1]} : vector<8x128xf32> to vector<1x32xf32>
    %210 = vector.extract_strided_slice %207 {offsets = [2, 0], sizes = [1, 96], strides = [1, 1]} : vector<8x128xf32> to vector<1x96xf32>
    %211 = vector.extract_strided_slice %207 {offsets = [3, 0], sizes = [1, 32], strides = [1, 1]} : vector<8x128xf32> to vector<1x32xf32>
    %212 = vector.extract_strided_slice %207 {offsets = [4, 0], sizes = [1, 32], strides = [1, 1]} : vector<8x128xf32> to vector<1x32xf32>
    %213 = vector.extract_strided_slice %207 {offsets = [5, 0], sizes = [1, 32], strides = [1, 1]} : vector<8x128xf32> to vector<1x32xf32>
    %214 = vector.extract_strided_slice %207 {offsets = [6, 0], sizes = [1, 128], strides = [1, 1]} : vector<8x128xf32> to vector<1x128xf32>
    %215 = vector.extract_strided_slice %207 {offsets = [7, 0], sizes = [1, 32], strides = [1, 1]} : vector<8x128xf32> to vector<1x32xf32>
    %216 = vector.shape_cast %198 : vector<2x8x32xf32> to vector<16x32xf32>
    %cst_64 = arith.constant dense<0.000000e+00> : vector<16xf32>
    %217 = vector.multi_reduction <add>, %216, %cst_64 [1] : vector<16x32xf32> to vector<16xf32>
    %218 = vector.shape_cast %217 : vector<16xf32> to vector<16x1xf32>
    %cst_65 = arith.constant 3.200000e+01 : f32
    %219 = vector.broadcast %cst_65 : f32 to vector<16x1xf32>
    %220 = arith.divf %218, %219 : vector<16x1xf32>
    %221 = vector.broadcast %220 : vector<16x1xf32> to vector<16x32xf32>
    %222 = arith.subf %216, %221 : vector<16x32xf32>
    %223 = vector.broadcast %220 : vector<16x1xf32> to vector<16x32xf32>
    %224 = arith.subf %216, %223 : vector<16x32xf32>
    %225 = arith.mulf %222, %224 : vector<16x32xf32>
    %cst_66 = arith.constant dense<0.000000e+00> : vector<16xf32>
    %226 = vector.multi_reduction <add>, %225, %cst_66 [1] : vector<16x32xf32> to vector<16xf32>
    %227 = vector.shape_cast %226 : vector<16xf32> to vector<16x1xf32>
    %cst_67 = arith.constant 3.200000e+01 : f32
    %228 = vector.broadcast %cst_67 : f32 to vector<16x1xf32>
    %229 = arith.divf %227, %228 : vector<16x1xf32>
    %230 = vector.broadcast %220 : vector<16x1xf32> to vector<16x32xf32>
    %231 = arith.subf %216, %230 : vector<16x32xf32>
    %cst_68 = arith.constant 9.99999974E-6 : f32
    %232 = vector.broadcast %cst_68 : f32 to vector<16x1xf32>
    %233 = arith.addf %229, %232 : vector<16x1xf32>
    %234 = math.rsqrt %233 : vector<16x1xf32>
    %235 = vector.broadcast %234 : vector<16x1xf32> to vector<16x32xf32>
    %236 = arith.mulf %231, %235 : vector<16x32xf32>
    %237 = vector.broadcast %208 : vector<1x32xf32> to vector<16x32xf32>
    %238 = arith.mulf %236, %237 : vector<16x32xf32>
    %239 = vector.broadcast %209 : vector<1x32xf32> to vector<16x32xf32>
    %240 = arith.addf %238, %239 : vector<16x32xf32>
    %cst_69 = arith.constant dense<0.000000e+00> : vector<16x96xf32>
    %241 = tpu.matmul %240, %202, %cst_69 {dimension_numbers = #tpu.dot_dimension_numbers<[1], [0], [0], [1], [0, 0, 1, 1], [], []>} : vector<16x32xf32>, vector<32x96xf32>, vector<16x96xf32> -> vector<16x96xf32>
    %242 = vector.broadcast %210 : vector<1x96xf32> to vector<16x96xf32>
    %243 = arith.addf %241, %242 : vector<16x96xf32>
    %244 = vector.extract_strided_slice %243 {offsets = [0, 0], sizes = [16, 32], strides = [1, 1]} : vector<16x96xf32> to vector<16x32xf32>
    %245 = vector.shape_cast %244 : vector<16x32xf32> to vector<2x8x32xf32>
    %246 = vector.extract_strided_slice %243 {offsets = [0, 32], sizes = [16, 32], strides = [1, 1]} : vector<16x96xf32> to vector<16x32xf32>
    %247 = vector.shape_cast %246 : vector<16x32xf32> to vector<2x8x32xf32>
    %248 = vector.extract_strided_slice %243 {offsets = [0, 64], sizes = [16, 32], strides = [1, 1]} : vector<16x96xf32> to vector<16x32xf32>
    %249 = vector.shape_cast %248 : vector<16x32xf32> to vector<2x8x32xf32>
    %250 = vector.extract_strided_slice %245 {offsets = [0, 0, 0], sizes = [2, 8, 8], strides = [1, 1, 1]} : vector<2x8x32xf32> to vector<2x8x8xf32>
    %251 = vector.extract_strided_slice %245 {offsets = [0, 0, 8], sizes = [2, 8, 8], strides = [1, 1, 1]} : vector<2x8x32xf32> to vector<2x8x8xf32>
    %252 = vector.extract_strided_slice %245 {offsets = [0, 0, 16], sizes = [2, 8, 8], strides = [1, 1, 1]} : vector<2x8x32xf32> to vector<2x8x8xf32>
    %253 = vector.extract_strided_slice %245 {offsets = [0, 0, 24], sizes = [2, 8, 8], strides = [1, 1, 1]} : vector<2x8x32xf32> to vector<2x8x8xf32>
    %254 = tpu.concatenate %250, %251, %252, %253 in 0 : vector<2x8x8xf32>, vector<2x8x8xf32>, vector<2x8x8xf32>, vector<2x8x8xf32> -> vector<8x8x8xf32>
    %255 = vector.extract_strided_slice %247 {offsets = [0, 0, 0], sizes = [2, 8, 8], strides = [1, 1, 1]} : vector<2x8x32xf32> to vector<2x8x8xf32>
    %256 = vector.extract_strided_slice %247 {offsets = [0, 0, 8], sizes = [2, 8, 8], strides = [1, 1, 1]} : vector<2x8x32xf32> to vector<2x8x8xf32>
    %257 = vector.extract_strided_slice %247 {offsets = [0, 0, 16], sizes = [2, 8, 8], strides = [1, 1, 1]} : vector<2x8x32xf32> to vector<2x8x8xf32>
    %258 = vector.extract_strided_slice %247 {offsets = [0, 0, 24], sizes = [2, 8, 8], strides = [1, 1, 1]} : vector<2x8x32xf32> to vector<2x8x8xf32>
    %259 = tpu.concatenate %255, %256, %257, %258 in 0 : vector<2x8x8xf32>, vector<2x8x8xf32>, vector<2x8x8xf32>, vector<2x8x8xf32> -> vector<8x8x8xf32>
    %260 = vector.extract_strided_slice %249 {offsets = [0, 0, 0], sizes = [2, 8, 8], strides = [1, 1, 1]} : vector<2x8x32xf32> to vector<2x8x8xf32>
    %261 = vector.extract_strided_slice %249 {offsets = [0, 0, 8], sizes = [2, 8, 8], strides = [1, 1, 1]} : vector<2x8x32xf32> to vector<2x8x8xf32>
    %262 = vector.extract_strided_slice %249 {offsets = [0, 0, 16], sizes = [2, 8, 8], strides = [1, 1, 1]} : vector<2x8x32xf32> to vector<2x8x8xf32>
    %263 = vector.extract_strided_slice %249 {offsets = [0, 0, 24], sizes = [2, 8, 8], strides = [1, 1, 1]} : vector<2x8x32xf32> to vector<2x8x8xf32>
    %264 = tpu.concatenate %260, %261, %262, %263 in 0 : vector<2x8x8xf32>, vector<2x8x8xf32>, vector<2x8x8xf32>, vector<2x8x8xf32> -> vector<8x8x8xf32>
    "tpu.trace_start"() <{level = 10 : i32, message = "bqd,bkd->bqk"}> : () -> ()
    %cst_70 = arith.constant dense<0.000000e+00> : vector<8x8x8xf32>
    %265 = tpu.matmul %254, %259, %cst_70 {dimension_numbers = #tpu.dot_dimension_numbers<[2], [2], [1], [1], [0, 0, 0, 1, 1, 1], [0], [0]>} : vector<8x8x8xf32>, vector<8x8x8xf32>, vector<8x8x8xf32> -> vector<8x8x8xf32>
    "tpu.trace_stop"() : () -> ()
    %cst_71 = arith.constant 0.176776692 : f32
    %266 = vector.broadcast %cst_71 : f32 to vector<8x8x8xf32>
    %267 = arith.mulf %265, %266 : vector<8x8x8xf32>
    %268 = vector.broadcast %34 : vector<1x8x8xf32> to vector<8x8x8xf32>
    %269 = arith.addf %267, %268 : vector<8x8x8xf32>
    %cst_72 = arith.constant dense<0xFF800000> : vector<8x8xf32>
    %270 = vector.multi_reduction <maximumf>, %269, %cst_72 [2] : vector<8x8x8xf32> to vector<8x8xf32>
    %271 = vector.shape_cast %270 : vector<8x8xf32> to vector<8x8x1xf32>
    %272 = vector.broadcast %271 : vector<8x8x1xf32> to vector<8x8x8xf32>
    %273 = arith.subf %269, %272 : vector<8x8x8xf32>
    %274 = math.exp %273 : vector<8x8x8xf32>
    %cst_73 = arith.constant dense<0.000000e+00> : vector<8x8xf32>
    %275 = vector.multi_reduction <add>, %274, %cst_73 [2] : vector<8x8x8xf32> to vector<8x8xf32>
    %276 = vector.shape_cast %275 : vector<8x8xf32> to vector<8x8x1xf32>
    %277 = vector.broadcast %276 : vector<8x8x1xf32> to vector<8x8x8xf32>
    %278 = arith.divf %274, %277 : vector<8x8x8xf32>
    "tpu.trace_start"() <{level = 10 : i32, message = "bqk,bkd->bqd"}> : () -> ()
    %cst_74 = arith.constant dense<0.000000e+00> : vector<8x8x8xf32>
    %279 = tpu.matmul %278, %264, %cst_74 {dimension_numbers = #tpu.dot_dimension_numbers<[2], [1], [1], [2], [0, 0, 0, 1, 1, 2], [0], [0]>} : vector<8x8x8xf32>, vector<8x8x8xf32>, vector<8x8x8xf32> -> vector<8x8x8xf32>
    "tpu.trace_stop"() : () -> ()
    %280 = vector.extract_strided_slice %279 {offsets = [0, 0, 0], sizes = [2, 8, 8], strides = [1, 1, 1]} : vector<8x8x8xf32> to vector<2x8x8xf32>
    %281 = vector.extract_strided_slice %279 {offsets = [2, 0, 0], sizes = [2, 8, 8], strides = [1, 1, 1]} : vector<8x8x8xf32> to vector<2x8x8xf32>
    %282 = vector.extract_strided_slice %279 {offsets = [4, 0, 0], sizes = [2, 8, 8], strides = [1, 1, 1]} : vector<8x8x8xf32> to vector<2x8x8xf32>
    %283 = vector.extract_strided_slice %279 {offsets = [6, 0, 0], sizes = [2, 8, 8], strides = [1, 1, 1]} : vector<8x8x8xf32> to vector<2x8x8xf32>
    %284 = tpu.concatenate %280, %281, %282, %283 in 2 : vector<2x8x8xf32>, vector<2x8x8xf32>, vector<2x8x8xf32>, vector<2x8x8xf32> -> vector<2x8x32xf32>
    %285 = vector.shape_cast %284 : vector<2x8x32xf32> to vector<16x32xf32>
    %cst_75 = arith.constant dense<0.000000e+00> : vector<16x32xf32>
    %286 = tpu.matmul %285, %203, %cst_75 {dimension_numbers = #tpu.dot_dimension_numbers<[1], [0], [0], [1], [0, 0, 1, 1], [], []>} : vector<16x32xf32>, vector<32x32xf32>, vector<16x32xf32> -> vector<16x32xf32>
    %287 = vector.broadcast %211 : vector<1x32xf32> to vector<16x32xf32>
    %288 = arith.addf %286, %287 : vector<16x32xf32>
    %289 = arith.addf %216, %288 : vector<16x32xf32>
    %cst_76 = arith.constant dense<0.000000e+00> : vector<16xf32>
    %290 = vector.multi_reduction <add>, %289, %cst_76 [1] : vector<16x32xf32> to vector<16xf32>
    %291 = vector.shape_cast %290 : vector<16xf32> to vector<16x1xf32>
    %cst_77 = arith.constant 3.200000e+01 : f32
    %292 = vector.broadcast %cst_77 : f32 to vector<16x1xf32>
    %293 = arith.divf %291, %292 : vector<16x1xf32>
    %294 = vector.broadcast %293 : vector<16x1xf32> to vector<16x32xf32>
    %295 = arith.subf %289, %294 : vector<16x32xf32>
    %296 = vector.broadcast %293 : vector<16x1xf32> to vector<16x32xf32>
    %297 = arith.subf %289, %296 : vector<16x32xf32>
    %298 = arith.mulf %295, %297 : vector<16x32xf32>
    %cst_78 = arith.constant dense<0.000000e+00> : vector<16xf32>
    %299 = vector.multi_reduction <add>, %298, %cst_78 [1] : vector<16x32xf32> to vector<16xf32>
    %300 = vector.shape_cast %299 : vector<16xf32> to vector<16x1xf32>
    %cst_79 = arith.constant 3.200000e+01 : f32
    %301 = vector.broadcast %cst_79 : f32 to vector<16x1xf32>
    %302 = arith.divf %300, %301 : vector<16x1xf32>
    %303 = vector.broadcast %293 : vector<16x1xf32> to vector<16x32xf32>
    %304 = arith.subf %289, %303 : vector<16x32xf32>
    %cst_80 = arith.constant 9.99999974E-6 : f32
    %305 = vector.broadcast %cst_80 : f32 to vector<16x1xf32>
    %306 = arith.addf %302, %305 : vector<16x1xf32>
    %307 = math.rsqrt %306 : vector<16x1xf32>
    %308 = vector.broadcast %307 : vector<16x1xf32> to vector<16x32xf32>
    %309 = arith.mulf %304, %308 : vector<16x32xf32>
    %310 = vector.broadcast %212 : vector<1x32xf32> to vector<16x32xf32>
    %311 = arith.mulf %309, %310 : vector<16x32xf32>
    %312 = vector.broadcast %213 : vector<1x32xf32> to vector<16x32xf32>
    %313 = arith.addf %311, %312 : vector<16x32xf32>
    %cst_81 = arith.constant dense<0.000000e+00> : vector<16x128xf32>
    %314 = tpu.matmul %313, %201, %cst_81 {dimension_numbers = #tpu.dot_dimension_numbers<[1], [0], [0], [1], [0, 0, 1, 1], [], []>} : vector<16x32xf32>, vector<32x128xf32>, vector<16x128xf32> -> vector<16x128xf32>
    %315 = vector.broadcast %214 : vector<1x128xf32> to vector<16x128xf32>
    %316 = arith.addf %314, %315 : vector<16x128xf32>
    %cst_82 = arith.constant 5.000000e-01 : f32
    %317 = vector.broadcast %cst_82 : f32 to vector<16x128xf32>
    %318 = arith.mulf %317, %316 : vector<16x128xf32>
    %cst_83 = arith.constant 0.707106769 : f32
    %319 = vector.broadcast %cst_83 : f32 to vector<16x128xf32>
    %320 = arith.mulf %316, %319 : vector<16x128xf32>
    %cst_84 = arith.constant 0.000000e+00 : f32
    %321 = vector.broadcast %cst_84 : f32 to vector<16x128xf32>
    %322 = arith.cmpf olt, %320, %321 : vector<16x128xf32>
    %cst_85 = arith.constant -1.000000e+00 : f32
    %cst_86 = arith.constant 1.000000e+00 : f32
    %323 = vector.broadcast %cst_85 : f32 to vector<16x128xf32>
    %324 = vector.broadcast %cst_86 : f32 to vector<16x128xf32>
    %325 = arith.select %322, %323, %324 : vector<16x128xi1>, vector<16x128xf32>
    %326 = math.absf %320 : vector<16x128xf32>
    %cst_87 = arith.constant 0.327591091 : f32
    %327 = vector.broadcast %cst_87 : f32 to vector<16x128xf32>
    %328 = arith.mulf %327, %326 : vector<16x128xf32>
    %cst_88 = arith.constant 1.000000e+00 : f32
    %329 = vector.broadcast %cst_88 : f32 to vector<16x128xf32>
    %330 = arith.addf %329, %328 : vector<16x128xf32>
    %cst_89 = arith.constant 1.000000e+00 : f32
    %331 = vector.broadcast %cst_89 : f32 to vector<16x128xf32>
    %332 = arith.divf %331, %330 : vector<16x128xf32>
    %cst_90 = arith.constant 1.06140542 : f32
    %333 = vector.broadcast %cst_90 : f32 to vector<16x128xf32>
    %334 = arith.mulf %333, %332 : vector<16x128xf32>
    %cst_91 = arith.constant -1.45315206 : f32
    %335 = vector.broadcast %cst_91 : f32 to vector<16x128xf32>
    %336 = arith.addf %334, %335 : vector<16x128xf32>
    %337 = arith.mulf %336, %332 : vector<16x128xf32>
    %cst_92 = arith.constant 1.42141378 : f32
    %338 = vector.broadcast %cst_92 : f32 to vector<16x128xf32>
    %339 = arith.addf %337, %338 : vector<16x128xf32>
    %340 = arith.mulf %339, %332 : vector<16x128xf32>
    %cst_93 = arith.constant -0.284496725 : f32
    %341 = vector.broadcast %cst_93 : f32 to vector<16x128xf32>
    %342 = arith.addf %340, %341 : vector<16x128xf32>
    %343 = arith.mulf %342, %332 : vector<16x128xf32>
    %cst_94 = arith.constant 0.254829586 : f32
    %344 = vector.broadcast %cst_94 : f32 to vector<16x128xf32>
    %345 = arith.addf %343, %344 : vector<16x128xf32>
    %346 = arith.mulf %345, %332 : vector<16x128xf32>
    %cst_95 = arith.constant 0.000000e+00 : f32
    %347 = vector.broadcast %cst_95 : f32 to vector<16x128xf32>
    %348 = arith.subf %347, %326 : vector<16x128xf32>
    %349 = arith.mulf %348, %326 : vector<16x128xf32>
    %350 = math.exp %349 : vector<16x128xf32>
    %351 = arith.mulf %346, %350 : vector<16x128xf32>
    %cst_96 = arith.constant 1.000000e+00 : f32
    %352 = vector.broadcast %cst_96 : f32 to vector<16x128xf32>
    %353 = arith.subf %352, %351 : vector<16x128xf32>
    %354 = arith.mulf %325, %353 : vector<16x128xf32>
    %cst_97 = arith.constant 1.000000e+00 : f32
    %355 = vector.broadcast %cst_97 : f32 to vector<16x128xf32>
    %356 = arith.addf %355, %354 : vector<16x128xf32>
    %357 = arith.mulf %318, %356 : vector<16x128xf32>
    %cst_98 = arith.constant dense<0.000000e+00> : vector<16x32xf32>
    %358 = tpu.matmul %357, %205, %cst_98 {dimension_numbers = #tpu.dot_dimension_numbers<[1], [0], [0], [1], [0, 0, 1, 1], [], []>} : vector<16x128xf32>, vector<128x32xf32>, vector<16x32xf32> -> vector<16x32xf32>
    %359 = vector.broadcast %215 : vector<1x32xf32> to vector<16x32xf32>
    %360 = arith.addf %358, %359 : vector<16x32xf32>
    %361 = arith.addf %289, %360 : vector<16x32xf32>
    %362 = vector.shape_cast %361 : vector<16x32xf32> to vector<2x8x32xf32>
    %c0_99 = arith.constant 0 : index
    %c0_100 = arith.constant 0 : index
    %363 = vector.load %arg5[%c0_99, %c0_100] : memref<34x32xf32, #tpu.memory_space<vmem>>, vector<34x32xf32>
    %364 = vector.extract_strided_slice %363 {offsets = [0, 0], sizes = [32, 32], strides = [1, 1]} : vector<34x32xf32> to vector<32x32xf32>
    %365 = vector.extract_strided_slice %363 {offsets = [32, 0], sizes = [1, 32], strides = [1, 1]} : vector<34x32xf32> to vector<1x32xf32>
    %366 = vector.extract_strided_slice %363 {offsets = [33, 0], sizes = [1, 32], strides = [1, 1]} : vector<34x32xf32> to vector<1x32xf32>
    %367 = vector.shape_cast %362 : vector<2x8x32xf32> to vector<16x32xf32>
    %cst_101 = arith.constant dense<0.000000e+00> : vector<16xf32>
    %368 = vector.multi_reduction <add>, %367, %cst_101 [1] : vector<16x32xf32> to vector<16xf32>
    %369 = vector.shape_cast %368 : vector<16xf32> to vector<16x1xf32>
    %cst_102 = arith.constant 3.200000e+01 : f32
    %370 = vector.broadcast %cst_102 : f32 to vector<16x1xf32>
    %371 = arith.divf %369, %370 : vector<16x1xf32>
    %372 = vector.broadcast %371 : vector<16x1xf32> to vector<16x32xf32>
    %373 = arith.subf %367, %372 : vector<16x32xf32>
    %374 = vector.broadcast %371 : vector<16x1xf32> to vector<16x32xf32>
    %375 = arith.subf %367, %374 : vector<16x32xf32>
    %376 = arith.mulf %373, %375 : vector<16x32xf32>
    %cst_103 = arith.constant dense<0.000000e+00> : vector<16xf32>
    %377 = vector.multi_reduction <add>, %376, %cst_103 [1] : vector<16x32xf32> to vector<16xf32>
    %378 = vector.shape_cast %377 : vector<16xf32> to vector<16x1xf32>
    %cst_104 = arith.constant 3.200000e+01 : f32
    %379 = vector.broadcast %cst_104 : f32 to vector<16x1xf32>
    %380 = arith.divf %378, %379 : vector<16x1xf32>
    %381 = vector.broadcast %371 : vector<16x1xf32> to vector<16x32xf32>
    %382 = arith.subf %367, %381 : vector<16x32xf32>
    %cst_105 = arith.constant 9.99999974E-6 : f32
    %383 = vector.broadcast %cst_105 : f32 to vector<16x1xf32>
    %384 = arith.addf %380, %383 : vector<16x1xf32>
    %385 = math.rsqrt %384 : vector<16x1xf32>
    %386 = vector.broadcast %385 : vector<16x1xf32> to vector<16x32xf32>
    %387 = arith.mulf %382, %386 : vector<16x32xf32>
    %388 = vector.broadcast %365 : vector<1x32xf32> to vector<16x32xf32>
    %389 = arith.mulf %387, %388 : vector<16x32xf32>
    %390 = vector.broadcast %366 : vector<1x32xf32> to vector<16x32xf32>
    %391 = arith.addf %389, %390 : vector<16x32xf32>
    %cst_106 = arith.constant dense<0.000000e+00> : vector<16x32xf32>
    %392 = tpu.matmul %391, %364, %cst_106 {dimension_numbers = #tpu.dot_dimension_numbers<[1], [0], [0], [1], [0, 0, 1, 1], [], []>} : vector<16x32xf32>, vector<32x32xf32>, vector<16x32xf32> -> vector<16x32xf32>
    %393 = vector.shape_cast %392 : vector<16x32xf32> to vector<2x8x32xf32>
    %c0_107 = arith.constant 0 : index
    %c0_108 = arith.constant 0 : index
    %c0_109 = arith.constant 0 : index
    %394 = vector.load %arg6[%c0_107, %c0_108, %c0_109] : memref<2x8x32xf32, #tpu.memory_space<vmem>>, vector<2x8x32xf32>
    tpu.vector_store %arg6[%c0_107, %c0_108, %c0_109], %393 {strides = array<i32>} : memref<2x8x32xf32, #tpu.memory_space<vmem>>, vector<2x8x32xf32>,
    %cst_110 = arith.constant dense<0xFF800000> : vector<2x8xf32>
    %395 = vector.multi_reduction <maximumf>, %393, %cst_110 [2] : vector<2x8x32xf32> to vector<2x8xf32>
    %396 = vector.shape_cast %395 : vector<2x8xf32> to vector<2x8x1xf32>
    %397 = vector.broadcast %396 : vector<2x8x1xf32> to vector<2x8x32xf32>
    %398 = arith.subf %393, %397 : vector<2x8x32xf32>
    %399 = math.exp %398 : vector<2x8x32xf32>
    %cst_111 = arith.constant dense<0.000000e+00> : vector<2x8xf32>
    %400 = vector.multi_reduction <add>, %399, %cst_111 [2] : vector<2x8x32xf32> to vector<2x8xf32>
    %401 = vector.shape_cast %400 : vector<2x8xf32> to vector<2x8x1xf32>
    %402 = math.log %401 : vector<2x8x1xf32>
    %403 = arith.addf %402, %396 : vector<2x8x1xf32>
    %404 = tpu.iota {dimensions = array<i32: 2>} : vector<2x8x32xi32>
    %405 = vector.shape_cast %5 : vector<2x8xi32> to vector<2x8x1xi32>
    %406 = vector.broadcast %405 : vector<2x8x1xi32> to vector<2x8x32xi32>
    %407 = arith.cmpi eq, %404, %406 : vector<2x8x32xi32>
    %408 = arith.extui %407 : vector<2x8x32xi1> to vector<2x8x32xi32>
    %409 = arith.sitofp %408 : vector<2x8x32xi32> to vector<2x8x32xf32>
    %410 = arith.mulf %393, %409 : vector<2x8x32xf32>
    %cst_112 = arith.constant dense<0.000000e+00> : vector<2x8xf32>
    %411 = vector.multi_reduction <add>, %410, %cst_112 [2] : vector<2x8x32xf32> to vector<2x8xf32>
    %412 = vector.shape_cast %411 : vector<2x8xf32> to vector<2x8x1xf32>
    %413 = arith.subf %403, %412 : vector<2x8x1xf32>
    %414 = vector.shape_cast %3 : vector<2x8xi32> to vector<2x8x1xi32>
    %c0_i32_113 = arith.constant 0 : i32
    %415 = vector.broadcast %c0_i32_113 : i32 to vector<2x8x1xi32>
    %416 = arith.cmpi eq, %414, %415 : vector<2x8x1xi32>
    %cst_114 = arith.constant 0.000000e+00 : f32
    %417 = vector.broadcast %cst_114 : f32 to vector<2x8x1xf32>
    %418 = arith.select %416, %417, %413 : vector<2x8x1xi1>, vector<2x8x1xf32>
    %419 = vector.shape_cast %418 : vector<2x8x1xf32> to vector<1x2x8x1xf32>
    %cst_115 = arith.constant dense<0.000000e+00> : vector<1xf32>
    %420 = vector.multi_reduction <add>, %419, %cst_115 [1, 2, 3] : vector<1x2x8x1xf32> to vector<1xf32>
    %421 = vector.shape_cast %420 : vector<1xf32> to vector<1x1x1x1xf32>
    %422 = vector.extract %421[0, 0, 0, 0] : f32 from vector<1x1x1x1xf32>
    %cst_116 = arith.constant 6.250000e-02 : f32
    %423 = arith.mulf %422, %cst_116 : f32
    %cst_117 = arith.constant 1.000000e+00 : f32
    %424 = vector.broadcast %cst_117 : f32 to vector<1x1xf32>
    %425 = vector.broadcast %423 : f32 to vector<1x1xf32>
    %426 = arith.mulf %425, %424 : vector<1x1xf32>
    %c0_118 = arith.constant 0 : index
    %c0_119 = arith.constant 0 : index
    %427 = vector.load %arg7[%c0_118, %c0_119] : memref<1x1xf32, #tpu.memory_space<vmem>>, vector<1x1xf32>
    tpu.vector_store %arg7[%c0_118, %c0_119], %426 {strides = array<i32>} : memref<1x1xf32, #tpu.memory_space<vmem>>, vector<1x1xf32>,
    return
  }
}

</mosaic_0001>

<bundles_post_ra>
// kernel: tpu_custom_call.1
= control target key start
LH: loop header
LB: loop body
LE: loop exit
PB: predicated region body
PF: predicated region fallthrough
CT: control target
= control target key end

     0   :  { %13 = vsyncpa [#allocation3], 0  ;;  %v37_v0 = vlaneseq  ;;  %s3597_s0 = inlined_call_operand.vmem [shape: s32[3,2,8], index: 0, kind: input, shape index: {}]   ;;  %s3598_s1 = inlined_call_operand.vmem [shape: f32[40,32], index: 1, kind: input, shape index: {}]   ;;  %s3599_s2 = inlined_call_operand.vmem [shape: f32[2,32,288], index: 2, kind: input, shape index: {}]   ;;  %s3600_s3 = inlined_call_operand.vmem [shape: f32[2,128,32], index: 3, kind: input, shape index: {}]   ;;  %s3601_s4 = inlined_call_operand.vmem [shape: f32[2,8,128], index: 4, kind: input, shape index: {}]   ;;  %s3602_s5 = inlined_call_operand.vmem [shape: f32[34,32], index: 5, kind: input, shape index: {}]   ;;  %s3603_s6 = inlined_call_operand.hbm [shape: f32[2,8,32], index: 6, kind: output, shape index: {0}]   ;;  %s3604_s7 = inlined_call_operand.hbm [shape: f32[1,1], index: 7, kind: output, shape index: {1}]  }
   0x1   :  { %v35_v1 = vld [vmem:[%s3598_s1 + $0x18] sm:$0xff]  ;;  %v34_v2 = vld [vmem:[%s3598_s1 + $0x10] sm:$0xff] }
   0x2   :  { %78 = vmatpush.msra.mxu0 %v35_v1 }
   0x3   :  { %14 = vsyncpa [#allocation5], 0  ;;  %v2688_v3 = vshrl.u32 %v37_v0, 7  ;;  %v33_v4 = vld [vmem:[%s3598_s1 + $0x8] sm:$0xff]  ;;  %v27_v5 = vld [vmem:[%s3597_s0] sm:$0x3] }
   0x4   :  { %79 = vmatpush.msra.mxu0 %v34_v2  ;;  %v39_v6 = vperm.slane %v27_v5, 0  ;;  %v46_v7 = vperm.slane %v27_v5, 1  ;;  %v32_v8 = vld [vmem:[%s3598_s1] sm:$0xff]  ;;  %v2704_v12 = vand.u32 127, %v37_v0  ;;  %vm59_vm0 = vcmask 261120   ;;  %v127_v46 = vld [vmem:[%s3599_s2 + $0x50] sm:$0xff] }
   0x5   :  { %2431 = vset.pattern.permute.xlu0 %v2688_v3  ;;  %2432 = vset.pattern.permute.xlu1 %v2688_v3  ;;  %v2315_v9 = vld [vmem:[%s3597_s0 + $0x2] sm:$0x3]  ;;  %v2627_v14 = vmov 0.0   ;;  %v2628_v29 = vmov 32.0   ;;  %v124_v47 = vld [vmem:[%s3599_s2 + $0x38] sm:$0xff]  ;;  %v118_v49 = vld [vmem:[%s3599_s2 + $0x8] sm:$0xff] }
   0x6   :  { %80 = vmatpush.msra.mxu0 %v33_v4  ;;  %v91_v10 = vperm.slane %v2315_v9, 0  ;;  %v98_v11 = vperm.slane %v2315_v9, 1  ;;  %v36_v19 = vld [vmem:[%s3598_s1 + $0x20] sm:$0xff]  ;;  %2463 = vrcp.f32 %v2628_v29  ;;  %222 = vmatpush.msra.mxu1 %v127_v46  ;;  %s2629_s24 = smov 104   ;;  %s2630_s25 = smov 120   ;;  %vm249_vm12 = vcmask 64512  }
   0x7   :  { %v121_v48 = vld [vmem:[%s3599_s2 + $0x20] sm:$0xff]  ;;  %s2631_s26 = smov 112   ;;  %s2632_s27 = smov 96   ;;  %vm115_vm13 = vcmp.ge.s32.totalorder %v2688_v3, %v2704_v12 }
   0x8   :  { %81 = vmatpush.msra.mxu0 %v32_v8  ;;  %223 = vmatpush.msra.mxu1 %v124_v47  ;;  %v2754_v61 = vld [vmem:[%s3601_s4] sm:$0xff]  ;;  %s2634_s28 = smov 64   ;;  %s2635_s29 = smov 8  }
   0x9   :  { %v197_v1 = vperm.slane %v2754_v61, 0  ;;  %s2636_s30 = smov 24   ;;  %s2637_s8 = smov 16  }
   0xa   :  { %224 = vmatpush.msra.mxu1 %v121_v48  ;;  %s2287_s12 = sshll.u32 %s3603_s6, 4  ;;  %s2640_s13 = smov 128   ;;  %s2288_s12 = int_to_ptr.hbm [resolvable:$true] %s2287_s12 }
   0xb   :  { %s2301_s16 = sshll.u32 %s3604_s7, 4  ;;  %s2302_s16 = int_to_ptr.hbm [resolvable:$true] %s2301_s16 }
   0xc   :  { %v2464_v30 = vpop.eup %2463  ;;  %225 = vmatpush.msra.mxu1 %v118_v49 }
   0xd   :  { %44 = vperm.xlu0 %2431, %v39_v6   ;;  %96 = vperm.xlu1 %2432, %v91_v10   ;;  %v153_v31 = vmul.f32 32.0, %v2464_v30  ;;  %vm157_vm5 = vweird.f32 %v2464_v30  ;;  %v200_v6 = vperm.slane %v2754_v61, 1 }
   0xf   :  { %v154_v32 = vsub.f32 1.0, %v153_v31 }
  0x11   :  { %v155_v33 = vmul.f32 %v2464_v30, %v154_v32 }
  0x13   :  { %v156_v34 = vadd.f32 %v2464_v30, %v155_v33 }
  0x15   :  { %51 = vperm.xlu0 %2431, %v46_v7   ;;  %103 = vperm.xlu1 %2432, %v98_v11   ;;  %v2729_v35 = vsel %vm157_vm5, %v2464_v30, %v156_v34 }
  0x7f   :  { %v45_v13 = vpop.permute.xlu0 %44  ;;  %v2712_v18 = vpop.permute.xlu1 %96 }
  0x80   :  { %vm53_vm1 = vcmp.eq.s32.totalorder %v2704_v12, %v45_v13  ;;  %vm105_vm3 = vcmp.ne.s32.totalorder %v2712_v18, 0 }
  0x81   :  { %v2317_v15 = vsel %vm53_vm1, 1.0, %v2627_v14 }
  0x82   :  { %2319 = vmatmul.msk.f32.vlgmr.msra.gmra.mxu0 %vm59_vm0, %v2317_v15 }
  0x87   :  { %v52_v16 = vpop.permute.xlu0 %51  ;;  %v2722_v24 = vpop.permute.xlu1 %103 }
  0x88   :  { %vm54_vm2 = vcmp.eq.s32.totalorder %v2704_v12, %v52_v16  ;;  %vm106_vm4 = vcmp.ne.s32.totalorder %v2722_v24, 0 }
  0x89   :  { %v2318_v17 = vsel %vm54_vm2, 1.0, %v2627_v14 }
  0x8a   :  { %2320 = vmatmul.msk.f32.gmra.mxu0 %vm59_vm0, %v2318_v17 }
  0xff   :  { %v83_v20 = vpop.f32.mrf.mxu0 }
 0x100   :  { %v89_v21 = vadd.f32 %v83_v20, %v36_v19 }
 0x102   :  { %v2718_v22 = vsel %vm105_vm3, 0.0, %v89_v21 }
 0x103   :  { %v146_v23 = vsel %vm59_vm0, %v2718_v22, 0.0 }
 0x104   :  { %147 = vadd.xlane.f32.xlu2 %v146_v23 }
 0x107   :  { %v86_v25 = vpop.f32.mrf.mxu0 }
 0x108   :  { %v90_v26 = vadd.f32 %v86_v25, %v36_v19  ;;  %v203_v19 = vperm.slane %v2754_v61, 2 }
 0x10a   :  { %v2725_v27 = vsel %vm106_vm4, 0.0, %v90_v26 }
 0x10b   :  { %v149_v28 = vsel %vm59_vm0, %v2725_v27, 0.0 }
 0x10c   :  { %150 = vadd.xlane.f32.xlu2 %v149_v28 }
 0x177   :  { %v148_v36 = vpop.xlane.xlu2 %147 }
 0x178   :  { %v159_v37 = vmul.f32 %v2729_v35, %v148_v36 }
 0x17a   :  { %v161_v38 = vsub.f32 %v2718_v22, %v159_v37 }
 0x17c   :  { %v163_v39 = vmul.f32 %v161_v38, %v161_v38 }
 0x17e   :  { %v165_v40 = vsel %vm59_vm0, %v163_v39, 0.0 }
 0x17f   :  { %166 = vadd.xlane.f32.xlu0 %v165_v40  ;;  %v151_v41 = vpop.xlane.xlu2 %150 }
 0x180   :  { %v160_v42 = vmul.f32 %v2729_v35, %v151_v41 }
 0x182   :  { %v162_v43 = vsub.f32 %v2725_v27, %v160_v42  ;;  %v2633_v42 = vmov -1e+30  }
 0x184   :  { %v164_v44 = vmul.f32 %v162_v43, %v162_v43 }
 0x186   :  { %v168_v45 = vsel %vm59_vm0, %v164_v44, 0.0 }
 0x187   :  { %169 = vadd.xlane.f32.xlu1 %v168_v45 }
 0x1f2   :  { %v167_v50 = vpop.xlane.xlu0 %166 }
 0x1f3   :  { %v171_v51 = vmul.f32 %v167_v50, %v2729_v35 }
 0x1f5   :  { %v173_v52 = vadd.f32 1e-05, %v171_v51 }
 0x1f7   :  { %2465 = vrsqrt.f32 %v173_v52  ;;  %vm181_vm7 = vweird.f32 %v173_v52 }
 0x1fa   :  { %v170_v53 = vpop.xlane.xlu1 %169 }
 0x1fb   :  { %v172_v54 = vmul.f32 %v170_v53, %v2729_v35 }
 0x1fd   :  { %v2466_v55 = vpop.eup %2465  ;;  %v174_v56 = vadd.f32 1e-05, %v172_v54 }
 0x1fe   :  { %v176_v57 = vmul.f32 %v2466_v55, %v173_v52  ;;  %vm182_vm6 = vweird.f32 %v2466_v55 }
 0x1ff   :  { %2467 = vrsqrt.f32 %v174_v56  ;;  %vm183_vm8 = vmor %vm181_vm7, %vm182_vm6  ;;  %vm191_vm10 = vweird.f32 %v174_v56 }
 0x200   :  { %v177_v58 = vmul.f32 %v2466_v55, %v176_v57 }
 0x202   :  { %v178_v59 = vmul.f32 0.5, %v177_v58 }
 0x204   :  { %v179_v60 = vsub.f32 1.5, %v178_v59 }
 0x205   :  { %v2468_v62 = vpop.eup %2467 }
 0x206   :  { %v180_v63 = vmul.f32 %v2466_v55, %v179_v60  ;;  %v186_v0 = vmul.f32 %v2468_v62, %v174_v56  ;;  %vm192_vm9 = vweird.f32 %v2468_v62 }
 0x207   :  { %vm193_vm11 = vmor %vm191_vm10, %vm192_vm9 }
 0x208   :  { %v184_v2 = vsel %vm183_vm8, %v2466_v55, %v180_v63  ;;  %v187_v4 = vmul.f32 %v2468_v62, %v186_v0 }
 0x209   :  { %v195_v5 = vmul.f32 %v184_v2, %v161_v38 }
 0x20a   :  { %v188_v7 = vmul.f32 0.5, %v187_v4 }
 0x20b   :  { %v198_v8 = vmul.f32 %v197_v1, %v195_v5 }
 0x20c   :  { %v189_v9 = vsub.f32 1.5, %v188_v7 }
 0x20d   :  { %v201_v10 = vadd.f32 %v200_v6, %v198_v8 }
 0x20e   :  { %v190_v11 = vmul.f32 %v2468_v62, %v189_v9 }
 0x20f   :  { %2321 = vmatmul.msk.f32.vlgmr.msra.gmra.mxu1 %vm59_vm0, %v201_v10 }
 0x210   :  { %v194_v13 = vsel %vm193_vm11, %v2468_v62, %v190_v11 }
 0x211   :  { %v196_v15 = vmul.f32 %v194_v13, %v162_v43  ;;  %v2831_v43 = vsel %vm115_vm13, 0.0, %v2633_v42 }
 0x213   :  { %v199_v16 = vmul.f32 %v197_v1, %v196_v15 }
 0x215   :  { %v202_v17 = vadd.f32 %v200_v6, %v199_v16 }
 0x217   :  { %2322 = vmatmul.msk.f32.gmra.mxu1 %vm59_vm0, %v202_v17 }
 0x28c   :  { %v227_v20 = vpop.f32.mrf.mxu1 }
 0x28d   :  { %v2761_v21 = vadd.f32 %v227_v20, %v203_v19 }
 0x28f   :  { %243 = vrot.lane.b32.xlu0 %v2761_v21, %s2629_s24  ;;  %235 = vrot.lane.b32.xlu2 %v2761_v21, %s2630_s25 }
 0x294   :  { %v230_v23 = vpop.f32.mrf.mxu1 }
 0x295   :  { %v2767_v25 = vadd.f32 %v230_v23, %v203_v19 }
 0x297   :  { %245 = vrot.lane.b32.xlu1 %v2767_v25, %s2629_s24  ;;  %239 = vrot.lane.b32.xlu2 %v2761_v21, %s2631_s26 }
 0x29f   :  { %237 = vrot.lane.b32.xlu2 %v2767_v25, %s2630_s25 }
 0x2a7   :  { %241 = vrot.lane.b32.xlu2 %v2767_v25, %s2631_s26 }
 0x2af   :  { %247 = vrot.lane.b32.xlu2 %v2761_v21, %s2632_s27 }
 0x2b7   :  { %274 = vrot.lane.b32.xlu2 %v2767_v25, %s2632_s27 }
 0x2e9   :  { %v2781_v26 = vpop.permute.xlu2 %235 }
 0x2ea   :  { %300 = vrot.lane.b32.xlu0 %v2781_v26, %s2632_s27  ;;  %v2433_v23 = vpack.i.bf16 %v2781_v26, %v2761_v21 }
 0x2f1   :  { %v2785_v28 = vpop.permute.xlu2 %239 }
 0x2f2   :  { %352 = vrot.lane.b32.xlu1 %v2785_v28, %s2632_s27 }
 0x2f9   :  { %v2789_v29 = vpop.permute.xlu2 %237 }
 0x2fa   :  { %326 = vrot.lane.b32.xlu2 %v2789_v29, %s2632_s27 }
 0x301   :  { %v2793_v30 = vpop.permute.xlu0 %243  ;;  %v2795_v31 = vpop.permute.xlu2 %241 }
 0x302   :  { %404 = vrot.lane.b32.xlu2 %v2793_v30, %s2632_s27  ;;  %378 = vrot.lane.b32.xlu0 %v2795_v31, %s2632_s27 }
 0x309   :  { %v2801_v32 = vpop.permute.xlu1 %245  ;;  %v248_v33 = vpop.permute.xlu2 %247 }
 0x30a   :  { %430 = vrot.lane.b32.xlu1 %v2801_v32, %s2632_s27  ;;  %2323 = vmatpush.xpose.msk.msra.mxu2 %vm249_vm12, %v248_v33 }
 0x30d   :  { %2324 = vmatmul.msk.f32.vlgmr.msra.gmra.mxu2 %vm249_vm12, %v2761_v21 }
 0x311   :  { %v275_v34 = vpop.permute.xlu2 %274 }
 0x312   :  { %2325 = vmatpush.xpose.msk.msra.mxu3 %vm249_vm12, %v275_v34 }
 0x315   :  { %2326 = vmatmul.msk.f32.vlgmr.msra.gmra.mxu3 %vm249_vm12, %v2767_v25 }
 0x354   :  { %v327_v36 = vpop.permute.xlu2 %326 }
 0x355   :  { %2329 = vmatpush.xpose.msk.msrb.mxu3 %vm249_vm12, %v327_v36 }
 0x358   :  { %2330 = vmatmul.msk.f32.vlgmr.msrb.gmra.mxu3 %vm249_vm12, %v2789_v29 }
 0x35c   :  { %v301_v37 = vpop.permute.xlu0 %300  ;;  %v405_v38 = vpop.permute.xlu2 %404 }
 0x35d   :  { %2327 = vmatpush.xpose.msk.msrb.mxu2 %vm249_vm12, %v301_v37  ;;  %2335 = vmatpush.xpose.msk.msrb.mxu0 %vm249_vm12, %v405_v38 }
 0x360   :  { %2328 = vmatmul.msk.f32.vlgmr.msrb.gmra.mxu2 %vm249_vm12, %v2781_v26  ;;  %2336 = vmatmul.msk.f32.vlgmr.msrb.gmra.mxu0 %vm249_vm12, %v2793_v30 }
 0x364   :  { %v353_v39 = vpop.permute.xlu1 %352 }
 0x365   :  { %2331 = vmatpush.xpose.msk.msra.mxu2 %vm249_vm12, %v353_v39 }
 0x368   :  { %2332 = vmatmul.msk.f32.vlgmr.msra.gmra.mxu2 %vm249_vm12, %v2785_v28 }
 0x374   :  { %v379_v40 = vpop.permute.xlu0 %378 }
 0x375   :  { %2333 = vmatpush.xpose.msk.msra.mxu3 %vm249_vm12, %v379_v40 }
 0x378   :  { %2334 = vmatmul.msk.f32.vlgmr.msra.gmra.mxu3 %vm249_vm12, %v2795_v31 }
 0x37c   :  { %v431_v41 = vpop.permute.xlu1 %430 }
 0x37d   :  { %2337 = vmatpush.xpose.msk.msrb.mxu2 %vm249_vm12, %v431_v41 }
 0x380   :  { %2338 = vmatmul.msk.f32.vlgmr.msrb.gmra.mxu2 %vm249_vm12, %v2801_v32 }
 0x390   :  { %v271_v44 = vpop.f32.mrf.mxu2 }
 0x391   :  { %v456_v45 = vmul.f32 0.17677669, %v271_v44 }
 0x393   :  { %v464_v46 = vadd.f32 %v456_v45, %v2831_v43 }
 0x395   :  { %v472_v47 = vsel %vm249_vm12, %v464_v46, -inf }
 0x396   :  { %473 = vmax.xlane.f32.xlu0 %v472_v47 }
 0x398   :  { %v297_v48 = vpop.f32.mrf.mxu3 }
 0x399   :  { %v457_v49 = vmul.f32 0.17677669, %v297_v48 }
 0x39b   :  { %v465_v50 = vadd.f32 %v457_v49, %v2831_v43 }
 0x39d   :  { %v475_v51 = vsel %vm249_vm12, %v465_v50, -inf }
 0x39e   :  { %476 = vmax.xlane.f32.xlu1 %v475_v51 }
 0x3db   :  { %v349_v57 = vpop.f32.mrf.mxu3 }
 0x3dc   :  { %v459_v59 = vmul.f32 0.17677669, %v349_v57 }
 0x3dd   :  { %v427_v52 = vpop.f32.mrf.mxu0 }
 0x3de   :  { %v462_v53 = vmul.f32 0.17677669, %v427_v52  ;;  %v467_v0 = vadd.f32 %v459_v59, %v2831_v43 }
 0x3e0   :  { %v470_v3 = vadd.f32 %v462_v53, %v2831_v43  ;;  %v481_v4 = vsel %vm249_vm12, %v467_v0, -inf }
 0x3e2   :  { %v490_v54 = vsel %vm249_vm12, %v470_v3, -inf }
 0x3e3   :  { %v323_v55 = vpop.f32.mrf.mxu2  ;;  %491 = vmax.xlane.f32.xlu1 %v490_v54 }
 0x3e4   :  { %v458_v56 = vmul.f32 0.17677669, %v323_v55 }
 0x3e6   :  { %v466_v58 = vadd.f32 %v458_v56, %v2831_v43 }
 0x3e8   :  { %v478_v60 = vsel %vm249_vm12, %v466_v58, -inf }
 0x3e9   :  { %479 = vmax.xlane.f32.xlu2 %v478_v60 }
 0x3eb   :  { %v375_v62 = vpop.f32.mrf.mxu2 }
 0x3ec   :  { %v460_v63 = vmul.f32 0.17677669, %v375_v62 }
 0x3ee   :  { %v468_v1 = vadd.f32 %v460_v63, %v2831_v43 }
 0x3f0   :  { %v484_v2 = vsel %vm249_vm12, %v468_v1, -inf }
 0x3f1   :  { %485 = vmax.xlane.f32.xlu0 %v484_v2  ;;  %482 = vmax.xlane.f32.xlu2 %v481_v4 }
 0x3fb   :  { %v401_v5 = vpop.f32.mrf.mxu3 }
 0x3fc   :  { %v461_v6 = vmul.f32 0.17677669, %v401_v5 }
 0x3fe   :  { %v469_v7 = vadd.f32 %v461_v6, %v2831_v43 }
 0x400   :  { %v487_v8 = vsel %vm249_vm12, %v469_v7, -inf }
 0x401   :  { %488 = vmax.xlane.f32.xlu0 %v487_v8 }
 0x403   :  { %v453_v9 = vpop.f32.mrf.mxu2 }
 0x404   :  { %v463_v10 = vmul.f32 0.17677669, %v453_v9 }
 0x406   :  { %v471_v11 = vadd.f32 %v463_v10, %v2831_v43 }
 0x408   :  { %v493_v13 = vsel %vm249_vm12, %v471_v11, -inf }
 0x409   :  { %v474_v15 = vpop.xlane.xlu0 %473  ;;  %494 = vmax.xlane.f32.xlu2 %v493_v13 }
 0x40a   :  { %v496_v16 = vsub.f32 %v464_v46, %v474_v15 }
 0x40c   :  { %v504_v17 = vmul.f32 1.442695, %v496_v16 }
 0x40e   :  { %2469 = vpow2.f32 %v504_v17  ;;  %v2438_v17 = vpack.i.bf16 %v2785_v28, %v2767_v25 }
 0x411   :  { %v477_v19 = vpop.xlane.xlu1 %476 }
 0x412   :  { %v497_v20 = vsub.f32 %v465_v50, %v477_v19 }
 0x414   :  { %v2851_v33 = vpop.eup %2469  ;;  %v506_v34 = vmul.f32 1.442695, %v497_v20 }
 0x415   :  { %2434 = vrot.lane.b32.xlu0 %v2433_v23, %s2634_s28  ;;  %v520_v36 = vsel %vm249_vm12, %v2851_v33, 0.0 }
 0x416   :  { %2471 = vpow2.f32 %v506_v34  ;;  %521 = vadd.xlane.f32.xlu1 %v520_v36  ;;  %v2443_v34 = vpack.i.bf16 %v2793_v30, %v2789_v29 }
 0x41c   :  { %v2856_v37 = vpop.eup %2471 }
 0x41d   :  { %v523_v38 = vsel %vm249_vm12, %v2856_v37, 0.0 }
 0x41e   :  { %524 = vadd.xlane.f32.xlu2 %v523_v38 }
 0x456   :  { %v492_v39 = vpop.xlane.xlu1 %491 }
 0x457   :  { %v502_v40 = vsub.f32 %v470_v3, %v492_v39 }
 0x459   :  { %v516_v21 = vmul.f32 1.442695, %v502_v40 }
 0x45b   :  { %2473 = vpow2.f32 %v516_v21 }
 0x45c   :  { %v480_v26 = vpop.xlane.xlu2 %479 }
 0x45d   :  { %v498_v41 = vsub.f32 %v466_v58, %v480_v26 }
 0x45f   :  { %v508_v42 = vmul.f32 1.442695, %v498_v41 }
 0x461   :  { %v2860_v44 = vpop.eup %2473  ;;  %2475 = vpow2.f32 %v508_v42 }
 0x462   :  { %v538_v45 = vsel %vm249_vm12, %v2860_v44, 0.0 }
 0x463   :  { %539 = vadd.xlane.f32.xlu2 %v538_v45 }
 0x464   :  { %v486_v46 = vpop.xlane.xlu0 %485  ;;  %v483_v47 = vpop.xlane.xlu2 %482 }
 0x465   :  { %v500_v48 = vsub.f32 %v468_v1, %v486_v46  ;;  %v499_v49 = vsub.f32 %v467_v0, %v483_v47 }
 0x467   :  { %v2864_v50 = vpop.eup %2475  ;;  %v512_v51 = vmul.f32 1.442695, %v500_v48  ;;  %v510_v52 = vmul.f32 1.442695, %v499_v49 }
 0x468   :  { %v526_v53 = vsel %vm249_vm12, %v2864_v50, 0.0 }
 0x469   :  { %2477 = vpow2.f32 %v512_v51  ;;  %527 = vadd.xlane.f32.xlu0 %v526_v53 }
 0x46a   :  { %2479 = vpow2.f32 %v510_v52 }
 0x46f   :  { %v2868_v3 = vpop.eup %2477 }
 0x470   :  { %v2870_v54 = vpop.eup %2479  ;;  %v532_v55 = vsel %vm249_vm12, %v2868_v3, 0.0 }
 0x471   :  { %533 = vadd.xlane.f32.xlu1 %v532_v55  ;;  %v529_v56 = vsel %vm249_vm12, %v2870_v54, 0.0 }
 0x472   :  { %530 = vadd.xlane.f32.xlu0 %v529_v56 }
 0x474   :  { %v489_v57 = vpop.xlane.xlu0 %488 }
 0x475   :  { %v501_v58 = vsub.f32 %v469_v7, %v489_v57 }
 0x477   :  { %v514_v59 = vmul.f32 1.442695, %v501_v58 }
 0x479   :  { %2481 = vpow2.f32 %v514_v59 }
 0x47c   :  { %v495_v60 = vpop.xlane.xlu2 %494 }
 0x47d   :  { %v503_v62 = vsub.f32 %v471_v11, %v495_v60 }
 0x47f   :  { %v2876_v63 = vpop.eup %2481  ;;  %v518_v0 = vmul.f32 1.442695, %v503_v62 }
 0x480   :  { %v535_v1 = vsel %vm249_vm12, %v2876_v63, 0.0 }
 0x481   :  { %2483 = vpow2.f32 %v518_v0  ;;  %536 = vadd.xlane.f32.xlu1 %v535_v1 }
 0x486   :  { %794 = vrot.lane.b32.xlu0 %v2795_v31, %s2634_s28 }
 0x487   :  { %v2882_v2 = vpop.eup %2483  ;;  %v2435_v4 = vpop.permute.xlu0 %2434 }
 0x488   :  { %v2437_v5 = vunpack.i.h.bf16 %v2435_v4  ;;  %v2436_v6 = vunpack.i.l.bf16 %v2435_v4  ;;  %v541_v7 = vsel %vm249_vm12, %v2882_v2, 0.0 }
 0x489   :  { %v522_v8 = vpop.xlane.xlu1 %521  ;;  %542 = vadd.xlane.f32.xlu2 %v541_v7 }
 0x48a   :  { %2485 = vrcp.f32 %v522_v8  ;;  %685 = vmatpush.msra.mxu2 %v2436_v6  ;;  %737 = vmatpush.msra.mxu0 %v2437_v5  ;;  %v555_v31 = vand.u32 2147483648, %v522_v8  ;;  %v553_v15 = vand.u32 2147483647, %v522_v8  ;;  %vm549_vm15 = vweird.f32 %v522_v8 }
 0x48c   :  { %v556_v19 = vor.u32 1.1754944e-38, %v555_v31  ;;  %vm554_vm2 = vcmp.eq.f32.partialorder %v553_v15, 8.507059e+37 }
 0x48e   :  { %846 = vrot.lane.b32.xlu0 %v2801_v32, %s2634_s28 }
 0x490   :  { %v2486_v9 = vpop.eup %2485 }
 0x491   :  { %v545_v10 = vmul.f32 %v2486_v9, %v522_v8  ;;  %vm550_vm14 = vweird.f32 %v2486_v9  ;;  %v2896_v36 = vpop.xlane.xlu2 %524 }
 0x492   :  { %vm551_vm1 = vmor %vm549_vm15, %vm550_vm14  ;;  %vm564_vm15 = vweird.f32 %v2896_v36 }
 0x493   :  { %v546_v11 = vsub.f32 1.0, %v545_v10 }
 0x495   :  { %v547_v13 = vmul.f32 %v2486_v9, %v546_v11  ;;  %v568_v11 = vand.u32 2147483647, %v2896_v36 }
 0x497   :  { %v548_v16 = vadd.f32 %v2486_v9, %v547_v13 }
 0x499   :  { %v552_v20 = vsel %vm551_vm1, %v2486_v9, %v548_v16  ;;  %vm2958_vm1 = vcmp.eq.f32.partialorder %v568_v11, 8.507059e+37 }
 0x49a   :  { %v557_v23 = vsel %vm554_vm2, %v556_v19, %v552_v20  ;;  %2439 = vrot.lane.b32.xlu1 %v2438_v17, %s2634_s28  ;;  %v570_v17 = vand.u32 2147483648, %v2896_v36 }
 0x49b   :  { %v558_v32 = vmul.f32 %v2851_v33, %v557_v23 }
 0x49d   :  { %2339 = vmatmul.msk.f32.vlgmr.msra.gmra.mxu2 %vm249_vm12, %v558_v32 }
 0x4a1   :  { %2444 = vrot.lane.b32.xlu2 %v2443_v34, %s2634_s28 }
 0x4d6   :  { %v2898_v28 = vpop.xlane.xlu2 %539 }
 0x4d7   :  { %vm639_vm9 = vweird.f32 %v2898_v28  ;;  %v645_v9 = vand.u32 2147483648, %v2898_v28  ;;  %v643_v13 = vand.u32 2147483647, %v2898_v28 }
 0x4d9   :  { %vm644_vm2 = vcmp.eq.f32.partialorder %v643_v13, 8.507059e+37 }
 0x4dc   :  { %v528_v38 = vpop.xlane.xlu0 %527 }
 0x4dd   :  { %2487 = vrcp.f32 %v528_v38  ;;  %v585_v21 = vand.u32 2147483648, %v528_v38  ;;  %v583_v29 = vand.u32 2147483647, %v528_v38  ;;  %vm579_vm4 = vweird.f32 %v528_v38 }
 0x4de   :  { %2489 = vrcp.f32 %v2898_v28 }
 0x4df   :  { %v586_v41 = vor.u32 1.1754944e-38, %v585_v21  ;;  %vm584_vm6 = vcmp.eq.f32.partialorder %v583_v29, 8.507059e+37 }
 0x4e3   :  { %v2488_v25 = vpop.eup %2487 }
 0x4e4   :  { %v575_v39 = vmul.f32 %v2488_v25, %v528_v38  ;;  %vm580_vm3 = vweird.f32 %v2488_v25  ;;  %v2905_v42 = vpop.xlane.xlu1 %533  ;;  %v2490_v45 = vpop.eup %2489 }
 0x4e5   :  { %v2900_v40 = vpop.xlane.xlu0 %530  ;;  %vm581_vm5 = vmor %vm579_vm4, %vm580_vm3  ;;  %v635_v51 = vmul.f32 %v2490_v45, %v2898_v28  ;;  %vm640_vm7 = vweird.f32 %v2490_v45 }
 0x4e6   :  { %v576_v33 = vsub.f32 1.0, %v575_v39  ;;  %2491 = vrcp.f32 %v2900_v40  ;;  %v600_v10 = vand.u32 2147483648, %v2900_v40  ;;  %vm2933_vm10 = vmor %vm639_vm9, %vm640_vm7  ;;  %vm594_vm11 = vweird.f32 %v2900_v40  ;;  %v122_v39 = vld [vmem:[%s3599_s2 + $0x28] sm:$0xff] }
 0x4e7   :  { %2493 = vrcp.f32 %v2896_v36  ;;  %v636_v57 = vsub.f32 1.0, %v635_v51  ;;  %v598_v15 = vand.u32 2147483647, %v2900_v40  ;;  %v904_v51 = vperm.slane %v2754_v61, 3 }
 0x4e8   :  { %v577_v26 = vmul.f32 %v2488_v25, %v576_v33  ;;  %2495 = vrcp.f32 %v2905_v42  ;;  %v601_v28 = vor.u32 1.1754944e-38, %v600_v10 }
 0x4e9   :  { %v637_v62 = vmul.f32 %v2490_v45, %v636_v57  ;;  %vm599_vm3 = vcmp.eq.f32.partialorder %v598_v15, 8.507059e+37 }
 0x4ea   :  { %v578_v30 = vadd.f32 %v2488_v25, %v577_v26 }
 0x4eb   :  { %v638_v5 = vadd.f32 %v2490_v45, %v637_v62 }
 0x4ec   :  { %v582_v46 = vsel %vm581_vm5, %v2488_v25, %v578_v30  ;;  %v2492_v47 = vpop.eup %2491  ;;  %v646_v25 = vor.u32 1.1754944e-38, %v645_v9  ;;  %v571_v30 = vor.u32 1.1754944e-38, %v570_v17 }
 0x4ed   :  { %v587_v48 = vsel %vm584_vm6, %v586_v41, %v582_v46  ;;  %v590_v52 = vmul.f32 %v2492_v47, %v2900_v40  ;;  %v2912_v53 = vpop.eup %2493  ;;  %vm595_vm8 = vweird.f32 %v2492_v47  ;;  %v642_v32 = vsel %vm2933_vm10, %v2490_v45, %v638_v5 }
 0x4ee   :  { %v588_v49 = vmul.f32 %v2864_v50, %v587_v48  ;;  %v2914_v55 = vpop.eup %2495  ;;  %v560_v56 = vmul.f32 %v2912_v53, %v2896_v36  ;;  %vm565_vm13 = vweird.f32 %v2912_v53  ;;  %vm2946_vm14 = vmor %vm594_vm11, %vm595_vm8  ;;  %v647_v21 = vsel %vm644_vm2, %v646_v25, %v642_v32  ;;  %v128_v25 = vld [vmem:[%s3599_s2 + $0x58] sm:$0xff] }
 0x4ef   :  { %v591_v58 = vsub.f32 1.0, %v590_v52  ;;  %v605_v50 = vmul.f32 %v2914_v55, %v2905_v42  ;;  %vm2964_vm4 = vmor %vm564_vm15, %vm565_vm13  ;;  %vm610_vm5 = vweird.f32 %v2914_v55  ;;  %vm609_vm6 = vweird.f32 %v2905_v42 }
 0x4f0   :  { %2341 = vmatmul.msk.f32.vlgmr.msra.gmra.mxu0 %vm249_vm12, %v588_v49  ;;  %v561_v60 = vsub.f32 1.0, %v560_v56  ;;  %vm2976_vm7 = vmor %vm609_vm6, %vm610_vm5  ;;  %v613_v52 = vand.u32 2147483647, %v2905_v42  ;;  %v648_v57 = vmul.f32 %v2860_v44, %v647_v21 }
 0x4f1   :  { %v592_v0 = vmul.f32 %v2492_v47, %v591_v58  ;;  %v606_v1 = vsub.f32 1.0, %v605_v50 }
 0x4f2   :  { %v562_v4 = vmul.f32 %v2912_v53, %v561_v60  ;;  %vm614_vm9 = vcmp.eq.f32.partialorder %v613_v52, 8.507059e+37 }
 0x4f3   :  { %v593_v6 = vadd.f32 %v2492_v47, %v592_v0  ;;  %v607_v19 = vmul.f32 %v2914_v55, %v606_v1 }
 0x4f4   :  { %v2918_v59 = vpop.xlane.xlu1 %536  ;;  %v563_v23 = vadd.f32 %v2912_v53, %v562_v4 }
 0x4f5   :  { %2497 = vrcp.f32 %v2918_v59  ;;  %v597_v38 = vsel %vm2946_vm14, %v2492_v47, %v593_v6  ;;  %v608_v26 = vadd.f32 %v2914_v55, %v607_v19  ;;  %v615_v47 = vand.u32 2147483648, %v2905_v42 }
 0x4f6   :  { %v602_v29 = vsel %vm599_vm3, %v601_v28, %v597_v38  ;;  %v567_v36 = vsel %vm2964_vm4, %v2912_v53, %v563_v23  ;;  %v630_v11 = vand.u32 2147483648, %v2918_v59  ;;  %vm624_vm15 = vweird.f32 %v2918_v59  ;;  %v125_v28 = vld [vmem:[%s3599_s2 + $0x40] sm:$0xff] }
 0x4f7   :  { %v603_v53 = vmul.f32 %v2870_v54, %v602_v29  ;;  %v572_v58 = vsel %vm2958_vm1, %v571_v30, %v567_v36  ;;  %v612_v50 = vsel %vm2976_vm7, %v2914_v55, %v608_v26  ;;  %v616_v44 = vor.u32 1.1754944e-38, %v615_v47 }
 0x4f8   :  { %v2940_v16 = vpop.permute.xlu0 %794  ;;  %v573_v5 = vmul.f32 %v2856_v37, %v572_v58  ;;  %v631_v20 = vor.u32 1.1754944e-38, %v630_v11  ;;  %vm898_vm3 = vcmask 130048   ;;  %vm901_vm4 = vcmask 195584   ;;  %v117_v11 = vld [vmem:[%s3599_s2] sm:$0xff] }
 0x4f9   :  { %v617_v55 = vsel %vm614_vm9, %v616_v44, %v612_v50 }
 0x4fa   :  { %v618_v17 = vmul.f32 %v2868_v3, %v617_v55 }
 0x4fb   :  { %v2926_v8 = vpop.eup %2497 }
 0x4fc   :  { %v2924_v7 = vpop.xlane.xlu2 %542  ;;  %v620_v34 = vmul.f32 %v2926_v8, %v2918_v59  ;;  %vm625_vm13 = vweird.f32 %v2926_v8 }
 0x4fd   :  { %2499 = vrcp.f32 %v2924_v7  ;;  %v660_v60 = vand.u32 2147483648, %v2924_v7  ;;  %v658_v42 = vand.u32 2147483647, %v2924_v7  ;;  %vm654_vm10 = vweird.f32 %v2924_v7  ;;  %vm626_vm1 = vmor %vm624_vm15, %vm625_vm13 }
 0x4fe   :  { %v621_v41 = vsub.f32 1.0, %v620_v34 }
 0x4ff   :  { %v661_v4 = vor.u32 1.1754944e-38, %v660_v60  ;;  %vm659_vm14 = vcmp.eq.f32.partialorder %v658_v42, 8.507059e+37 }
 0x500   :  { %v622_v62 = vmul.f32 %v2926_v8, %v621_v41  ;;  %v847_v54 = vpop.permute.xlu0 %846 }
 0x502   :  { %v623_v6 = vadd.f32 %v2926_v8, %v622_v62 }
 0x503   :  { %v2500_v40 = vpop.eup %2499 }
 0x504   :  { %v650_v45 = vmul.f32 %v2500_v40, %v2924_v7  ;;  %v2445_v46 = vpop.permute.xlu2 %2444  ;;  %vm655_vm8 = vweird.f32 %v2500_v40  ;;  %v628_v7 = vand.u32 2147483647, %v2918_v59  ;;  %v627_v19 = vsel %vm626_vm1, %v2926_v8, %v623_v6  ;;  %v126_v6 = vld [vmem:[%s3599_s2 + $0x48] sm:$0xff] }
 0x505   :  { %v2447_v48 = vunpack.i.h.bf16 %v2445_v46  ;;  %v2446_v49 = vunpack.i.l.bf16 %v2445_v46  ;;  %vm656_vm11 = vmor %vm654_vm10, %vm655_vm8 }
 0x506   :  { %v651_v56 = vsub.f32 1.0, %v650_v45  ;;  %vm629_vm2 = vcmp.eq.f32.partialorder %v628_v7, 8.507059e+37 }
 0x507   :  { %763 = vmatpush.msrb.mxu1 %v2446_v49  ;;  %841 = vmatpush.msrb.mxu0 %v2447_v48  ;;  %v632_v59 = vsel %vm629_vm2, %v631_v20, %v627_v19 }
 0x508   :  { %v652_v0 = vmul.f32 %v2500_v40, %v651_v56  ;;  %2342 = vmatmul.msk.f32.vlgmr.msrb.gmra.mxu1 %vm249_vm12, %v603_v53  ;;  %2345 = vmatmul.msk.f32.vlgmr.msrb.gmra.mxu0 %vm249_vm12, %v648_v57  ;;  %v633_v3 = vmul.f32 %v2876_v63, %v632_v59 }
 0x509   :  { %867 = vmatpush.msra.mxu1 %v847_v54 }
 0x50a   :  { %v653_v1 = vadd.f32 %v2500_v40, %v652_v0 }
 0x50b   :  { %1005 = vmatpush.msrb.mxu1 %v126_v6  ;;  %v133_v6 = vld [vmem:[%s3600_s3 + $0x20] sm:$0xff] }
 0x50c   :  { %v657_v9 = vsel %vm656_vm11, %v2500_v40, %v653_v1  ;;  %v2440_v10 = vpop.permute.xlu1 %2439  ;;  %v119_v40 = vld [vmem:[%s3599_s2 + $0x10] sm:$0xff] }
 0x50d   :  { %v662_v31 = vsel %vm659_vm14, %v661_v4, %v657_v9  ;;  %v2442_v13 = vunpack.i.h.bf16 %v2440_v10  ;;  %v2441_v15 = vunpack.i.l.bf16 %v2440_v10  ;;  %v123_v9 = vld [vmem:[%s3599_s2 + $0x30] sm:$0xff]  ;;  %v120_v10 = vld [vmem:[%s3599_s2 + $0x18] sm:$0xff] }
 0x50e   :  { %v663_v37 = vmul.f32 %v2882_v2, %v662_v31  ;;  %1006 = vmatpush.msrb.mxu1 %v123_v9 }
 0x50f   :  { %711 = vmatpush.msrb.mxu3 %v2441_v15  ;;  %789 = vmatpush.msrb.mxu2 %v2442_v13 }
 0x510   :  { %2340 = vmatmul.msk.f32.vlgmr.msrb.gmra.mxu3 %vm249_vm12, %v573_v5  ;;  %2343 = vmatmul.msk.f32.vlgmr.msrb.gmra.mxu2 %vm249_vm12, %v618_v17 }
 0x511   :  { %815 = vmatpush.msra.mxu3 %v2940_v16  ;;  %2346 = vmatmul.msk.f32.vlgmr.msra.gmra.mxu1 %vm249_vm12, %v663_v37 }
 0x512   :  { %923 = vmatpush.msra.mxu2 %v128_v25  ;;  %1007 = vmatpush.msrb.mxu1 %v120_v10  ;;  %v983_v25 = vperm.slane %v2754_v61, 5 }
 0x514   :  { %924 = vmatpush.msra.mxu2 %v125_v28  ;;  %1008 = vmatpush.msrb.mxu1 %v117_v11  ;;  %v132_v11 = vld [vmem:[%s3600_s3 + $0x18] sm:$0xff] }
 0x516   :  { %925 = vmatpush.msra.mxu2 %v122_v39 }
 0x518   :  { %2344 = vmatmul.msk.f32.vlgmr.msra.gmra.mxu3 %vm249_vm12, %v633_v3  ;;  %926 = vmatpush.msra.mxu2 %v119_v40 }
 0x520   :  { %v687_v16 = vpop.f32.mrf.mxu2 }
 0x56d   :  { %v739_v2 = vpop.f32.mrf.mxu0 }
 0x56e   :  { %874 = vrot.lane.b32.xlu1 %v739_v2, %s2635_s29 }
 0x585   :  { %v765_v8 = vpop.f32.mrf.mxu1  ;;  %v843_v23 = vpop.f32.mrf.mxu0 }
 0x586   :  { %890 = vrot.lane.b32.xlu0 %v843_v23, %s2636_s30  ;;  %876 = vrot.lane.b32.xlu1 %v765_v8, %s2635_s29 }
 0x58e   :  { %v869_v32 = vpop.f32.mrf.mxu1 }
 0x58f   :  { %892 = vrot.lane.b32.xlu0 %v869_v32, %s2636_s30 }
 0x593   :  { %v713_v34 = vpop.f32.mrf.mxu3  ;;  %v791_v38 = vpop.f32.mrf.mxu2 }
 0x594   :  { %882 = vrot.lane.b32.xlu2 %v791_v38, %s2637_s8 }
 0x59b   :  { %v817_v63 = vpop.f32.mrf.mxu3 }
 0x59c   :  { %884 = vrot.lane.b32.xlu2 %v817_v63, %s2637_s8 }
 0x5e0   :  { %v875_v33 = vpop.permute.xlu1 %874 }
 0x5e1   :  { %v896_v26 = vsel %vm249_vm12, %v687_v16, %v875_v33  ;;  %v980_v16 = vperm.slane %v2754_v61, 4 }
 0x5ee   :  { %v883_v21 = vpop.permute.xlu2 %882 }
 0x5ef   :  { %v899_v29 = vsel %vm898_vm3, %v896_v26, %v883_v21 }
 0x5f6   :  { %v885_v46 = vpop.permute.xlu2 %884 }
 0x5f8   :  { %v891_v36 = vpop.permute.xlu0 %890  ;;  %v877_v41 = vpop.permute.xlu1 %876 }
 0x5f9   :  { %v902_v30 = vsel %vm901_vm4, %v899_v29, %v891_v36  ;;  %v897_v45 = vsel %vm249_vm12, %v713_v34, %v877_v41  ;;  %v144_v41 = vld [vmem:[%s3600_s3 + $0x78] sm:$0xff] }
 0x5fa   :  { %2347 = vmatmul.msk.f32.vlgmr.msra.gmra.mxu2 %vm59_vm0, %v902_v30  ;;  %v900_v48 = vsel %vm898_vm3, %v897_v45, %v885_v46  ;;  %1097 = vmatpush.msra.mxu0 %v144_v41  ;;  %v986_v45 = vperm.slane %v2754_v61, 6  ;;  %v143_v46 = vld [vmem:[%s3600_s3 + $0x70] sm:$0xff] }
 0x5fc   :  { %1098 = vmatpush.msra.mxu0 %v143_v46 }
 0x601   :  { %v893_v47 = vpop.permute.xlu0 %892 }
 0x602   :  { %v903_v49 = vsel %vm901_vm4, %v900_v48, %v893_v47  ;;  %v142_v47 = vld [vmem:[%s3600_s3 + $0x68] sm:$0xff] }
 0x603   :  { %2348 = vmatmul.msk.f32.gmra.mxu2 %vm59_vm0, %v903_v49  ;;  %1099 = vmatpush.msra.mxu0 %v142_v47 }
 0x67d   :  { %v928_v52 = vpop.f32.mrf.mxu2 }
 0x67e   :  { %v929_v56 = vadd.f32 %v928_v52, %v904_v51  ;;  %v140_v52 = vld [vmem:[%s3600_s3 + $0x58] sm:$0xff] }
 0x680   :  { %v3037_v53 = vadd.f32 %v929_v56, %v2718_v22 }
 0x682   :  { %v936_v57 = vsel %vm59_vm0, %v3037_v53, 0.0 }
 0x683   :  { %937 = vadd.xlane.f32.xlu1 %v936_v57  ;;  %v139_v57 = vld [vmem:[%s3600_s3 + $0x50] sm:$0xff] }
 0x686   :  { %v931_v58 = vpop.f32.mrf.mxu2 }
 0x687   :  { %v932_v50 = vadd.f32 %v931_v58, %v904_v51  ;;  %v141_v51 = vld [vmem:[%s3600_s3 + $0x60] sm:$0xff] }
 0x688   :  { %1100 = vmatpush.msra.mxu0 %v141_v51 }
 0x689   :  { %v3042_v60 = vadd.f32 %v932_v50, %v2725_v27  ;;  %v138_v50 = vld [vmem:[%s3600_s3 + $0x48] sm:$0xff] }
 0x68a   :  { %1101 = vmatpush.msra.mxu0 %v140_v52 }
 0x68b   :  { %v939_v62 = vsel %vm59_vm0, %v3042_v60, 0.0 }
 0x68c   :  { %940 = vadd.xlane.f32.xlu2 %v939_v62  ;;  %1102 = vmatpush.msra.mxu0 %v139_v57 }
 0x68e   :  { %1103 = vmatpush.msra.mxu0 %v138_v50 }
 0x6f6   :  { %v938_v0 = vpop.xlane.xlu1 %937 }
 0x6f7   :  { %v942_v42 = vmul.f32 %v938_v0, %v2729_v35 }
 0x6f9   :  { %v944_v54 = vsub.f32 %v3037_v53, %v942_v42  ;;  %v137_v42 = vld [vmem:[%s3600_s3 + $0x40] sm:$0xff] }
 0x6fa   :  { %1104 = vmatpush.msra.mxu0 %v137_v42 }
 0x6fb   :  { %v946_v22 = vmul.f32 %v944_v54, %v944_v54 }
 0x6fd   :  { %v948_v44 = vsel %vm59_vm0, %v946_v22, 0.0  ;;  %v136_v22 = vld [vmem:[%s3600_s3 + $0x38] sm:$0xff] }
 0x6fe   :  { %949 = vadd.xlane.f32.xlu0 %v948_v44  ;;  %1105 = vmatpush.msra.mxu0 %v136_v22 }
 0x6ff   :  { %v941_v1 = vpop.xlane.xlu2 %940 }
 0x700   :  { %v943_v55 = vmul.f32 %v941_v1, %v2729_v35  ;;  %v135_v1 = vld [vmem:[%s3600_s3 + $0x30] sm:$0xff] }
 0x701   :  { %1106 = vmatpush.msra.mxu0 %v135_v1 }
 0x702   :  { %v945_v4 = vsub.f32 %v3042_v60, %v943_v55 }
 0x704   :  { %v947_v27 = vmul.f32 %v945_v4, %v945_v4 }
 0x706   :  { %v951_v5 = vsel %vm59_vm0, %v947_v27, 0.0 }
 0x707   :  { %952 = vadd.xlane.f32.xlu1 %v951_v5 }
 0x771   :  { %v950_v31 = vpop.xlane.xlu0 %949 }
 0x772   :  { %v954_v13 = vmul.f32 %v950_v31, %v2729_v35 }
 0x774   :  { %v956_v15 = vadd.f32 1e-05, %v954_v13 }
 0x776   :  { %2501 = vrsqrt.f32 %v956_v15  ;;  %vm964_vm6 = vweird.f32 %v956_v15 }
 0x77a   :  { %v953_v7 = vpop.xlane.xlu1 %952 }
 0x77b   :  { %v955_v17 = vmul.f32 %v953_v7, %v2729_v35 }
 0x77c   :  { %v2502_v37 = vpop.eup %2501 }
 0x77d   :  { %v959_v19 = vmul.f32 %v2502_v37, %v956_v15  ;;  %v957_v20 = vadd.f32 1e-05, %v955_v17  ;;  %vm965_vm5 = vweird.f32 %v2502_v37  ;;  %v131_v15 = vld [vmem:[%s3600_s3 + $0x10] sm:$0xff] }
 0x77e   :  { %vm966_vm7 = vmor %vm964_vm6, %vm965_vm5 }
 0x77f   :  { %v960_v59 = vmul.f32 %v2502_v37, %v959_v19  ;;  %2503 = vrsqrt.f32 %v957_v20  ;;  %vm974_vm9 = vweird.f32 %v957_v20  ;;  %v129_v19 = vld [vmem:[%s3600_s3] sm:$0xff] }
 0x781   :  { %v961_v3 = vmul.f32 0.5, %v960_v59 }
 0x783   :  { %v962_v2 = vsub.f32 1.5, %v961_v3 }
 0x785   :  { %v2504_v8 = vpop.eup %2503  ;;  %v963_v23 = vmul.f32 %v2502_v37, %v962_v2 }
 0x786   :  { %v969_v32 = vmul.f32 %v2504_v8, %v957_v20  ;;  %vm975_vm8 = vweird.f32 %v2504_v8 }
 0x787   :  { %v967_v34 = vsel %vm966_vm7, %v2502_v37, %v963_v23  ;;  %vm976_vm10 = vmor %vm974_vm9, %vm975_vm8  ;;  %v130_v37 = vld [vmem:[%s3600_s3 + $0x8] sm:$0xff] }
 0x788   :  { %v978_v38 = vmul.f32 %v967_v34, %v944_v54  ;;  %v970_v63 = vmul.f32 %v2504_v8, %v969_v32 }
 0x78a   :  { %v981_v28 = vmul.f32 %v980_v16, %v978_v38  ;;  %v971_v39 = vmul.f32 0.5, %v970_v63 }
 0x78c   :  { %v972_v40 = vsub.f32 1.5, %v971_v39  ;;  %v984_v33 = vadd.f32 %v983_v25, %v981_v28 }
 0x78e   :  { %v973_v21 = vmul.f32 %v2504_v8, %v972_v40  ;;  %2349 = vmatmul.msk.f32.vlgmr.msrb.gmra.mxu1 %vm59_vm0, %v984_v33 }
 0x790   :  { %v977_v26 = vsel %vm976_vm10, %v2504_v8, %v973_v21 }
 0x791   :  { %v979_v29 = vmul.f32 %v977_v26, %v945_v4  ;;  %v134_v4 = vld [vmem:[%s3600_s3 + $0x28] sm:$0xff] }
 0x792   :  { %1107 = vmatpush.msra.mxu0 %v134_v4 }
 0x793   :  { %v982_v36 = vmul.f32 %v980_v16, %v979_v29 }
 0x794   :  { %1108 = vmatpush.msra.mxu0 %v133_v6 }
 0x795   :  { %v985_v30 = vadd.f32 %v983_v25, %v982_v36 }
 0x796   :  { %1109 = vmatpush.msra.mxu0 %v132_v11 }
 0x797   :  { %2350 = vmatmul.msk.f32.gmra.mxu1 %vm59_vm0, %v985_v30 }
 0x798   :  { %1110 = vmatpush.msra.mxu0 %v131_v15 }
 0x79a   :  { %1111 = vmatpush.msra.mxu0 %v130_v37 }
 0x79c   :  { %1112 = vmatpush.msra.mxu0 %v129_v19 }
 0x80b   :  { %v1010_v48 = vpop.f32.mrf.mxu1 }
 0x80c   :  { %v3080_v49 = vadd.f32 %v1010_v48, %v986_v45 }
 0x80e   :  { %v3086_v61 = vmul.f32 0.70710677, %v3080_v49 }
 0x810   :  { %v1024_v56 = vand.u32 2147483647, %v3086_v61  ;;  %vm1020_vm7 = vcmp.lt.f32.partialorder %v3086_v61, 0.0 }
 0x812   :  { %v1026_v58 = vmul.f32 0.3275911, %v1024_v56  ;;  %v1078_v23 = vsub.f32 0.0, %v1024_v56 }
 0x814   :  { %v1028_v62 = vadd.f32 1.0, %v1026_v58  ;;  %v1013_v0 = vpop.f32.mrf.mxu1  ;;  %v1080_v25 = vmul.f32 %v1078_v23, %v1024_v56 }
 0x815   :  { %v3101_v54 = vadd.f32 %v1013_v0, %v986_v45 }
 0x816   :  { %2505 = vrcp.f32 %v1028_v62  ;;  %v1041_v13 = vand.u32 2147483648, %v1028_v62  ;;  %v1039_v17 = vand.u32 2147483647, %v1028_v62  ;;  %vm1035_vm13 = vweird.f32 %v1028_v62 }
 0x817   :  { %v3107_v44 = vmul.f32 0.70710677, %v3101_v54  ;;  %v1082_v29 = vmul.f32 1.442695, %v1080_v25  ;;  %v1017_v19 = vmul.f32 0.5, %v3101_v54 }
 0x818   :  { %v1042_v59 = vor.u32 1.1754944e-38, %v1041_v13  ;;  %vm1040_vm15 = vcmp.eq.f32.partialorder %v1039_v17, 8.507059e+37 }
 0x819   :  { %v1025_v55 = vand.u32 2147483647, %v3107_v44  ;;  %vm1021_vm8 = vcmp.lt.f32.partialorder %v3107_v44, 0.0 }
 0x81b   :  { %v1027_v27 = vmul.f32 0.3275911, %v1025_v55  ;;  %v1079_v41 = vsub.f32 0.0, %v1025_v55 }
 0x81c   :  { %v2506_v5 = vpop.eup %2505 }
 0x81d   :  { %v1031_v9 = vmul.f32 %v2506_v5, %v1028_v62  ;;  %v1029_v10 = vadd.f32 1.0, %v1027_v27  ;;  %vm1036_vm11 = vweird.f32 %v2506_v5  ;;  %v1081_v52 = vmul.f32 %v1079_v41, %v1025_v55 }
 0x81e   :  { %vm1037_vm14 = vmor %vm1035_vm13, %vm1036_vm11  ;;  %v2638_v27 = vmov 1.0   ;;  %v1016_v55 = vmul.f32 0.5, %v3080_v49  ;;  %v2573_v49 = vld [vmem:[%s3601_s4] sm:$0xff] }
 0x81f   :  { %v1032_v31 = vsub.f32 1.0, %v1031_v9  ;;  %2507 = vrcp.f32 %v1029_v10  ;;  %v1056_v63 = vand.u32 2147483648, %v1029_v10  ;;  %v1054_v39 = vand.u32 2147483647, %v1029_v10 }
 0x820   :  { %vm1050_vm2 = vweird.f32 %v1029_v10  ;;  %2509 = vpow2.f32 %v1082_v29  ;;  %v1084_v62 = vmul.f32 1.442695, %v1081_v52  ;;  %v1023_v17 = vsel %vm1021_vm8, -1.0, %v2638_v27  ;;  %v2358_v29 = vld [vmem:[%s3599_s2 + $0x98] sm:$0xff] }
 0x821   :  { %v1033_v7 = vmul.f32 %v2506_v5, %v1032_v31  ;;  %v1057_v26 = vor.u32 1.1754944e-38, %v1056_v63  ;;  %vm1055_vm6 = vcmp.eq.f32.partialorder %v1054_v39, 8.507059e+37 }
 0x822   :  { %2511 = vpow2.f32 %v1084_v62 }
 0x823   :  { %v1034_v20 = vadd.f32 %v2506_v5, %v1033_v7 }
 0x825   :  { %v2508_v3 = vpop.eup %2507  ;;  %v1038_v2 = vsel %vm1037_vm14, %v2506_v5, %v1034_v20  ;;  %v1022_v5 = vsel %vm1020_vm7, -1.0, %v2638_v27 }
 0x826   :  { %v1043_v8 = vsel %vm1040_vm15, %v1042_v59, %v1038_v2  ;;  %v1046_v16 = vmul.f32 %v2508_v3, %v1029_v10  ;;  %vm1051_vm1 = vweird.f32 %v2508_v3  ;;  %v2510_v0 = vpop.eup %2509 }
 0x827   :  { %v1060_v32 = vmul.f32 1.0614054, %v1043_v8  ;;  %vm1052_vm5 = vmor %vm1050_vm2, %vm1051_vm1 }
 0x828   :  { %v1047_v34 = vsub.f32 1.0, %v1046_v16  ;;  %v2512_v13 = vpop.eup %2511 }
 0x829   :  { %v1062_v38 = vadd.f32 -1.4531521, %v1060_v32 }
 0x82a   :  { %v1048_v28 = vmul.f32 %v2508_v3, %v1047_v34 }
 0x82b   :  { %v1064_v40 = vmul.f32 %v1062_v38, %v1043_v8 }
 0x82c   :  { %v1049_v33 = vadd.f32 %v2508_v3, %v1048_v28 }
 0x82d   :  { %v1066_v21 = vadd.f32 1.4214138, %v1064_v40 }
 0x82e   :  { %v1053_v36 = vsel %vm1052_vm5, %v2508_v3, %v1049_v33  ;;  %v1096_v3 = vperm.slane %v2573_v49, 7 }
 0x82f   :  { %v1068_v30 = vmul.f32 %v1066_v21, %v1043_v8  ;;  %v1058_v45 = vsel %vm1055_vm6, %v1057_v26, %v1053_v36  ;;  %v2361_v26 = vld [vmem:[%s3599_s2 + $0xb0] sm:$0xff]  ;;  %v2355_v36 = vld [vmem:[%s3599_s2 + $0x80] sm:$0xff] }
 0x830   :  { %v1061_v46 = vmul.f32 1.0614054, %v1058_v45  ;;  %1223 = vmatpush.msra.mxu1 %v2361_v26 }
 0x831   :  { %v1070_v47 = vadd.f32 -0.28449672, %v1068_v30  ;;  %v2352_v30 = vld [vmem:[%s3599_s2 + $0x68] sm:$0xff] }
 0x832   :  { %v1063_v48 = vadd.f32 -1.4531521, %v1061_v46  ;;  %1224 = vmatpush.msra.mxu1 %v2358_v29 }
 0x833   :  { %v1072_v51 = vmul.f32 %v1070_v47, %v1043_v8 }
 0x834   :  { %v1065_v56 = vmul.f32 %v1063_v48, %v1058_v45  ;;  %1225 = vmatpush.msra.mxu1 %v2355_v36 }
 0x835   :  { %v1074_v57 = vadd.f32 0.2548296, %v1072_v51 }
 0x836   :  { %v1067_v58 = vadd.f32 1.4214138, %v1065_v56  ;;  %1226 = vmatpush.msra.mxu1 %v2352_v30 }
 0x837   :  { %v1076_v50 = vmul.f32 %v1074_v57, %v1043_v8 }
 0x838   :  { %v1069_v42 = vmul.f32 %v1067_v58, %v1058_v45 }
 0x839   :  { %v1086_v22 = vmul.f32 %v2510_v0, %v1076_v50  ;;  %v3173_v50 = vld [vmem:[%s3601_s4 + $0x8] sm:$0xff] }
 0x83a   :  { %v1071_v1 = vadd.f32 -0.28449672, %v1069_v42 }
 0x83b   :  { %v1088_v4 = vsub.f32 1.0, %v1086_v22  ;;  %v1198_v22 = vperm.slane %v3173_v50, 0 }
 0x83c   :  { %v1073_v6 = vmul.f32 %v1071_v1, %v1058_v45 }
 0x83d   :  { %v1090_v9 = vmul.f32 %v1088_v4, %v1022_v5 }
 0x83e   :  { %v1075_v10 = vadd.f32 0.2548296, %v1073_v6 }
 0x83f   :  { %v1092_v11 = vadd.f32 1.0, %v1090_v9  ;;  %v1201_v9 = vperm.slane %v3173_v50, 1 }
 0x840   :  { %v1077_v31 = vmul.f32 %v1075_v10, %v1058_v45 }
 0x841   :  { %v1094_v15 = vmul.f32 %v1092_v11, %v1016_v55 }
 0x842   :  { %v1087_v7 = vmul.f32 %v2512_v13, %v1077_v31 }
 0x843   :  { %1113 = vmatmul.f32.vlgmr.msra.gmra.mxu0 %v1094_v15 }
 0x844   :  { %v1089_v61 = vsub.f32 1.0, %v1087_v7 }
 0x846   :  { %v1091_v37 = vmul.f32 %v1089_v61, %v1023_v17 }
 0x848   :  { %v1093_v20 = vadd.f32 1.0, %v1091_v37  ;;  %v1204_v37 = vperm.slane %v3173_v50, 2 }
 0x84a   :  { %v1095_v59 = vmul.f32 %v1093_v20, %v1017_v19 }
 0x84c   :  { %1116 = vmatmul.f32.gmra.mxu0 %v1095_v59 }
 0x8c0   :  { %v1114_v2 = vpop.f32.mrf.mxu0 }
 0x8c1   :  { %v1115_v8 = vadd.f32 %v1114_v2, %v1096_v3 }
 0x8c3   :  { %v3141_v44 = vadd.f32 %v1115_v8, %v3037_v53 }
 0x8c5   :  { %v1154_v23 = vsel %vm59_vm0, %v3141_v44, 0.0 }
 0x8c6   :  { %1155 = vadd.xlane.f32.xlu2 %v1154_v23 }
 0x8c9   :  { %v1117_v16 = vpop.f32.mrf.mxu0 }
 0x8ca   :  { %v1118_v32 = vadd.f32 %v1117_v16, %v1096_v3 }
 0x8cc   :  { %v3146_v54 = vadd.f32 %v1118_v32, %v3042_v60 }
 0x8ce   :  { %v1157_v34 = vsel %vm59_vm0, %v3146_v54, 0.0 }
 0x8cf   :  { %1158 = vadd.xlane.f32.xlu0 %v1157_v34 }
 0x939   :  { %v1156_v38 = vpop.xlane.xlu2 %1155 }
 0x93a   :  { %v1160_v63 = vmul.f32 %v1156_v38, %v2729_v35 }
 0x93c   :  { %v1162_v25 = vsub.f32 %v3141_v44, %v1160_v63 }
 0x93e   :  { %v1164_v53 = vmul.f32 %v1162_v25, %v1162_v25 }
 0x940   :  { %v1166_v28 = vsel %vm59_vm0, %v1164_v53, 0.0 }
 0x941   :  { %1167 = vadd.xlane.f32.xlu1 %v1166_v28 }
 0x942   :  { %v1159_v39 = vpop.xlane.xlu0 %1158 }
 0x943   :  { %v1161_v40 = vmul.f32 %v1159_v39, %v2729_v35 }
 0x945   :  { %v1163_v33 = vsub.f32 %v3146_v54, %v1161_v40 }
 0x947   :  { %v1165_v60 = vmul.f32 %v1163_v33, %v1163_v33 }
 0x949   :  { %v1169_v21 = vsel %vm59_vm0, %v1165_v60, 0.0 }
 0x94a   :  { %1170 = vadd.xlane.f32.xlu2 %v1169_v21 }
 0x9b4   :  { %v1168_v41 = vpop.xlane.xlu1 %1167 }
 0x9b5   :  { %v1172_v45 = vmul.f32 %v1168_v41, %v2729_v35 }
 0x9b7   :  { %v1174_v46 = vadd.f32 1e-05, %v1172_v45 }
 0x9b9   :  { %2513 = vrsqrt.f32 %v1174_v46  ;;  %vm1182_vm10 = vweird.f32 %v1174_v46 }
 0x9bd   :  { %v1171_v47 = vpop.xlane.xlu2 %1170 }
 0x9be   :  { %v1173_v48 = vmul.f32 %v1171_v47, %v2729_v35 }
 0x9bf   :  { %v2514_v51 = vpop.eup %2513 }
 0x9c0   :  { %v1177_v52 = vmul.f32 %v2514_v51, %v1174_v46  ;;  %v1175_v56 = vadd.f32 1e-05, %v1173_v48  ;;  %vm1183_vm9 = vweird.f32 %v2514_v51 }
 0x9c1   :  { %vm1184_vm11 = vmor %vm1182_vm10, %vm1183_vm9 }
 0x9c2   :  { %v1178_v57 = vmul.f32 %v2514_v51, %v1177_v52  ;;  %2515 = vrsqrt.f32 %v1175_v56  ;;  %vm1192_vm14 = vweird.f32 %v1175_v56 }
 0x9c4   :  { %v1179_v58 = vmul.f32 0.5, %v1178_v57 }
 0x9c6   :  { %v1180_v62 = vsub.f32 1.5, %v1179_v58 }
 0x9c8   :  { %v2516_v0 = vpop.eup %2515  ;;  %v1181_v42 = vmul.f32 %v2514_v51, %v1180_v62 }
 0x9c9   :  { %v1187_v1 = vmul.f32 %v2516_v0, %v1175_v56  ;;  %vm1193_vm13 = vweird.f32 %v2516_v0 }
 0x9ca   :  { %v1185_v4 = vsel %vm1184_vm11, %v2514_v51, %v1181_v42  ;;  %vm1194_vm15 = vmor %vm1192_vm14, %vm1193_vm13 }
 0x9cb   :  { %v1196_v5 = vmul.f32 %v1185_v4, %v1162_v25  ;;  %v1188_v6 = vmul.f32 %v2516_v0, %v1187_v1 }
 0x9cd   :  { %v1199_v10 = vmul.f32 %v1198_v22, %v1196_v5  ;;  %v1189_v55 = vmul.f32 0.5, %v1188_v6 }
 0x9cf   :  { %v1190_v11 = vsub.f32 1.5, %v1189_v55  ;;  %v1202_v31 = vadd.f32 %v1201_v9, %v1199_v10 }
 0x9d1   :  { %v1191_v13 = vmul.f32 %v2516_v0, %v1190_v11  ;;  %2380 = vmatmul.msk.f32.vlgmr.msra.gmra.mxu1 %vm59_vm0, %v1202_v31 }
 0x9d3   :  { %v1195_v15 = vsel %vm1194_vm15, %v2516_v0, %v1191_v13 }
 0x9d4   :  { %v1197_v7 = vmul.f32 %v1195_v15, %v1163_v33 }
 0x9d6   :  { %v1200_v61 = vmul.f32 %v1198_v22, %v1197_v7 }
 0x9d8   :  { %v1203_v17 = vadd.f32 %v1201_v9, %v1200_v61 }
 0x9da   :  { %2381 = vmatmul.msk.f32.gmra.mxu1 %vm59_vm0, %v1203_v17 }
 0xa4e   :  { %v1228_v19 = vpop.f32.mrf.mxu1 }
 0xa4f   :  { %v3180_v20 = vadd.f32 %v1228_v19, %v1204_v37 }
 0xa51   :  { %1244 = vrot.lane.b32.xlu2 %v3180_v20, %s2629_s24  ;;  %1236 = vrot.lane.b32.xlu1 %v3180_v20, %s2630_s25 }
 0xa57   :  { %v1231_v59 = vpop.f32.mrf.mxu1 }
 0xa58   :  { %v3186_v49 = vadd.f32 %v1231_v59, %v1204_v37 }
 0xa59   :  { %1248 = vrot.lane.b32.xlu2 %v3180_v20, %s2632_s27 }
 0xa5a   :  { %1242 = vrot.lane.b32.xlu1 %v3186_v49, %s2631_s26  ;;  %1238 = vrot.lane.b32.xlu0 %v3186_v49, %s2630_s25 }
 0xa62   :  { %1240 = vrot.lane.b32.xlu0 %v3180_v20, %s2631_s26 }
 0xa6a   :  { %1246 = vrot.lane.b32.xlu0 %v3186_v49, %s2629_s24 }
 0xa72   :  { %1274 = vrot.lane.b32.xlu0 %v3186_v49, %s2632_s27 }
 0xaab   :  { %v3200_v3 = vpop.permute.xlu2 %1244 }
 0xab3   :  { %v1249_v2 = vpop.permute.xlu2 %1248 }
 0xab4   :  { %2382 = vmatpush.xpose.msk.msrb.mxu2 %vm249_vm12, %v1249_v2 }
 0xab7   :  { %2383 = vmatmul.msk.f32.vlgmr.msrb.gmra.mxu2 %vm249_vm12, %v3180_v20 }
 0xac3   :  { %v3205_v8 = vpop.permute.xlu1 %1236 }
 0xac4   :  { %1300 = vrot.lane.b32.xlu2 %v3205_v8, %s2632_s27 }
 0xacc   :  { %v3209_v23 = vpop.permute.xlu1 %1242  ;;  %v3211_v16 = vpop.permute.xlu0 %1238 }
 0xacd   :  { %1378 = vrot.lane.b32.xlu2 %v3209_v23, %s2632_s27  ;;  %1326 = vrot.lane.b32.xlu1 %v3211_v16, %s2632_s27 }
 0xad4   :  { %v3217_v32 = vpop.permute.xlu0 %1240 }
 0xad5   :  { %1352 = vrot.lane.b32.xlu0 %v3217_v32, %s2632_s27  ;;  %1404 = vrot.lane.b32.xlu1 %v3200_v3, %s2632_s27 }
 0xadc   :  { %v3223_v34 = vpop.permute.xlu0 %1246 }
 0xadd   :  { %1430 = vrot.lane.b32.xlu1 %v3223_v34, %s2632_s27 }
 0xae4   :  { %v1275_v38 = vpop.permute.xlu0 %1274 }
 0xae5   :  { %2384 = vmatpush.xpose.msk.msrb.mxu3 %vm249_vm12, %v1275_v38 }
 0xae8   :  { %2385 = vmatmul.msk.f32.vlgmr.msrb.gmra.mxu3 %vm249_vm12, %v3186_v49 }
 0xb1e   :  { %v1301_v63 = vpop.permute.xlu2 %1300 }
 0xb1f   :  { %2386 = vmatpush.xpose.msk.msrb.mxu1 %vm249_vm12, %v1301_v63  ;;  %v2448_v63 = vpack.i.bf16 %v3180_v20, %v3205_v8 }
 0xb22   :  { %2387 = vmatmul.msk.f32.vlgmr.msrb.gmra.mxu1 %vm249_vm12, %v3205_v8 }
 0xb27   :  { %v1379_v25 = vpop.permute.xlu2 %1378 }
 0xb28   :  { %2392 = vmatpush.xpose.msk.msra.mxu1 %vm249_vm12, %v1379_v25 }
 0xb2b   :  { %2393 = vmatmul.msk.f32.vlgmr.msra.gmra.mxu1 %vm249_vm12, %v3209_v23 }
 0xb3a   :  { %v1271_v53 = vpop.f32.mrf.mxu2 }
 0xb3b   :  { %v1456_v28 = vmul.f32 0.17677669, %v1271_v53 }
 0xb3d   :  { %v1464_v39 = vadd.f32 %v1456_v28, %v2831_v43 }
 0xb3f   :  { %v1327_v40 = vpop.permute.xlu1 %1326  ;;  %v1472_v33 = vsel %vm249_vm12, %v1464_v39, -inf }
 0xb40   :  { %2388 = vmatpush.xpose.msk.msra.mxu2 %vm249_vm12, %v1327_v40  ;;  %1473 = vmax.xlane.f32.xlu2 %v1472_v33 }
 0xb43   :  { %2389 = vmatmul.msk.f32.vlgmr.msra.gmra.mxu2 %vm249_vm12, %v3211_v16 }
 0xb47   :  { %v1353_v60 = vpop.permute.xlu0 %1352  ;;  %v1405_v21 = vpop.permute.xlu1 %1404 }
 0xb48   :  { %2390 = vmatpush.xpose.msk.msra.mxu3 %vm249_vm12, %v1353_v60  ;;  %2394 = vmatpush.xpose.msk.msrb.mxu2 %vm249_vm12, %v1405_v21 }
 0xb4b   :  { %2391 = vmatmul.msk.f32.vlgmr.msra.gmra.mxu3 %vm249_vm12, %v3217_v32  ;;  %2395 = vmatmul.msk.f32.vlgmr.msrb.gmra.mxu2 %vm249_vm12, %v3200_v3 }
 0xb4f   :  { %v1431_v26 = vpop.permute.xlu1 %1430 }
 0xb50   :  { %2396 = vmatpush.xpose.msk.msrb.mxu3 %vm249_vm12, %v1431_v26 }
 0xb53   :  { %2397 = vmatmul.msk.f32.vlgmr.msrb.gmra.mxu3 %vm249_vm12, %v3223_v34 }
 0xb6b   :  { %v1297_v29 = vpop.f32.mrf.mxu3 }
 0xb6c   :  { %v1457_v36 = vmul.f32 0.17677669, %v1297_v29 }
 0xb6e   :  { %v1465_v30 = vadd.f32 %v1457_v36, %v2831_v43 }
 0xb70   :  { %v1475_v41 = vsel %vm249_vm12, %v1465_v30, -inf }
 0xb71   :  { %1476 = vmax.xlane.f32.xlu1 %v1475_v41 }
 0xb9f   :  { %v1323_v45 = vpop.f32.mrf.mxu1 }
 0xba0   :  { %v1458_v46 = vmul.f32 0.17677669, %v1323_v45 }
 0xba2   :  { %v1466_v47 = vadd.f32 %v1458_v46, %v2831_v43 }
 0xba4   :  { %v1478_v48 = vsel %vm249_vm12, %v1466_v47, -inf }
 0xba5   :  { %1479 = vmax.xlane.f32.xlu0 %v1478_v48 }
 0xba8   :  { %v1401_v51 = vpop.f32.mrf.mxu1 }
 0xba9   :  { %v1461_v52 = vmul.f32 0.17677669, %v1401_v51 }
 0xbab   :  { %v1469_v56 = vadd.f32 %v1461_v52, %v2831_v43 }
 0xbad   :  { %v1487_v57 = vsel %vm249_vm12, %v1469_v56, -inf }
 0xbae   :  { %1488 = vmax.xlane.f32.xlu2 %v1487_v57 }
 0xbb3   :  { %v1474_v58 = vpop.xlane.xlu2 %1473 }
 0xbb4   :  { %v1496_v62 = vsub.f32 %v1464_v39, %v1474_v58 }
 0xbb6   :  { %v1504_v0 = vmul.f32 1.442695, %v1496_v62 }
 0xbb8   :  { %2517 = vpow2.f32 %v1504_v0 }
 0xbbe   :  { %v3256_v42 = vpop.eup %2517 }
 0xbbf   :  { %v1520_v22 = vsel %vm249_vm12, %v3256_v42, 0.0 }
 0xbc0   :  { %1521 = vadd.xlane.f32.xlu2 %v1520_v22 }
 0xbc6   :  { %v1349_v1 = vpop.f32.mrf.mxu2 }
 0xbc7   :  { %v1459_v4 = vmul.f32 0.17677669, %v1349_v1 }
 0xbc9   :  { %v1467_v5 = vadd.f32 %v1459_v4, %v2831_v43 }
 0xbcb   :  { %v1481_v6 = vsel %vm249_vm12, %v1467_v5, -inf }
 0xbcc   :  { %1482 = vmax.xlane.f32.xlu1 %v1481_v6 }
 0xbce   :  { %v1375_v9 = vpop.f32.mrf.mxu3  ;;  %v1427_v10 = vpop.f32.mrf.mxu2 }
 0xbcf   :  { %v1460_v55 = vmul.f32 0.17677669, %v1375_v9  ;;  %v1462_v11 = vmul.f32 0.17677669, %v1427_v10 }
 0xbd1   :  { %v1468_v31 = vadd.f32 %v1460_v55, %v2831_v43  ;;  %v1470_v13 = vadd.f32 %v1462_v11, %v2831_v43 }
 0xbd3   :  { %v1484_v15 = vsel %vm249_vm12, %v1468_v31, -inf  ;;  %v1490_v7 = vsel %vm249_vm12, %v1470_v13, -inf }
 0xbd4   :  { %1485 = vmax.xlane.f32.xlu0 %v1484_v15  ;;  %1491 = vmax.xlane.f32.xlu2 %v1490_v7 }
 0xbd6   :  { %v1453_v61 = vpop.f32.mrf.mxu3 }
 0xbd7   :  { %v1463_v17 = vmul.f32 0.17677669, %v1453_v61 }
 0xbd9   :  { %v3267_v37 = vadd.f32 %v1463_v17, %v2831_v43 }
 0xbdb   :  { %v1493_v19 = vsel %vm249_vm12, %v3267_v37, -inf }
 0xbdc   :  { %1494 = vmax.xlane.f32.xlu0 %v1493_v19 }
 0xbe4   :  { %v1477_v59 = vpop.xlane.xlu1 %1476 }
 0xbe5   :  { %v1497_v2 = vsub.f32 %v1465_v30, %v1477_v59 }
 0xbe7   :  { %v1506_v38 = vmul.f32 1.442695, %v1497_v2 }
 0xbe9   :  { %2519 = vpow2.f32 %v1506_v38  ;;  %v2453_v38 = vpack.i.bf16 %v3200_v3, %v3186_v49 }
 0xbec   :  { %2449 = vrot.lane.b32.xlu2 %v2448_v63, %s2634_s28  ;;  %v2458_v63 = vpack.i.bf16 %v3211_v16, %v3217_v32 }
 0xbef   :  { %v3274_v25 = vpop.eup %2519 }
 0xbf0   :  { %v1523_v53 = vsel %vm249_vm12, %v3274_v25, 0.0 }
 0xbf1   :  { %1524 = vadd.xlane.f32.xlu0 %v1523_v53 }
 0xc18   :  { %v1480_v43 = vpop.xlane.xlu0 %1479 }
 0xc19   :  { %v1498_v28 = vsub.f32 %v1466_v47, %v1480_v43 }
 0xc1b   :  { %v1508_v39 = vmul.f32 1.442695, %v1498_v28 }
 0xc1d   :  { %2521 = vpow2.f32 %v1508_v39 }
 0xc21   :  { %v1489_v40 = vpop.xlane.xlu2 %1488 }
 0xc22   :  { %v1501_v33 = vsub.f32 %v1469_v56, %v1489_v40 }
 0xc23   :  { %v3278_v60 = vpop.eup %2521 }
 0xc24   :  { %v1514_v21 = vmul.f32 1.442695, %v1501_v33  ;;  %v1526_v20 = vsel %vm249_vm12, %v3278_v60, 0.0 }
 0xc25   :  { %1527 = vadd.xlane.f32.xlu1 %v1526_v20 }
 0xc26   :  { %2523 = vpow2.f32 %v1514_v21 }
 0xc2c   :  { %v3282_v8 = vpop.eup %2523 }
 0xc2d   :  { %v1535_v26 = vsel %vm249_vm12, %v3282_v8, 0.0 }
 0xc2e   :  { %1536 = vadd.xlane.f32.xlu1 %v1535_v26 }
 0xc33   :  { %v1522_v29 = vpop.xlane.xlu2 %1521 }
 0xc34   :  { %2525 = vrcp.f32 %v1522_v29  ;;  %v1555_v57 = vand.u32 2147483648, %v1522_v29  ;;  %vm1549_vm2 = vweird.f32 %v1522_v29  ;;  %v1553_v0 = vand.u32 2147483647, %v1522_v29 }
 0xc36   :  { %v1556_v9 = vor.u32 1.1754944e-38, %v1555_v57  ;;  %vm1554_vm6 = vcmp.eq.f32.partialorder %v1553_v0, 8.507059e+37 }
 0xc3a   :  { %v2526_v36 = vpop.eup %2525 }
 0xc3b   :  { %v1545_v30 = vmul.f32 %v2526_v36, %v1522_v29  ;;  %vm1550_vm1 = vweird.f32 %v2526_v36 }
 0xc3c   :  { %vm1551_vm5 = vmor %vm1549_vm2, %vm1550_vm1 }
 0xc3d   :  { %v1546_v41 = vsub.f32 1.0, %v1545_v30 }
 0xc3f   :  { %v1483_v45 = vpop.xlane.xlu1 %1482  ;;  %v1547_v48 = vmul.f32 %v2526_v36, %v1546_v41 }
 0xc40   :  { %v1499_v46 = vsub.f32 %v1467_v5, %v1483_v45 }
 0xc41   :  { %v1548_v51 = vadd.f32 %v2526_v36, %v1547_v48 }
 0xc42   :  { %v1510_v47 = vmul.f32 1.442695, %v1499_v46 }
 0xc43   :  { %v1552_v6 = vsel %vm1551_vm5, %v2526_v36, %v1548_v51 }
 0xc44   :  { %2527 = vpow2.f32 %v1510_v47  ;;  %v1557_v10 = vsel %vm1554_vm6, %v1556_v9, %v1552_v6 }
 0xc45   :  { %v1558_v7 = vmul.f32 %v3256_v42, %v1557_v10 }
 0xc47   :  { %v1486_v52 = vpop.xlane.xlu0 %1485  ;;  %v1492_v56 = vpop.xlane.xlu2 %1491 }
 0xc48   :  { %v1500_v58 = vsub.f32 %v1468_v31, %v1486_v52  ;;  %v1502_v62 = vsub.f32 %v1470_v13, %v1492_v56 }
 0xc4a   :  { %v3286_v22 = vpop.eup %2527  ;;  %v1512_v1 = vmul.f32 1.442695, %v1500_v58  ;;  %v1516_v4 = vmul.f32 1.442695, %v1502_v62 }
 0xc4b   :  { %v1529_v5 = vsel %vm249_vm12, %v3286_v22, 0.0 }
 0xc4c   :  { %2529 = vpow2.f32 %v1512_v1  ;;  %1530 = vadd.xlane.f32.xlu0 %v1529_v5 }
 0xc4d   :  { %2531 = vpow2.f32 %v1516_v4 }
 0xc4f   :  { %v1495_v55 = vpop.xlane.xlu0 %1494  ;;  %v2450_v11 = vpop.permute.xlu2 %2449 }
 0xc50   :  { %v1503_v31 = vsub.f32 %v3267_v37, %v1495_v55  ;;  %v2452_v13 = vunpack.i.h.bf16 %v2450_v11  ;;  %v2451_v15 = vunpack.i.l.bf16 %v2450_v11 }
 0xc52   :  { %v3292_v61 = vpop.eup %2529  ;;  %v1518_v17 = vmul.f32 1.442695, %v1503_v31  ;;  %1685 = vmatpush.msrb.mxu1 %v2452_v13  ;;  %1737 = vmatpush.msra.mxu3 %v2451_v15 }
 0xc53   :  { %v3294_v19 = vpop.eup %2531  ;;  %2398 = vmatmul.msk.f32.vlgmr.msrb.gmra.mxu1 %vm249_vm12, %v1558_v7  ;;  %v1532_v59 = vsel %vm249_vm12, %v3292_v61, 0.0 }
 0xc54   :  { %2533 = vpow2.f32 %v1518_v17  ;;  %1533 = vadd.xlane.f32.xlu2 %v1532_v59  ;;  %v1538_v37 = vsel %vm249_vm12, %v3294_v19, 0.0 }
 0xc55   :  { %1539 = vadd.xlane.f32.xlu1 %v1538_v37 }
 0xc5a   :  { %v3301_v2 = vpop.eup %2533 }
 0xc5b   :  { %v1541_v42 = vsel %vm249_vm12, %v3301_v2, 0.0 }
 0xc5c   :  { %1542 = vadd.xlane.f32.xlu0 %v1541_v42 }
 0xc6c   :  { %1794 = vrot.lane.b32.xlu2 %v3209_v23, %s2634_s28 }
 0xc6e   :  { %2454 = vrot.lane.b32.xlu1 %v2453_v38, %s2634_s28 }
 0xc70   :  { %2459 = vrot.lane.b32.xlu0 %v2458_v63, %s2634_s28 }
 0xc78   :  { %1846 = vrot.lane.b32.xlu0 %v3223_v34, %s2634_s28  ;;  %v1525_v34 = vpop.xlane.xlu0 %1524 }
 0xc79   :  { %v1570_v62 = vand.u32 2147483648, %v1525_v34  ;;  %vm1564_vm13 = vweird.f32 %v1525_v34  ;;  %v1568_v1 = vand.u32 2147483647, %v1525_v34 }
 0xc7b   :  { %v1571_v55 = vor.u32 1.1754944e-38, %v1570_v62  ;;  %vm1569_vm15 = vcmp.eq.f32.partialorder %v1568_v1, 8.507059e+37 }
 0xc98   :  { %v1528_v53 = vpop.xlane.xlu1 %1527 }
 0xc99   :  { %2535 = vrcp.f32 %v1528_v53  ;;  %v1585_v40 = vand.u32 2147483648, %v1528_v53  ;;  %v1583_v3 = vand.u32 2147483647, %v1528_v53  ;;  %vm1579_vm8 = vweird.f32 %v1528_v53 }
 0xc9a   :  { %2537 = vrcp.f32 %v1525_v34 }
 0xc9b   :  { %v1586_v16 = vor.u32 1.1754944e-38, %v1585_v40  ;;  %vm1584_vm10 = vcmp.eq.f32.partialorder %v1583_v3, 8.507059e+37 }
 0xc9f   :  { %v2536_v43 = vpop.eup %2535 }
 0xca0   :  { %v1575_v28 = vmul.f32 %v2536_v43, %v1528_v53  ;;  %vm1580_vm7 = vweird.f32 %v2536_v43  ;;  %v2538_v20 = vpop.eup %2537 }
 0xca1   :  { %vm1581_vm9 = vmor %vm1579_vm8, %vm1580_vm7  ;;  %v3317_v26 = vpop.xlane.xlu1 %1536  ;;  %v1560_v36 = vmul.f32 %v2538_v20, %v1525_v34  ;;  %vm1565_vm11 = vweird.f32 %v2538_v20 }
 0xca2   :  { %v1576_v39 = vsub.f32 1.0, %v1575_v28  ;;  %vm1566_vm14 = vmor %vm1564_vm13, %vm1565_vm11 }
 0xca3   :  { %v1561_v30 = vsub.f32 1.0, %v1560_v36  ;;  %v1630_v36 = vand.u32 2147483648, %v3317_v26 }
 0xca4   :  { %v1577_v49 = vmul.f32 %v2536_v43, %v1576_v39 }
 0xca5   :  { %v1562_v46 = vmul.f32 %v2538_v20, %v1561_v30 }
 0xca6   :  { %v1578_v23 = vadd.f32 %v2536_v43, %v1577_v49 }
 0xca7   :  { %v1563_v52 = vadd.f32 %v2538_v20, %v1562_v46 }
 0xca8   :  { %v1582_v32 = vsel %vm1581_vm9, %v2536_v43, %v1578_v23  ;;  %vm1624_vm9 = vweird.f32 %v3317_v26 }
 0xca9   :  { %v1587_v33 = vsel %vm1584_vm10, %v1586_v16, %v1582_v32  ;;  %v1567_v5 = vsel %vm1566_vm14, %v2538_v20, %v1563_v52 }
 0xcaa   :  { %v1588_v21 = vmul.f32 %v3278_v60, %v1587_v33  ;;  %v1572_v13 = vsel %vm1569_vm15, %v1571_v55, %v1567_v5 }
 0xcab   :  { %v1573_v38 = vmul.f32 %v3274_v25, %v1572_v13 }
 0xcac   :  { %2400 = vmatmul.msk.f32.vlgmr.msra.gmra.mxu3 %vm249_vm12, %v1588_v21  ;;  %v1628_v21 = vand.u32 2147483647, %v3317_v26 }
 0xcbf   :  { %v3319_v29 = vpop.xlane.xlu0 %1530 }
 0xcc0   :  { %2539 = vrcp.f32 %v3319_v29  ;;  %v1600_v39 = vand.u32 2147483648, %v3319_v29  ;;  %vm1594_vm8 = vweird.f32 %v3319_v29  ;;  %v1598_v25 = vand.u32 2147483647, %v3319_v29 }
 0xcc2   :  { %v1601_v30 = vor.u32 1.1754944e-38, %v1600_v39  ;;  %v2353_v39 = vld [vmem:[%s3599_s2 + $0x70] sm:$0xff] }
 0xcc6   :  { %v3326_v60 = vpop.eup %2539 }
 0xcc7   :  { %v3322_v41 = vpop.xlane.xlu2 %1533  ;;  %v1590_v48 = vmul.f32 %v3326_v60, %v3319_v29  ;;  %vm1595_vm2 = vweird.f32 %v3326_v60 }
 0xcc8   :  { %v1540_v45 = vpop.xlane.xlu1 %1539  ;;  %2541 = vrcp.f32 %v3322_v41  ;;  %v1615_v23 = vand.u32 2147483648, %v3322_v41  ;;  %vm3366_vm10 = vmor %vm1594_vm8, %vm1595_vm2  ;;  %vm1609_vm11 = vweird.f32 %v3322_v41  ;;  %v1613_v33 = vand.u32 2147483647, %v3322_v41 }
 0xcc9   :  { %2543 = vrcp.f32 %v1540_v45  ;;  %v1591_v4 = vsub.f32 1.0, %v1590_v48  ;;  %v1645_v42 = vand.u32 2147483648, %v1540_v45  ;;  %vm1639_vm5 = vweird.f32 %v1540_v45 }
 0xcca   :  { %2545 = vrcp.f32 %v3317_v26  ;;  %v1643_v53 = vand.u32 2147483647, %v1540_v45  ;;  %vm1614_vm2 = vcmp.eq.f32.partialorder %v1613_v33, 8.507059e+37 }
 0xccb   :  { %v1592_v15 = vmul.f32 %v3326_v60, %v1591_v4  ;;  %v1646_v32 = vor.u32 1.1754944e-38, %v1645_v42 }
 0xccc   :  { %vm1644_vm13 = vcmp.eq.f32.partialorder %v1643_v53, 8.507059e+37 }
 0xccd   :  { %v1593_v63 = vadd.f32 %v3326_v60, %v1592_v15 }
 0xcce   :  { %v3328_v47 = vpop.eup %2541 }
 0xccf   :  { %v2544_v51 = vpop.eup %2543  ;;  %v1605_v56 = vmul.f32 %v3328_v47, %v3322_v41  ;;  %v3334_v57 = vpop.xlane.xlu0 %1542  ;;  %vm1610_vm7 = vweird.f32 %v3328_v47  ;;  %v1597_v34 = vsel %vm3366_vm10, %v3326_v60, %v1593_v63  ;;  %v1616_v60 = vor.u32 1.1754944e-38, %v1615_v23 }
 0xcd0   :  { %v3336_v58 = vpop.eup %2545  ;;  %v1635_v0 = vmul.f32 %v2544_v51, %v1540_v45  ;;  %2547 = vrcp.f32 %v3334_v57  ;;  %vm1640_vm1 = vweird.f32 %v2544_v51  ;;  %vm3376_vm14 = vmor %vm1609_vm11, %vm1610_vm7  ;;  %vm1654_vm7 = vweird.f32 %v3334_v57  ;;  %v1795_v55 = vpop.permute.xlu2 %1794 }
 0xcd1   :  { %v1620_v9 = vmul.f32 %v3336_v58, %v3317_v26  ;;  %v1606_v10 = vsub.f32 1.0, %v1605_v56  ;;  %vm3352_vm6 = vmor %vm1639_vm5, %vm1640_vm1  ;;  %vm1625_vm15 = vweird.f32 %v3336_v58  ;;  %vm1599_vm1 = vcmp.eq.f32.partialorder %v1598_v25, 8.507059e+37 }
 0xcd2   :  { %v1636_v6 = vsub.f32 1.0, %v1635_v0 }
 0xcd3   :  { %v1621_v7 = vsub.f32 1.0, %v1620_v9  ;;  %v1607_v17 = vmul.f32 %v3328_v47, %v1606_v10 }
 0xcd4   :  { %v1637_v11 = vmul.f32 %v2544_v51, %v1636_v6  ;;  %v1660_v6 = vand.u32 2147483648, %v3334_v57 }
 0xcd5   :  { %v1622_v28 = vmul.f32 %v3336_v58, %v1621_v7  ;;  %v1608_v49 = vadd.f32 %v3328_v47, %v1607_v17 }
 0xcd6   :  { %v3341_v31 = vpop.eup %2547  ;;  %v1638_v37 = vadd.f32 %v2544_v51, %v1637_v11  ;;  %v1631_v11 = vor.u32 1.1754944e-38, %v1630_v36  ;;  %v1661_v15 = vor.u32 1.1754944e-38, %v1660_v6  ;;  %v1902_v36 = vperm.slane %v3173_v50, 3 }
 0xcd7   :  { %v1650_v59 = vmul.f32 %v3341_v31, %v3334_v57  ;;  %v1612_v41 = vsel %vm3376_vm14, %v3328_v47, %v1608_v49  ;;  %v1623_v46 = vadd.f32 %v3336_v58, %v1622_v28  ;;  %vm1655_vm5 = vweird.f32 %v3341_v31  ;;  %v2356_v28 = vld [vmem:[%s3599_s2 + $0x88] sm:$0xff] }
 0xcd8   :  { %v1642_v3 = vsel %vm3352_vm6, %v2544_v51, %v1638_v37  ;;  %v1602_v51 = vsel %vm1599_vm1, %v1601_v30, %v1597_v34  ;;  %v1617_v62 = vsel %vm1614_vm2, %v1616_v60, %v1612_v41  ;;  %vm3392_vm6 = vmor %vm1624_vm9, %vm1625_vm15  ;;  %vm1629_vm9 = vcmp.eq.f32.partialorder %v1628_v21, 8.507059e+37 }
 0xcd9   :  { %v1651_v43 = vsub.f32 1.0, %v1650_v59  ;;  %v1647_v45 = vsel %vm1644_vm13, %v1646_v32, %v1642_v3  ;;  %v1627_v10 = vsel %vm3392_vm6, %v3336_v58, %v1623_v46  ;;  %v1603_v26 = vmul.f32 %v3286_v22, %v1602_v51  ;;  %vm1656_vm8 = vmor %vm1654_vm7, %vm1655_vm5  ;;  %v1687_v59 = vpop.f32.mrf.mxu1 }
 0xcda   :  { %v1648_v4 = vmul.f32 %v3294_v19, %v1647_v45  ;;  %v1658_v19 = vand.u32 2147483647, %v3334_v57  ;;  %v1618_v13 = vmul.f32 %v3292_v61, %v1617_v62  ;;  %v1632_v57 = vsel %vm1629_vm9, %v1631_v11, %v1627_v10  ;;  %v2357_v10 = vld [vmem:[%s3599_s2 + $0x90] sm:$0xff] }
 0xcdb   :  { %v1652_v29 = vmul.f32 %v3341_v31, %v1651_v43  ;;  %v1633_v17 = vmul.f32 %v3282_v8, %v1632_v57  ;;  %v2359_v43 = vld [vmem:[%s3599_s2 + $0xa0] sm:$0xff] }
 0xcdc   :  { %vm1659_vm10 = vcmp.eq.f32.partialorder %v1658_v19, 8.507059e+37  ;;  %v2354_v19 = vld [vmem:[%s3599_s2 + $0x78] sm:$0xff] }
 0xcdd   :  { %v1653_v0 = vadd.f32 %v3341_v31, %v1652_v29 }
 0xcdf   :  { %v1657_v58 = vsel %vm1656_vm8, %v3341_v31, %v1653_v0 }
 0xce0   :  { %v2455_v48 = vpop.permute.xlu1 %2454  ;;  %v1662_v22 = vsel %vm1659_vm10, %v1661_v15, %v1657_v58 }
 0xce1   :  { %v2457_v52 = vunpack.i.h.bf16 %v2455_v48  ;;  %v2456_v56 = vunpack.i.l.bf16 %v2455_v48  ;;  %v1663_v61 = vmul.f32 %v3301_v2, %v1662_v22  ;;  %v2362_v2 = vld [vmem:[%s3599_s2 + $0xb8] sm:$0xff] }
 0xce2   :  { %v2460_v1 = vpop.permute.xlu0 %2459 }
 0xce3   :  { %v2462_v5 = vunpack.i.h.bf16 %v2460_v1  ;;  %v2461_v9 = vunpack.i.l.bf16 %v2460_v1  ;;  %1711 = vmatpush.msra.mxu2 %v2456_v56  ;;  %1841 = vmatpush.msrb.mxu3 %v2457_v52 }
 0xce4   :  { %2399 = vmatmul.msk.f32.vlgmr.msra.gmra.mxu2 %vm249_vm12, %v1573_v38  ;;  %2404 = vmatmul.msk.f32.vlgmr.msrb.gmra.mxu3 %vm249_vm12, %v1648_v4 }
 0xce5   :  { %1815 = vmatpush.msrb.mxu2 %v1795_v55  ;;  %1763 = vmatpush.msrb.mxu0 %v2462_v5  ;;  %v2351_v55 = vld [vmem:[%s3599_s2 + $0x60] sm:$0xff] }
 0xce6   :  { %1789 = vmatpush.msra.mxu1 %v2461_v9  ;;  %2401 = vmatmul.msk.f32.vlgmr.msrb.gmra.mxu0 %vm249_vm12, %v1603_v26  ;;  %v2360_v9 = vld [vmem:[%s3599_s2 + $0xa8] sm:$0xff]  ;;  %s2641_s2 = smov [#allocation4]  }
 0xce7   :  { %2402 = vmatmul.msk.f32.vlgmr.msra.gmra.mxu1 %vm249_vm12, %v1618_v13  ;;  %2003 = vmatpush.msra.mxu2 %v2360_v9  ;;  %s2299_s14 = sshll.u32 %s2641_s2, 4  ;;  %s2300_s14 = int_to_ptr.vmem [resolvable:$true] %s2299_s14 }
 0xce8   :  { %1921 = vmatpush.msrb.mxu1 %v2362_v2  ;;  %v1981_v2 = vperm.slane %v3173_v50, 5 }
 0xce9   :  { %2004 = vmatpush.msra.mxu2 %v2357_v10  ;;  %v2366_v10 = vld [vmem:[%s3600_s3 + $0x98] sm:$0xff] }
 0xcea   :  { %v1847_v7 = vpop.permute.xlu0 %1846  ;;  %1922 = vmatpush.msrb.mxu1 %v2359_v43 }
 0xceb   :  { %1867 = vmatpush.msra.mxu0 %v1847_v7  ;;  %2005 = vmatpush.msra.mxu2 %v2354_v19 }
 0xcec   :  { %2403 = vmatmul.msk.f32.vlgmr.msrb.gmra.mxu2 %vm249_vm12, %v1633_v17  ;;  %1923 = vmatpush.msrb.mxu1 %v2356_v28 }
 0xced   :  { %2006 = vmatpush.msra.mxu2 %v2351_v55 }
 0xcee   :  { %2405 = vmatmul.msk.f32.vlgmr.msra.gmra.mxu0 %vm249_vm12, %v1663_v61  ;;  %1924 = vmatpush.msrb.mxu1 %v2353_v39 }
 0xd2f   :  { %v1739_v31 = vpop.f32.mrf.mxu3 }
 0xd30   :  { %1874 = vrot.lane.b32.xlu2 %v1739_v31, %s2635_s29 }
 0xd63   :  { %v1765_v37 = vpop.f32.mrf.mxu0 }
 0xd64   :  { %v1791_v42 = vpop.f32.mrf.mxu1  ;;  %1876 = vrot.lane.b32.xlu2 %v1765_v37, %s2635_s29 }
 0xd65   :  { %1882 = vrot.lane.b32.xlu1 %v1791_v42, %s2637_s8  ;;  %v1978_v42 = vperm.slane %v3173_v50, 4 }
 0xd67   :  { %v1713_v38 = vpop.f32.mrf.mxu2  ;;  %v1843_v63 = vpop.f32.mrf.mxu3 }
 0xd68   :  { %1890 = vrot.lane.b32.xlu0 %v1843_v63, %s2636_s30 }
 0xd6b   :  { %v1869_v8 = vpop.f32.mrf.mxu0 }
 0xd6f   :  { %v1817_v53 = vpop.f32.mrf.mxu2 }
 0xd70   :  { %1884 = vrot.lane.b32.xlu1 %v1817_v53, %s2637_s8  ;;  %1892 = vrot.lane.b32.xlu0 %v1869_v8, %s2636_s30 }
 0xd8a   :  { %v1875_v40 = vpop.permute.xlu2 %1874 }
 0xd8b   :  { %v1896_v25 = vsel %vm249_vm12, %v1687_v59, %v1875_v40 }
 0xdbe   :  { %v1877_v32 = vpop.permute.xlu2 %1876 }
 0xdbf   :  { %v1897_v33 = vsel %vm249_vm12, %v1713_v38, %v1877_v32  ;;  %v2378_v32 = vld [vmem:[%s3600_s3 + $0xf8] sm:$0xff] }
 0xdc0   :  { %2095 = vmatpush.msra.mxu3 %v2378_v32 }
 0xdd7   :  { %v1883_v49 = vpop.permute.xlu1 %1882 }
 0xdd8   :  { %v1898_v3 = vsel %vm898_vm3, %v1896_v25, %v1883_v49 }
 0xdda   :  { %v1891_v23 = vpop.permute.xlu0 %1890 }
 0xddb   :  { %v1900_v16 = vsel %vm901_vm4, %v1898_v3, %v1891_v23 }
 0xddc   :  { %2406 = vmatmul.msk.f32.vlgmr.msrb.gmra.mxu1 %vm59_vm0, %v1900_v16 }
 0xde2   :  { %v1885_v21 = vpop.permute.xlu1 %1884  ;;  %v1893_v34 = vpop.permute.xlu0 %1892 }
 0xde3   :  { %v1899_v20 = vsel %vm898_vm3, %v1897_v33, %v1885_v21  ;;  %v2377_v33 = vld [vmem:[%s3600_s3 + $0xf0] sm:$0xff]  ;;  %v1984_v21 = vperm.slane %v3173_v50, 6 }
 0xde4   :  { %v1901_v29 = vsel %vm901_vm4, %v1899_v20, %v1893_v34  ;;  %2096 = vmatpush.msra.mxu3 %v2377_v33  ;;  %v2376_v34 = vld [vmem:[%s3600_s3 + $0xe8] sm:$0xff]  ;;  %v2375_v20 = vld [vmem:[%s3600_s3 + $0xe0] sm:$0xff] }
 0xde5   :  { %2407 = vmatmul.msk.f32.gmra.mxu1 %vm59_vm0, %v1901_v29 }
 0xde6   :  { %2097 = vmatpush.msra.mxu3 %v2376_v34 }
 0xde8   :  { %2098 = vmatpush.msra.mxu3 %v2375_v20 }
 0xe59   :  { %v1926_v30 = vpop.f32.mrf.mxu1 }
 0xe5a   :  { %v1927_v45 = vadd.f32 %v1926_v30, %v1902_v36  ;;  %v2374_v30 = vld [vmem:[%s3600_s3 + $0xd8] sm:$0xff] }
 0xe5b   :  { %2099 = vmatpush.msra.mxu3 %v2374_v30 }
 0xe5c   :  { %v3443_v41 = vadd.f32 %v1927_v45, %v3141_v44  ;;  %v2373_v45 = vld [vmem:[%s3600_s3 + $0xd0] sm:$0xff] }
 0xe5d   :  { %2100 = vmatpush.msra.mxu3 %v2373_v45 }
 0xe5e   :  { %v1934_v46 = vsel %vm59_vm0, %v3443_v41, 0.0 }
 0xe5f   :  { %1935 = vadd.xlane.f32.xlu2 %v1934_v46 }
 0xe62   :  { %v1929_v60 = vpop.f32.mrf.mxu1 }
 0xe63   :  { %v1930_v48 = vadd.f32 %v1929_v60, %v1902_v36  ;;  %v2372_v60 = vld [vmem:[%s3600_s3 + $0xc8] sm:$0xff] }
 0xe64   :  { %2101 = vmatpush.msra.mxu3 %v2372_v60 }
 0xe65   :  { %v3448_v51 = vadd.f32 %v1930_v48, %v3146_v54 }
 0xe67   :  { %v1937_v52 = vsel %vm59_vm0, %v3448_v51, 0.0 }
 0xe68   :  { %1938 = vadd.xlane.f32.xlu1 %v1937_v52  ;;  %v2371_v52 = vld [vmem:[%s3600_s3 + $0xc0] sm:$0xff] }
 0xe69   :  { %2102 = vmatpush.msra.mxu3 %v2371_v52 }
 0xed2   :  { %v1936_v56 = vpop.xlane.xlu2 %1935 }
 0xed3   :  { %v1940_v62 = vmul.f32 %v1936_v56, %v2729_v35 }
 0xed5   :  { %v1942_v0 = vsub.f32 %v3443_v41, %v1940_v62 }
 0xed7   :  { %v1944_v44 = vmul.f32 %v1942_v0, %v1942_v0 }
 0xed9   :  { %v1946_v1 = vsel %vm59_vm0, %v1944_v44, 0.0 }
 0xeda   :  { %1947 = vadd.xlane.f32.xlu0 %v1946_v1  ;;  %v2369_v1 = vld [vmem:[%s3600_s3 + $0xb0] sm:$0xff] }
 0xedb   :  { %v1939_v4 = vpop.xlane.xlu1 %1938 }
 0xedc   :  { %v1941_v47 = vmul.f32 %v1939_v4, %v2729_v35 }
 0xede   :  { %v1943_v6 = vsub.f32 %v3448_v51, %v1941_v47  ;;  %v2368_v47 = vld [vmem:[%s3600_s3 + $0xa8] sm:$0xff] }
 0xee0   :  { %v1945_v54 = vmul.f32 %v1943_v6, %v1943_v6 }
 0xee2   :  { %v1949_v5 = vsel %vm59_vm0, %v1945_v54, 0.0  ;;  %v2367_v54 = vld [vmem:[%s3600_s3 + $0xa0] sm:$0xff] }
 0xee3   :  { %1950 = vadd.xlane.f32.xlu2 %v1949_v5 }
 0xf4d   :  { %v1948_v26 = vpop.xlane.xlu0 %1947 }
 0xf4e   :  { %v1952_v11 = vmul.f32 %v1948_v26, %v2729_v35  ;;  %v2365_v26 = vld [vmem:[%s3600_s3 + $0x90] sm:$0xff] }
 0xf50   :  { %v1954_v13 = vadd.f32 1e-05, %v1952_v11 }
 0xf52   :  { %2549 = vrsqrt.f32 %v1954_v13  ;;  %vm1962_vm3 = vweird.f32 %v1954_v13 }
 0xf56   :  { %v1951_v58 = vpop.xlane.xlu2 %1950 }
 0xf57   :  { %v1953_v57 = vmul.f32 %v1951_v58, %v2729_v35  ;;  %v2364_v58 = vld [vmem:[%s3600_s3 + $0x88] sm:$0xff] }
 0xf58   :  { %v2550_v15 = vpop.eup %2549 }
 0xf59   :  { %v1957_v22 = vmul.f32 %v2550_v15, %v1954_v13  ;;  %v1955_v7 = vadd.f32 1e-05, %v1953_v57  ;;  %vm1963_vm12 = vweird.f32 %v2550_v15 }
 0xf5a   :  { %vm1964_vm4 = vmor %vm1962_vm3, %vm1963_vm12 }
 0xf5b   :  { %v1958_v17 = vmul.f32 %v2550_v15, %v1957_v22  ;;  %2551 = vrsqrt.f32 %v1955_v7  ;;  %vm1972_vm13 = vweird.f32 %v1955_v7  ;;  %v2363_v22 = vld [vmem:[%s3600_s3 + $0x80] sm:$0xff] }
 0xf5d   :  { %v1959_v61 = vmul.f32 0.5, %v1958_v17 }
 0xf5f   :  { %v1960_v31 = vsub.f32 1.5, %v1959_v61 }
 0xf61   :  { %v2552_v59 = vpop.eup %2551  ;;  %v1961_v37 = vmul.f32 %v2550_v15, %v1960_v31 }
 0xf62   :  { %v1967_v38 = vmul.f32 %v2552_v59, %v1955_v7  ;;  %vm1973_vm11 = vweird.f32 %v2552_v59 }
 0xf63   :  { %v1965_v63 = vsel %vm1964_vm4, %v2550_v15, %v1961_v37  ;;  %vm1974_vm14 = vmor %vm1972_vm13, %vm1973_vm11 }
 0xf64   :  { %v1976_v8 = vmul.f32 %v1965_v63, %v1942_v0  ;;  %v1968_v53 = vmul.f32 %v2552_v59, %v1967_v38  ;;  %v2370_v0 = vld [vmem:[%s3600_s3 + $0xb8] sm:$0xff] }
 0xf65   :  { %2103 = vmatpush.msra.mxu3 %v2370_v0 }
 0xf66   :  { %v1979_v43 = vmul.f32 %v1978_v42, %v1976_v8  ;;  %v1969_v28 = vmul.f32 0.5, %v1968_v53 }
 0xf67   :  { %2104 = vmatpush.msra.mxu3 %v2369_v1 }
 0xf68   :  { %v1970_v39 = vsub.f32 1.5, %v1969_v28  ;;  %v1982_v40 = vadd.f32 %v1981_v2, %v1979_v43 }
 0xf69   :  { %2105 = vmatpush.msra.mxu3 %v2368_v47 }
 0xf6a   :  { %v1971_v49 = vmul.f32 %v2552_v59, %v1970_v39  ;;  %2408 = vmatmul.msk.f32.vlgmr.msra.gmra.mxu2 %vm59_vm0, %v1982_v40 }
 0xf6b   :  { %2106 = vmatpush.msra.mxu3 %v2367_v54 }
 0xf6c   :  { %v1975_v25 = vsel %vm1974_vm14, %v2552_v59, %v1971_v49 }
 0xf6d   :  { %v1977_v3 = vmul.f32 %v1975_v25, %v1943_v6  ;;  %2107 = vmatpush.msra.mxu3 %v2366_v10 }
 0xf6f   :  { %v1980_v23 = vmul.f32 %v1978_v42, %v1977_v3  ;;  %2108 = vmatpush.msra.mxu3 %v2365_v26 }
 0xf71   :  { %v1983_v16 = vadd.f32 %v1981_v2, %v1980_v23  ;;  %2109 = vmatpush.msra.mxu3 %v2364_v58 }
 0xf73   :  { %2409 = vmatmul.msk.f32.gmra.mxu2 %vm59_vm0, %v1983_v16  ;;  %2110 = vmatpush.msra.mxu3 %v2363_v22 }
 0xfed   :  { %v2008_v29 = vpop.f32.mrf.mxu2 }
 0xfee   :  { %v3489_v36 = vadd.f32 %v2008_v29, %v1984_v21 }
 0xff0   :  { %v3495_v50 = vmul.f32 0.70710677, %v3489_v36 }
 0xff2   :  { %v2022_v46 = vand.u32 2147483647, %v3495_v50  ;;  %vm2018_vm10 = vcmp.lt.f32.partialorder %v3495_v50, 0.0 }
 0xff3   :  { %v2020_v54 = vsel %vm2018_vm10, -1.0, %v2638_v27 }
 0xff4   :  { %v2024_v48 = vmul.f32 0.3275911, %v2022_v46  ;;  %v2076_v37 = vsub.f32 0.0, %v2022_v46 }
 0xff6   :  { %v2026_v56 = vadd.f32 1.0, %v2024_v48  ;;  %v2011_v62 = vpop.f32.mrf.mxu2  ;;  %v2078_v2 = vmul.f32 %v2076_v37, %v2022_v46 }
 0xff7   :  { %v3510_v44 = vadd.f32 %v2011_v62, %v1984_v21 }
 0xff8   :  { %2553 = vrcp.f32 %v2026_v56  ;;  %v2039_v13 = vand.u32 2147483648, %v2026_v56  ;;  %v2037_v15 = vand.u32 2147483647, %v2026_v56  ;;  %vm2033_vm1 = vweird.f32 %v2026_v56 }
 0xff9   :  { %v3516_v4 = vmul.f32 0.70710677, %v3510_v44  ;;  %v2080_v3 = vmul.f32 1.442695, %v2078_v2 }
 0xffa   :  { %v2040_v17 = vor.u32 1.1754944e-38, %v2039_v13  ;;  %vm2038_vm5 = vcmp.eq.f32.partialorder %v2037_v15, 8.507059e+37  ;;  %v2015_v15 = vmul.f32 0.5, %v3510_v44 }
 0xffb   :  { %v2023_v6 = vand.u32 2147483647, %v3516_v4  ;;  %vm2019_vm12 = vcmp.lt.f32.partialorder %v3516_v4, 0.0 }
 0xffc   :  { %v2021_v58 = vsel %vm2019_vm12, -1.0, %v2638_v27 }
 0xffd   :  { %v2025_v5 = vmul.f32 0.3275911, %v2023_v6  ;;  %v2077_v32 = vsub.f32 0.0, %v2023_v6 }
 0xffe   :  { %v2554_v9 = vpop.eup %2553 }
 0xfff   :  { %v2029_v19 = vmul.f32 %v2554_v9, %v2026_v56  ;;  %v2027_v55 = vadd.f32 1.0, %v2025_v5  ;;  %vm2034_vm15 = vweird.f32 %v2554_v9  ;;  %v2079_v30 = vmul.f32 %v2077_v32, %v2023_v6 }
0x1000   :  { %vm2035_vm2 = vmor %vm2033_vm1, %vm2034_vm15  ;;  %v2014_v6 = vmul.f32 0.5, %v3489_v36  ;;  %v2574_v36 = vld [vmem:[%s3601_s4 + $0x8] sm:$0xff] }
0x1001   :  { %v2030_v11 = vsub.f32 1.0, %v2029_v19  ;;  %2555 = vrcp.f32 %v2027_v55  ;;  %v2054_v53 = vand.u32 2147483648, %v2027_v55  ;;  %v2052_v28 = vand.u32 2147483647, %v2027_v55 }
0x1002   :  { %vm2048_vm7 = vweird.f32 %v2027_v55  ;;  %2557 = vpow2.f32 %v2080_v3  ;;  %v2082_v52 = vmul.f32 1.442695, %v2079_v30  ;;  %v2122_v3 = vld [vmem:[%s3602_s5 + $0x10] sm:$0xff] }
0x1003   :  { %v2031_v57 = vmul.f32 %v2554_v9, %v2030_v11  ;;  %v2055_v25 = vor.u32 1.1754944e-38, %v2054_v53  ;;  %vm2053_vm9 = vcmp.eq.f32.partialorder %v2052_v28, 8.507059e+37 }
0x1004   :  { %2559 = vpow2.f32 %v2082_v52 }
0x1005   :  { %v2032_v7 = vadd.f32 %v2554_v9, %v2031_v57 }
0x1007   :  { %v2556_v61 = vpop.eup %2555  ;;  %v2036_v31 = vsel %vm2035_vm2, %v2554_v9, %v2032_v7 }
0x1008   :  { %v2041_v59 = vsel %vm2038_vm5, %v2040_v17, %v2036_v31  ;;  %v2044_v42 = vmul.f32 %v2556_v61, %v2027_v55  ;;  %vm2049_vm6 = vweird.f32 %v2556_v61  ;;  %v2558_v56 = vpop.eup %2557  ;;  %v2094_v17 = vperm.slane %v2574_v36, 7 }
0x1009   :  { %v2058_v38 = vmul.f32 1.0614054, %v2041_v59  ;;  %vm2050_vm8 = vmor %vm2048_vm7, %vm2049_vm6  ;;  %vm2260_vm5 = vcmp.eq.s32.totalorder %v2712_v18, 0  ;;  %vm2264_vm6 = vcmask 7168   ;;  %vm2279_vm7 = vcmask 0  }
0x100a   :  { %v2045_v63 = vsub.f32 1.0, %v2044_v42  ;;  %v2560_v26 = vpop.eup %2559 }
0x100b   :  { %v2060_v8 = vadd.f32 -1.4531521, %v2058_v38 }
0x100c   :  { %v2046_v43 = vmul.f32 %v2556_v61, %v2045_v63 }
0x100d   :  { %v2062_v39 = vmul.f32 %v2060_v8, %v2041_v59 }
0x100e   :  { %v2047_v40 = vadd.f32 %v2556_v61, %v2046_v43 }
0x100f   :  { %v2064_v49 = vadd.f32 1.4214138, %v2062_v39 }
0x1010   :  { %v2051_v23 = vsel %vm2050_vm8, %v2556_v61, %v2047_v40 }
0x1011   :  { %v2066_v16 = vmul.f32 %v2064_v49, %v2041_v59  ;;  %v2056_v33 = vsel %vm2053_vm9, %v2055_v25, %v2051_v23  ;;  %v2123_v25 = vld [vmem:[%s3602_s5 + $0x18] sm:$0xff]  ;;  %v2121_v23 = vld [vmem:[%s3602_s5 + $0x8] sm:$0xff] }
0x1012   :  { %v2059_v21 = vmul.f32 1.0614054, %v2056_v33  ;;  %2193 = vmatpush.msrb.mxu0 %v2123_v25 }
0x1013   :  { %v2068_v34 = vadd.f32 -0.28449672, %v2066_v16  ;;  %v2120_v16 = vld [vmem:[%s3602_s5] sm:$0xff] }
0x1014   :  { %v2061_v20 = vadd.f32 -1.4531521, %v2059_v21  ;;  %2194 = vmatpush.msrb.mxu0 %v2122_v3 }
0x1015   :  { %v2070_v29 = vmul.f32 %v2068_v34, %v2041_v59 }
0x1016   :  { %v2063_v45 = vmul.f32 %v2061_v20, %v2056_v33  ;;  %2195 = vmatpush.msrb.mxu0 %v2121_v23 }
0x1017   :  { %v2072_v46 = vadd.f32 0.2548296, %v2070_v29 }
0x1018   :  { %v2065_v60 = vadd.f32 1.4214138, %v2063_v45  ;;  %2196 = vmatpush.msrb.mxu0 %v2120_v16 }
0x1019   :  { %v2074_v48 = vmul.f32 %v2072_v46, %v2041_v59 }
0x101a   :  { %v2067_v62 = vmul.f32 %v2065_v60, %v2056_v33 }
0x101b   :  { %v2084_v0 = vmul.f32 %v2558_v56, %v2074_v48  ;;  %v2124_v48 = vld [vmem:[%s3602_s5 + $0x20] sm:$0x3]  ;;  %s2639_s5 = smov [#allocation2]  }
0x101c   :  { %v2069_v1 = vadd.f32 -0.28449672, %v2067_v62  ;;  %s2285_s9 = sshll.u32 %s2639_s5, 4  ;;  %s2286_s9 = int_to_ptr.vmem [resolvable:$true] %s2285_s9 }
0x101d   :  { %v2086_v47 = vsub.f32 1.0, %v2084_v0  ;;  %v2169_v0 = vperm.slane %v2124_v48, 0 }
0x101e   :  { %v2071_v5 = vmul.f32 %v2069_v1, %v2056_v33 }
0x101f   :  { %v2088_v9 = vmul.f32 %v2086_v47, %v2020_v54 }
0x1020   :  { %v2073_v10 = vadd.f32 0.2548296, %v2071_v5  ;;  %v2172_v5 = vperm.slane %v2124_v48, 1 }
0x1021   :  { %v2090_v19 = vadd.f32 1.0, %v2088_v9 }
0x1022   :  { %v2075_v55 = vmul.f32 %v2073_v10, %v2056_v33 }
0x1023   :  { %v2092_v11 = vmul.f32 %v2090_v19, %v2014_v6 }
0x1024   :  { %v2085_v13 = vmul.f32 %v2560_v26, %v2075_v55 }
0x1025   :  { %2111 = vmatmul.f32.vlgmr.msra.gmra.mxu3 %v2092_v11 }
0x1026   :  { %v2087_v50 = vsub.f32 1.0, %v2085_v13 }
0x1028   :  { %v2089_v57 = vmul.f32 %v2087_v50, %v2021_v58 }
0x102a   :  { %v2091_v22 = vadd.f32 1.0, %v2089_v57 }
0x102c   :  { %v2093_v7 = vmul.f32 %v2091_v22, %v2015_v15 }
0x102e   :  { %2114 = vmatmul.f32.gmra.mxu3 %v2093_v7 }
0x10a8   :  { %v2112_v61 = vpop.f32.mrf.mxu3 }
0x10a9   :  { %v2113_v31 = vadd.f32 %v2112_v61, %v2094_v17 }
0x10ab   :  { %v2118_v4 = vadd.f32 %v2113_v31, %v3443_v41 }
0x10ad   :  { %v2125_v59 = vsel %vm59_vm0, %v2118_v4, 0.0 }
0x10ae   :  { %2126 = vadd.xlane.f32.xlu1 %v2125_v59 }
0x10b1   :  { %v2115_v37 = vpop.f32.mrf.mxu3 }
0x10b2   :  { %v2116_v27 = vadd.f32 %v2115_v37, %v2094_v17 }
0x10b4   :  { %v2119_v42 = vadd.f32 %v2116_v27, %v3448_v51  ;;  %v2316_v51 = vld [vmem:[%s3597_s0 + $0x4] sm:$0x3] }
0x10b5   :  { %v2230_v49 = vperm.slane %v2316_v51, 0  ;;  %v2237_v7 = vperm.slane %v2316_v51, 1 }
0x10b6   :  { %v2128_v44 = vsel %vm59_vm0, %v2119_v42, 0.0 }
0x10b7   :  { %2129 = vadd.xlane.f32.xlu0 %v2128_v44 }
0x1121   :  { %v2127_v38 = vpop.xlane.xlu1 %2126 }
0x1122   :  { %v2131_v63 = vmul.f32 %v2127_v38, %v2729_v35 }
0x1124   :  { %v2133_v8 = vsub.f32 %v2118_v4, %v2131_v63 }
0x1126   :  { %v2135_v53 = vmul.f32 %v2133_v8, %v2133_v8 }
0x1128   :  { %v2137_v2 = vsel %vm59_vm0, %v2135_v53, 0.0 }
0x1129   :  { %2138 = vadd.xlane.f32.xlu2 %v2137_v2 }
0x112a   :  { %v2130_v43 = vpop.xlane.xlu0 %2129 }
0x112b   :  { %v2132_v41 = vmul.f32 %v2130_v43, %v2729_v35 }
0x112d   :  { %v2134_v28 = vsub.f32 %v2119_v42, %v2132_v41 }
0x112f   :  { %v2136_v39 = vmul.f32 %v2134_v28, %v2134_v28 }
0x1131   :  { %v2140_v40 = vsel %vm59_vm0, %v2136_v39, 0.0 }
0x1132   :  { %2141 = vadd.xlane.f32.xlu1 %v2140_v40 }
0x114b   :  { %2235 = vperm.xlu1 %2432, %v2230_v49  }
0x119c   :  { %v2139_v32 = vpop.xlane.xlu2 %2138 }
0x119d   :  { %v2143_v33 = vmul.f32 %v2139_v32, %v2729_v35 }
0x119f   :  { %v2145_v21 = vadd.f32 1e-05, %v2143_v33 }
0x11a1   :  { %2561 = vrsqrt.f32 %v2145_v21  ;;  %vm2153_vm4 = vweird.f32 %v2145_v21 }
0x11a5   :  { %v2142_v34 = vpop.xlane.xlu1 %2141 }
0x11a6   :  { %v2144_v20 = vmul.f32 %v2142_v34, %v2729_v35 }
0x11a7   :  { %v2562_v29 = vpop.eup %2561 }
0x11a8   :  { %v2148_v30 = vmul.f32 %v2562_v29, %v2145_v21  ;;  %v2146_v45 = vadd.f32 1e-05, %v2144_v20  ;;  %vm2154_vm3 = vweird.f32 %v2562_v29 }
0x11a9   :  { %vm2155_vm11 = vmor %vm2153_vm4, %vm2154_vm3 }
0x11aa   :  { %v2149_v46 = vmul.f32 %v2562_v29, %v2148_v30  ;;  %2563 = vrsqrt.f32 %v2146_v45  ;;  %vm2163_vm14 = vweird.f32 %v2146_v45 }
0x11ac   :  { %v2150_v60 = vmul.f32 0.5, %v2149_v46 }
0x11ae   :  { %v2151_v52 = vsub.f32 1.5, %v2150_v60 }
0x11b0   :  { %v2564_v56 = vpop.eup %2563  ;;  %v2152_v62 = vmul.f32 %v2562_v29, %v2151_v52 }
0x11b1   :  { %v2158_v1 = vmul.f32 %v2564_v56, %v2146_v45  ;;  %vm2164_vm13 = vweird.f32 %v2564_v56 }
0x11b2   :  { %v2156_v47 = vsel %vm2155_vm11, %v2562_v29, %v2152_v62  ;;  %vm2165_vm15 = vmor %vm2163_vm14, %vm2164_vm13 }
0x11b3   :  { %v2167_v35 = vmul.f32 %v2156_v47, %v2133_v8  ;;  %v2159_v54 = vmul.f32 %v2564_v56, %v2158_v1 }
0x11b5   :  { %v2170_v9 = vmul.f32 %v2169_v0, %v2167_v35  ;;  %v2160_v10 = vmul.f32 0.5, %v2159_v54 }
0x11b7   :  { %v2161_v6 = vsub.f32 1.5, %v2160_v10  ;;  %v2173_v19 = vadd.f32 %v2172_v5, %v2170_v9 }
0x11b9   :  { %v2162_v55 = vmul.f32 %v2564_v56, %v2161_v6  ;;  %2410 = vmatmul.msk.f32.vlgmr.msrb.gmra.mxu0 %vm59_vm0, %v2173_v19 }
0x11bb   :  { %v2166_v26 = vsel %vm2165_vm15, %v2564_v56, %v2162_v55 }
0x11bc   :  { %v2168_v11 = vmul.f32 %v2166_v26, %v2134_v28 }
0x11bd   :  { %v2236_v42 = vpop.permute.xlu1 %2235 }
0x11be   :  { %v2171_v13 = vmul.f32 %v2169_v0, %v2168_v11  ;;  %vm2244_vm2 = vcmp.eq.s32.totalorder %v2704_v12, %v2236_v42 }
0x11bf   :  { %v2412_v2 = vsel %vm2244_vm2, 1.0, %v2627_v14 }
0x11c0   :  { %v2174_v50 = vadd.f32 %v2172_v5, %v2171_v13 }
0x11c2   :  { %2411 = vmatmul.msk.f32.gmra.mxu0 %vm59_vm0, %v2174_v50 }
0x1236   :  { %v2198_v58 = vpop.f32.mrf.mxu0 }
0x1237   :  { %2204 = vst.msk [vmem:[#allocation2] sm:$0xff] %vm59_vm0, %v2198_v58  ;;  %v2206_v57 = vsel %vm59_vm0, %v2198_v58, -inf  ;;  %v2250_v41 = vmul.f32 %v2412_v2, %v2198_v58 }
0x1238   :  { %2207 = vmax.xlane.f32.xlu0 %v2206_v57 }
0x1239   :  { %v2252_v28 = vsel %vm59_vm0, %v2250_v41, 0.0 }
0x123f   :  { %v2201_v15 = vpop.f32.mrf.mxu0 }
0x1240   :  { %2205 = vst.msk [vmem:[#allocation2 + $0x8] sm:$0xff] %vm59_vm0, %v2201_v15  ;;  %v2209_v22 = vsel %vm59_vm0, %v2201_v15, -inf }
0x1241   :  { %2210 = vmax.xlane.f32.xlu2 %v2209_v22  ;;  %2293 = dma.vmem_to_hbm [thread:$0]  %s2286_s9, 256, %s2288_s12, [#allocation3], %s2640_s13, %s2640_s13, %s2635_s29  }
0x124c   :  { %2242 = vperm.xlu0 %2431, %v2237_v7  }
0x12ab   :  { %v2208_v36 = vpop.xlane.xlu0 %2207 }
0x12ac   :  { %v2212_v17 = vsub.f32 %v2198_v58, %v2208_v36 }
0x12ae   :  { %v2214_v61 = vmul.f32 1.442695, %v2212_v17 }
0x12b0   :  { %2565 = vpow2.f32 %v2214_v61 }
0x12b4   :  { %v2211_v31 = vpop.xlane.xlu2 %2210 }
0x12b5   :  { %v2213_v4 = vsub.f32 %v2201_v15, %v2211_v31 }
0x12b6   :  { %v2566_v59 = vpop.eup %2565 }
0x12b7   :  { %v2216_v37 = vmul.f32 1.442695, %v2213_v4  ;;  %v2218_v27 = vsel %vm59_vm0, %v2566_v59, 0.0 }
0x12b8   :  { %2219 = vadd.xlane.f32.xlu2 %v2218_v27 }
0x12b9   :  { %2567 = vpow2.f32 %v2216_v37 }
0x12be   :  { %v2243_v44 = vpop.permute.xlu0 %2242 }
0x12bf   :  { %v2568_v38 = vpop.eup %2567  ;;  %vm2245_vm1 = vcmp.eq.s32.totalorder %v2704_v12, %v2243_v44 }
0x12c0   :  { %v2413_v63 = vsel %vm2245_vm1, 1.0, %v2627_v14  ;;  %v2221_v8 = vsel %vm59_vm0, %v2568_v38, 0.0 }
0x12c1   :  { %2222 = vadd.xlane.f32.xlu2 %v2221_v8  ;;  %v2251_v53 = vmul.f32 %v2413_v63, %v2201_v15 }
0x12c3   :  { %v2255_v43 = vsel %vm59_vm0, %v2251_v53, 0.0  ;;  %vm2261_vm0 = vcmp.eq.s32.totalorder %v2722_v24, 0 }
0x12c4   :  { %2256 = vadd.xlane.f32.xlu0 %v2255_v43 }
0x12c9   :  { %2253 = vadd.xlane.f32.xlu2 %v2252_v28 }
0x132b   :  { %v2220_v39 = vpop.xlane.xlu2 %2219 }
0x132c   :  { %2569 = vlog2.f32 %v2220_v39 }
0x1332   :  { %v2570_v40 = vpop.eup %2569 }
0x1333   :  { %v2225_v12 = vmul.f32 0.6931472, %v2570_v40 }
0x1334   :  { %v2223_v51 = vpop.xlane.xlu2 %2222 }
0x1335   :  { %2571 = vlog2.f32 %v2223_v51  ;;  %v2228_v25 = vadd.f32 %v2225_v12, %v2208_v36 }
0x1337   :  { %v2257_v14 = vpop.xlane.xlu0 %2256 }
0x133b   :  { %v2572_v49 = vpop.eup %2571 }
0x133c   :  { %v2227_v3 = vmul.f32 0.6931472, %v2572_v49  ;;  %v2254_v23 = vpop.xlane.xlu2 %2253 }
0x133d   :  { %v2258_v16 = vsub.f32 %v2228_v25, %v2254_v23 }
0x133e   :  { %v2229_v32 = vadd.f32 %v2227_v3, %v2211_v31 }
0x133f   :  { %v2262_v21 = vsel %vm2260_vm5, 0.0, %v2258_v16 }
0x1340   :  { %v2259_v33 = vsub.f32 %v2229_v32, %v2257_v14  ;;  %v2265_v20 = vsel %vm2264_vm6, %v2262_v21, 0.0 }
0x1342   :  { %v2263_v34 = vsel %vm2261_vm0, 0.0, %v2259_v33 }
0x1343   :  { %v2266_v29 = vsel %vm2264_vm6, %v2263_v34, 0.0 }
0x1344   :  { %v2267_v30 = vadd.f32 %v2266_v29, %v2265_v20 }
0x1346   :  { %2268 = vadd.xlane.f32.xlu1 %v2267_v30 }
0x13b9   :  { %v2269_v18 = vpop.xlane.xlu1 %2268 }
0x13ba   :  { %v2270_v45 = vrot.slane %v2269_v18, 4 }
0x13bc   :  { %v2271_v46 = vadd.f32 %v2270_v45, %v2269_v18 }
0x13be   :  { %v2272_v24 = vrot.slane %v2271_v46, 2 }
0x13c0   :  { %v2273_v60 = vadd.f32 %v2272_v24, %v2271_v46 }
0x13c2   :  { %v2274_v48 = vrot.slane %v2273_v60, 1 }
0x13c4   :  { %v2275_v52 = vadd.f32 %v2274_v48, %v2273_v60 }
0x13c6   :  { %2414 = vpush %v2275_v52 }
0x13f7   :  { %s2415_s6 = spop %2414 }
0x13f8   :  { %s2277_s17 = smul.f32 0.0625, %s2415_s6 }
0x13fa   :  { %v2278_v56 = vstv %s2277_s17 }
0x13fb   :  { %2280 = vst.msk [vmem:[#allocation4] sm:$0x1] %vm2279_vm7, %v2278_v56 }
0x13fc   :  { %2304 = dma.vmem_to_hbm [thread:$0]  %s2300_s14, 16, %s2302_s16, [#allocation5]  }
0x13fd   :  { %2623 = dma.done.wait [#allocation3], 256  }
0x13fe   :  { %2624 = vsyncadd [#allocation3], 4294967040 }
0x13ff   :  { %2625 = dma.done.wait [#allocation5], 16  }
0x1400   :  { %2626 = vsyncadd [#allocation5], 4294967280 }
0x1401   :  { %2313 = vsyncpa [#allocation3], 1 }
0x1402   :  { %2314 = vsyncpa [#allocation5], 1 }

</bundles_post_ra>
